<compile_context>
chip_gen: v6e
topology: v6e:2x2x1
jax: 0.10.0
libtpu: 0.0.40
codegen_flags: <defaults>
</compile_context>

<pallas_src>
import jax
import jax.numpy as jnp
from jax.experimental import pallas as pl
from jax.experimental.pallas import tpu as pltpu

SENSOR_IN = 1024       # 4 * 16 * 16
SENSOR_OUT = 1024
MC1_OUT = 256
MC2_OUT = 256
LATENT = SENSOR_OUT + MC1_OUT + MC2_OUT   # 1536
HEAD_PAD = 128                            # lane-padded fused head width
TM_MAX = 256                              # MXU is 256 rows on v6e/v7x
TM_ALIGN = 32                             # multiple of bf16 sublane tile (16)


def brain_kernel(x_ref, ws_ref, bs_ref, w1_ref, b1_ref,
                 w2a_ref, w2b_ref, b2_ref,
                 whs_ref, wh1_ref, wh2_ref, bh_ref,
                 heads_ref, latent_ref):
    # ---- sensor: linear(1024->1024) + ReLU (x already bf16 from wrapper) --
    s = jnp.maximum(
        jnp.dot(x_ref[...], ws_ref[...], preferred_element_type=jnp.float32)
        + bs_ref[...], 0.0)                                   # [TM, 1024] f32
    s_bf = s.astype(jnp.bfloat16)

    # ---- mini_column1.initial_step: linear(1024->256) + tanh --------------
    h1 = jnp.tanh(
        jnp.dot(s_bf, w1_ref[...], preferred_element_type=jnp.float32)
        + b1_ref[...])                                        # [TM, 256] f32
    h1_bf = h1.astype(jnp.bfloat16)

    # ---- mini_column2.initial_step on cat(sensor, mc1) --------------------
    # cat(s, h1) @ w2  ==  s @ w2a + h1 @ w2b   (no VMEM concat round-trip)
    h2 = jnp.tanh(
        jnp.dot(s_bf, w2a_ref[...], preferred_element_type=jnp.float32)
        + jnp.dot(h1_bf, w2b_ref[...], preferred_element_type=jnp.float32)
        + b2_ref[...])                                        # [TM, 256] f32
    h2_bf = h2.astype(jnp.bfloat16)

    # ---- latent_state = cat(sensor, mc1, mc2): bf16, lane-aligned stores --
    latent_ref[:, 0:SENSOR_OUT] = s_bf
    latent_ref[:, SENSOR_OUT:SENSOR_OUT + MC1_OUT] = h1_bf
    latent_ref[:, SENSOR_OUT + MC1_OUT:] = h2_bf

    # ---- motor_unit (PPOSplit) fused policy+value head --------------------
    # cat(s, h1, h2) @ wh == s @ wh_s + h1 @ wh_1 + h2 @ wh_2
    heads_ref[...] = (
        jnp.dot(s_bf, whs_ref[...], preferred_element_type=jnp.float32)
        + jnp.dot(h1_bf, wh1_ref[...], preferred_element_type=jnp.float32)
        + jnp.dot(h2_bf, wh2_ref[...], preferred_element_type=jnp.float32)
        + bh_ref[...])


def init_params(key, out_sz):
    ks = jax.random.split(key, 6)
    scale = 0.02

    def w(k, shape):
        return (scale * jax.random.normal(k, shape, jnp.float32)).astype(jnp.bfloat16)

    ws = w(ks[0], (SENSOR_IN, SENSOR_OUT))
    bs = jnp.zeros((1, SENSOR_OUT), jnp.float32)
    w1 = w(ks[1], (SENSOR_OUT, MC1_OUT))
    b1 = jnp.zeros((1, MC1_OUT), jnp.float32)
    # mc2 weight (1280 x 256) split into the sensor part and the mc1 part.
    w2a = w(ks[2], (SENSOR_OUT, MC2_OUT))
    w2b = w(ks[3], (MC1_OUT, MC2_OUT))
    b2 = jnp.zeros((1, MC2_OUT), jnp.float32)
    # fused policy+value head (LATENT x HEAD_PAD), lane-padded to 128:
    #   cols [0:out_sz] = policy logits, col out_sz = value, rest = 0.
    wh = jnp.zeros((LATENT, HEAD_PAD), jnp.float32)
    wh = wh.at[:, :out_sz].set(
        scale * jax.random.normal(ks[4], (LATENT, out_sz), jnp.float32))
    wh = wh.at[:, out_sz].set(
        scale * jax.random.normal(ks[5], (LATENT,), jnp.float32))
    wh = wh.astype(jnp.bfloat16)
    # split to match the latent pieces (sensor / mc1 / mc2)
    wh_s = wh[:SENSOR_OUT]
    wh_1 = wh[SENSOR_OUT:SENSOR_OUT + MC1_OUT]
    wh_2 = wh[SENSOR_OUT + MC1_OUT:]
    bh = jnp.zeros((1, HEAD_PAD), jnp.float32)
    return dict(ws=ws, bs=bs, w1=w1, b1=b1, w2a=w2a, w2b=w2b, b2=b2,
                wh_s=wh_s, wh_1=wh_1, wh_2=wh_2, bh=bh)


def _round_up(n, m):
    return ((n + m - 1) // m) * m


def brain_forward(x, reward, done, params, out_sz):
    """Equivalent of Brain.forward(x, reward, done), batched over rows of x."""
    # TODO(synk): the PPO training update (uses reward/done) has no
    # forward-pass compute; only the action/value computation is implemented.
    del reward, done
    B = x.shape[0]
    # cast to bf16 in the wrapper: halves input DMA, removes in-kernel cast
    x_flat = x.reshape(B, -1).astype(jnp.bfloat16)            # [B, 1024]

    # Row tile: as large as the MXU row dim (256) but never bigger than the
    # (32-aligned) batch so tiny batches don't pay for padded rows.
    TM = min(TM_MAX, _round_up(B, TM_ALIGN))
    Bp = _round_up(B, TM)
    if Bp != B:
        x_flat = jnp.pad(x_flat, ((0, Bp - B), (0, 0)))
    num_tiles = Bp // TM

    const = lambda i: (0, 0)          # weights: same block every grid step
    row = lambda i: (i, 0)            # x / outputs: index by grid position

    # Weight-DMA-bound at small batch: keep work on one core unless each core
    # would get several row tiles (avoids duplicating the weight fetch per
    # TensorCore on v7x).
    semantics = ("parallel",) if num_tiles >= 8 else ("arbitrary",)

    heads, latent = pl.pallas_call(
        brain_kernel,
        out_shape=(
            jax.ShapeDtypeStruct((Bp, HEAD_PAD), jnp.float32),
            jax.ShapeDtypeStruct((Bp, LATENT), jnp.bfloat16),
        ),
        grid=(num_tiles,),
        in_specs=[
            pl.BlockSpec((TM, SENSOR_IN), row),                 # x (bf16)
            pl.BlockSpec((SENSOR_IN, SENSOR_OUT), const),       # ws
            pl.BlockSpec((1, SENSOR_OUT), const),               # bs
            pl.BlockSpec((SENSOR_OUT, MC1_OUT), const),         # w1
            pl.BlockSpec((1, MC1_OUT), const),                  # b1
            pl.BlockSpec((SENSOR_OUT, MC2_OUT), const),         # w2a
            pl.BlockSpec((MC1_OUT, MC2_OUT), const),            # w2b
            pl.BlockSpec((1, MC2_OUT), const),                  # b2
            pl.BlockSpec((SENSOR_OUT, HEAD_PAD), const),        # wh_s
            pl.BlockSpec((MC1_OUT, HEAD_PAD), const),           # wh_1
            pl.BlockSpec((MC2_OUT, HEAD_PAD), const),           # wh_2
            pl.BlockSpec((1, HEAD_PAD), const),                 # bh
        ],
        out_specs=(
            pl.BlockSpec((TM, HEAD_PAD), row),
            pl.BlockSpec((TM, LATENT), row),
        ),
        compiler_params=pltpu.CompilerParams(
            dimension_semantics=semantics,
            vmem_limit_bytes=32 << 20,
        ),
    )(x_flat, params["ws"], params["bs"], params["w1"], params["b1"],
      params["w2a"], params["w2b"], params["b2"],
      params["wh_s"], params["wh_1"], params["wh_2"], params["bh"])

    logits = heads[:B, :out_sz]                 # [B, out_sz]
    value = heads[:B, out_sz]                   # [B]
    # TODO(synk): real PPOSplit.act_and_train samples Categorical(logits);
    # deterministic argmax is used as the acting policy stand-in here.
    action = jnp.argmax(logits, axis=-1)        # [B]
    return action, logits, value, latent[:B]


if __name__ == "__main__":
    key = jax.random.PRNGKey(0)
    k_x, k_p = jax.random.split(key)

    out_sz = 6                                   # Atari-style action space
    batch = 16
    x = jax.random.normal(k_x, (batch, 4, 16, 16), jnp.float32)   # NCHW
    reward = jnp.zeros((batch,), jnp.float32)
    done = jnp.zeros((batch,), jnp.bool_)

    params = init_params(k_p, out_sz)
    action, logits, value, latent = brain_forward(x, reward, done, params, out_sz)
    jax.block_until_ready((action, logits, value, latent))

    assert action.shape == (batch,)
    assert logits.shape == (batch, out_sz)
    assert value.shape == (batch,)
    assert latent.shape == (batch, LATENT)
    print("KERNEL_OK")
</pallas_src>

<mosaic_0001>
module attributes {stable_mosaic.version = 11 : i64} {
  func.func @brain_kernel(%arg0: i32, %arg1: memref<32x1024xbf16, #tpu.memory_space<vmem>>, %arg2: memref<1024x1024xbf16, #tpu.memory_space<vmem>>, %arg3: memref<1x1024xf32, #tpu.memory_space<vmem>>, %arg4: memref<1024x256xbf16, #tpu.memory_space<vmem>>, %arg5: memref<1x256xf32, #tpu.memory_space<vmem>>, %arg6: memref<1024x256xbf16, #tpu.memory_space<vmem>>, %arg7: memref<256x256xbf16, #tpu.memory_space<vmem>>, %arg8: memref<1x256xf32, #tpu.memory_space<vmem>>, %arg9: memref<1024x128xbf16, #tpu.memory_space<vmem>>, %arg10: memref<256x128xbf16, #tpu.memory_space<vmem>>, %arg11: memref<256x128xbf16, #tpu.memory_space<vmem>>, %arg12: memref<1x128xf32, #tpu.memory_space<vmem>>, %arg13: memref<32x128xf32, #tpu.memory_space<vmem>>, %arg14: memref<32x1536xbf16, #tpu.memory_space<vmem>>) attributes {dimension_semantics = [#tpu.dimension_semantics<arbitrary>], iteration_bounds = array<i64: 1>, scalar_prefetch = 0 : i64, scratch_operands = 0 : i64, tpu.core_type = #tpu.core_type<tc>, window_params = [{transform_indices = @transform_0, window_bounds = array<i64: 32, 1024>}, {pipeline_mode = #tpu.pipeline_mode<synchronous>, transform_indices = @transform_1, window_bounds = array<i64: 1024, 1024>}, {pipeline_mode = #tpu.pipeline_mode<synchronous>, transform_indices = @transform_2, window_bounds = array<i64: 1, 1024>}, {pipeline_mode = #tpu.pipeline_mode<synchronous>, transform_indices = @transform_3, window_bounds = array<i64: 1024, 256>}, {pipeline_mode = #tpu.pipeline_mode<synchronous>, transform_indices = @transform_4, window_bounds = array<i64: 1, 256>}, {pipeline_mode = #tpu.pipeline_mode<synchronous>, transform_indices = @transform_5, window_bounds = array<i64: 1024, 256>}, {pipeline_mode = #tpu.pipeline_mode<synchronous>, transform_indices = @transform_6, window_bounds = array<i64: 256, 256>}, {pipeline_mode = #tpu.pipeline_mode<synchronous>, transform_indices = @transform_7, window_bounds = array<i64: 1, 256>}, {pipeline_mode = #tpu.pipeline_mode<synchronous>, transform_indices = @transform_8, window_bounds = array<i64: 1024, 128>}, {pipeline_mode = #tpu.pipeline_mode<synchronous>, transform_indices = @transform_9, window_bounds = array<i64: 256, 128>}, {pipeline_mode = #tpu.pipeline_mode<synchronous>, transform_indices = @transform_10, window_bounds = array<i64: 256, 128>}, {pipeline_mode = #tpu.pipeline_mode<synchronous>, transform_indices = @transform_11, window_bounds = array<i64: 1, 128>}, {transform_indices = @transform_12, window_bounds = array<i64: 32, 128>}, {transform_indices = @transform_13, window_bounds = array<i64: 32, 1536>}]} {
    %c0 = arith.constant 0 : index
    %c0_0 = arith.constant 0 : index
    %0 = vector.load %arg1[%c0, %c0_0] : memref<32x1024xbf16, #tpu.memory_space<vmem>>, vector<32x1024xbf16>
    %c0_1 = arith.constant 0 : index
    %c0_2 = arith.constant 0 : index
    %1 = vector.load %arg2[%c0_1, %c0_2] : memref<1024x1024xbf16, #tpu.memory_space<vmem>>, vector<1024x1024xbf16>
    %cst = arith.constant dense<0.000000e+00> : vector<32x1024xf32>
    %2 = tpu.matmul %0, %1, %cst {dimension_numbers = #tpu.dot_dimension_numbers<[1], [0], [0], [1], [0, 0, 1, 1], [], []>} : vector<32x1024xbf16>, vector<1024x1024xbf16>, vector<32x1024xf32> -> vector<32x1024xf32>
    %c0_3 = arith.constant 0 : index
    %c0_4 = arith.constant 0 : index
    %3 = vector.load %arg3[%c0_3, %c0_4] : memref<1x1024xf32, #tpu.memory_space<vmem>>, vector<1x1024xf32>
    %4 = vector.broadcast %3 : vector<1x1024xf32> to vector<32x1024xf32>
    %5 = arith.addf %2, %4 : vector<32x1024xf32>
    %cst_5 = arith.constant 0.000000e+00 : f32
    %6 = vector.broadcast %cst_5 : f32 to vector<32x1024xf32>
    %7 = arith.maximumf %5, %6 : vector<32x1024xf32>
    %8 = arith.truncf %7 : vector<32x1024xf32> to vector<32x1024xbf16>
    %c0_6 = arith.constant 0 : index
    %c0_7 = arith.constant 0 : index
    %9 = vector.load %arg4[%c0_6, %c0_7] : memref<1024x256xbf16, #tpu.memory_space<vmem>>, vector<1024x256xbf16>
    %cst_8 = arith.constant dense<0.000000e+00> : vector<32x256xf32>
    %10 = tpu.matmul %8, %9, %cst_8 {dimension_numbers = #tpu.dot_dimension_numbers<[1], [0], [0], [1], [0, 0, 1, 1], [], []>} : vector<32x1024xbf16>, vector<1024x256xbf16>, vector<32x256xf32> -> vector<32x256xf32>
    %c0_9 = arith.constant 0 : index
    %c0_10 = arith.constant 0 : index
    %11 = vector.load %arg5[%c0_9, %c0_10] : memref<1x256xf32, #tpu.memory_space<vmem>>, vector<1x256xf32>
    %12 = vector.broadcast %11 : vector<1x256xf32> to vector<32x256xf32>
    %13 = arith.addf %10, %12 : vector<32x256xf32>
    %14 = math.tanh %13 : vector<32x256xf32>
    %15 = arith.truncf %14 : vector<32x256xf32> to vector<32x256xbf16>
    %c0_11 = arith.constant 0 : index
    %c0_12 = arith.constant 0 : index
    %16 = vector.load %arg6[%c0_11, %c0_12] : memref<1024x256xbf16, #tpu.memory_space<vmem>>, vector<1024x256xbf16>
    %cst_13 = arith.constant dense<0.000000e+00> : vector<32x256xf32>
    %17 = tpu.matmul %8, %16, %cst_13 {dimension_numbers = #tpu.dot_dimension_numbers<[1], [0], [0], [1], [0, 0, 1, 1], [], []>} : vector<32x1024xbf16>, vector<1024x256xbf16>, vector<32x256xf32> -> vector<32x256xf32>
    %c0_14 = arith.constant 0 : index
    %c0_15 = arith.constant 0 : index
    %18 = vector.load %arg7[%c0_14, %c0_15] : memref<256x256xbf16, #tpu.memory_space<vmem>>, vector<256x256xbf16>
    %cst_16 = arith.constant dense<0.000000e+00> : vector<32x256xf32>
    %19 = tpu.matmul %15, %18, %cst_16 {dimension_numbers = #tpu.dot_dimension_numbers<[1], [0], [0], [1], [0, 0, 1, 1], [], []>} : vector<32x256xbf16>, vector<256x256xbf16>, vector<32x256xf32> -> vector<32x256xf32>
    %20 = arith.addf %17, %19 : vector<32x256xf32>
    %c0_17 = arith.constant 0 : index
    %c0_18 = arith.constant 0 : index
    %21 = vector.load %arg8[%c0_17, %c0_18] : memref<1x256xf32, #tpu.memory_space<vmem>>, vector<1x256xf32>
    %22 = vector.broadcast %21 : vector<1x256xf32> to vector<32x256xf32>
    %23 = arith.addf %20, %22 : vector<32x256xf32>
    %24 = math.tanh %23 : vector<32x256xf32>
    %25 = arith.truncf %24 : vector<32x256xf32> to vector<32x256xbf16>
    %c0_19 = arith.constant 0 : index
    %c0_20 = arith.constant 0 : index
    %26 = vector.load %arg14[%c0_19, %c0_20] : memref<32x1536xbf16, #tpu.memory_space<vmem>>, vector<32x1024xbf16>
    tpu.vector_store %arg14[%c0_19, %c0_20], %8 {strides = array<i32>} : memref<32x1536xbf16, #tpu.memory_space<vmem>>, vector<32x1024xbf16>,
    %c0_21 = arith.constant 0 : index
    %c1024 = arith.constant 1024 : index
    %27 = vector.load %arg14[%c0_21, %c1024] : memref<32x1536xbf16, #tpu.memory_space<vmem>>, vector<32x256xbf16>
    tpu.vector_store %arg14[%c0_21, %c1024], %15 {strides = array<i32>} : memref<32x1536xbf16, #tpu.memory_space<vmem>>, vector<32x256xbf16>,
    %c0_22 = arith.constant 0 : index
    %c1280 = arith.constant 1280 : index
    %28 = vector.load %arg14[%c0_22, %c1280] : memref<32x1536xbf16, #tpu.memory_space<vmem>>, vector<32x256xbf16>
    tpu.vector_store %arg14[%c0_22, %c1280], %25 {strides = array<i32>} : memref<32x1536xbf16, #tpu.memory_space<vmem>>, vector<32x256xbf16>,
    %c0_23 = arith.constant 0 : index
    %c0_24 = arith.constant 0 : index
    %29 = vector.load %arg9[%c0_23, %c0_24] : memref<1024x128xbf16, #tpu.memory_space<vmem>>, vector<1024x128xbf16>
    %cst_25 = arith.constant dense<0.000000e+00> : vector<32x128xf32>
    %30 = tpu.matmul %8, %29, %cst_25 {dimension_numbers = #tpu.dot_dimension_numbers<[1], [0], [0], [1], [0, 0, 1, 1], [], []>} : vector<32x1024xbf16>, vector<1024x128xbf16>, vector<32x128xf32> -> vector<32x128xf32>
    %c0_26 = arith.constant 0 : index
    %c0_27 = arith.constant 0 : index
    %31 = vector.load %arg10[%c0_26, %c0_27] : memref<256x128xbf16, #tpu.memory_space<vmem>>, vector<256x128xbf16>
    %cst_28 = arith.constant dense<0.000000e+00> : vector<32x128xf32>
    %32 = tpu.matmul %15, %31, %cst_28 {dimension_numbers = #tpu.dot_dimension_numbers<[1], [0], [0], [1], [0, 0, 1, 1], [], []>} : vector<32x256xbf16>, vector<256x128xbf16>, vector<32x128xf32> -> vector<32x128xf32>
    %33 = arith.addf %30, %32 : vector<32x128xf32>
    %c0_29 = arith.constant 0 : index
    %c0_30 = arith.constant 0 : index
    %34 = vector.load %arg11[%c0_29, %c0_30] : memref<256x128xbf16, #tpu.memory_space<vmem>>, vector<256x128xbf16>
    %cst_31 = arith.constant dense<0.000000e+00> : vector<32x128xf32>
    %35 = tpu.matmul %25, %34, %cst_31 {dimension_numbers = #tpu.dot_dimension_numbers<[1], [0], [0], [1], [0, 0, 1, 1], [], []>} : vector<32x256xbf16>, vector<256x128xbf16>, vector<32x128xf32> -> vector<32x128xf32>
    %36 = arith.addf %33, %35 : vector<32x128xf32>
    %c0_32 = arith.constant 0 : index
    %c0_33 = arith.constant 0 : index
    %37 = vector.load %arg12[%c0_32, %c0_33] : memref<1x128xf32, #tpu.memory_space<vmem>>, vector<1x128xf32>
    %38 = vector.broadcast %37 : vector<1x128xf32> to vector<32x128xf32>
    %39 = arith.addf %36, %38 : vector<32x128xf32>
    %c0_34 = arith.constant 0 : index
    %c0_35 = arith.constant 0 : index
    %40 = vector.load %arg13[%c0_34, %c0_35] : memref<32x128xf32, #tpu.memory_space<vmem>>, vector<32x128xf32>
    tpu.vector_store %arg13[%c0_34, %c0_35], %39 {strides = array<i32>} : memref<32x128xf32, #tpu.memory_space<vmem>>, vector<32x128xf32>,
    return
  }
  func.func @transform_0(%arg0: i32) -> (i32, i32) {
    %c0_i32 = arith.constant 0 : i32
    %c0_i32_0 = arith.constant 0 : i32
    return %arg0, %c0_i32 : i32, i32
  }
  func.func @transform_1(%arg0: i32) -> (i32, i32) {
    %c0_i32 = arith.constant 0 : i32
    %c0_i32_0 = arith.constant 0 : i32
    %c0_i32_1 = arith.constant 0 : i32
    return %c0_i32, %c0_i32_0 : i32, i32
  }
  func.func @transform_2(%arg0: i32) -> (i32, i32) {
    %c0_i32 = arith.constant 0 : i32
    %c0_i32_0 = arith.constant 0 : i32
    %c0_i32_1 = arith.constant 0 : i32
    return %c0_i32, %c0_i32_0 : i32, i32
  }
  func.func @transform_3(%arg0: i32) -> (i32, i32) {
    %c0_i32 = arith.constant 0 : i32
    %c0_i32_0 = arith.constant 0 : i32
    %c0_i32_1 = arith.constant 0 : i32
    return %c0_i32, %c0_i32_0 : i32, i32
  }
  func.func @transform_4(%arg0: i32) -> (i32, i32) {
    %c0_i32 = arith.constant 0 : i32
    %c0_i32_0 = arith.constant 0 : i32
    %c0_i32_1 = arith.constant 0 : i32
    return %c0_i32, %c0_i32_0 : i32, i32
  }
  func.func @transform_5(%arg0: i32) -> (i32, i32) {
    %c0_i32 = arith.constant 0 : i32
    %c0_i32_0 = arith.constant 0 : i32
    %c0_i32_1 = arith.constant 0 : i32
    return %c0_i32, %c0_i32_0 : i32, i32
  }
  func.func @transform_6(%arg0: i32) -> (i32, i32) {
    %c0_i32 = arith.constant 0 : i32
    %c0_i32_0 = arith.constant 0 : i32
    %c0_i32_1 = arith.constant 0 : i32
    return %c0_i32, %c0_i32_0 : i32, i32
  }
  func.func @transform_7(%arg0: i32) -> (i32, i32) {
    %c0_i32 = arith.constant 0 : i32
    %c0_i32_0 = arith.constant 0 : i32
    %c0_i32_1 = arith.constant 0 : i32
    return %c0_i32, %c0_i32_0 : i32, i32
  }
  func.func @transform_8(%arg0: i32) -> (i32, i32) {
    %c0_i32 = arith.constant 0 : i32
    %c0_i32_0 = arith.constant 0 : i32
    %c0_i32_1 = arith.constant 0 : i32
    return %c0_i32, %c0_i32_0 : i32, i32
  }
  func.func @transform_9(%arg0: i32) -> (i32, i32) {
    %c0_i32 = arith.constant 0 : i32
    %c0_i32_0 = arith.constant 0 : i32
    %c0_i32_1 = arith.constant 0 : i32
    return %c0_i32, %c0_i32_0 : i32, i32
  }
  func.func @transform_10(%arg0: i32) -> (i32, i32) {
    %c0_i32 = arith.constant 0 : i32
    %c0_i32_0 = arith.constant 0 : i32
    %c0_i32_1 = arith.constant 0 : i32
    return %c0_i32, %c0_i32_0 : i32, i32
  }
  func.func @transform_11(%arg0: i32) -> (i32, i32) {
    %c0_i32 = arith.constant 0 : i32
    %c0_i32_0 = arith.constant 0 : i32
    %c0_i32_1 = arith.constant 0 : i32
    return %c0_i32, %c0_i32_0 : i32, i32
  }
  func.func @transform_12(%arg0: i32) -> (i32, i32) {
    %c0_i32 = arith.constant 0 : i32
    %c0_i32_0 = arith.constant 0 : i32
    return %arg0, %c0_i32 : i32, i32
  }
  func.func @transform_13(%arg0: i32) -> (i32, i32) {
    %c0_i32 = arith.constant 0 : i32
    %c0_i32_0 = arith.constant 0 : i32
    return %arg0, %c0_i32 : i32, i32
  }
}

</mosaic_0001>

<bundles_post_ra>
// kernel: tpu_custom_call.1
= control target key start
LH: loop header
LB: loop body
LE: loop exit
PB: predicated region body
PF: predicated region fallthrough
CT: control target
= control target key end

     0   :  { %19 = vsyncpa [#allocation3], 0  ;;  %s10542_s0 = inlined_call_operand.hbm [shape: bf16[32,1024], index: 0, kind: input, shape index: {}]   ;;  %s10543_s1 = inlined_call_operand.hbm [shape: bf16[1024,1024], index: 1, kind: input, shape index: {}]   ;;  %s10544_s2 = inlined_call_operand.hbm [shape: f32[1,1024], index: 2, kind: input, shape index: {}]   ;;  %s10545_s3 = inlined_call_operand.hbm [shape: bf16[1024,256], index: 3, kind: input, shape index: {}]   ;;  %s10546_s4 = inlined_call_operand.hbm [shape: f32[1,256], index: 4, kind: input, shape index: {}]   ;;  %s10547_s5 = inlined_call_operand.hbm [shape: bf16[1024,256], index: 5, kind: input, shape index: {}]   ;;  %s10548_s6 = inlined_call_operand.hbm [shape: bf16[256,256], index: 6, kind: input, shape index: {}]   ;;  %s10549_s7 = inlined_call_operand.hbm [shape: f32[1,256], index: 7, kind: input, shape index: {}]   ;;  %s10550_s8 = inlined_call_operand.hbm [shape: bf16[1024,128], index: 8, kind: input, shape index: {}]   ;;  %s10551_s9 = inlined_call_operand.hbm [shape: bf16[256,128], index: 9, kind: input, shape index: {}]   ;;  %s10552_s10 = inlined_call_operand.hbm [shape: bf16[256,128], index: 10, kind: input, shape index: {}]   ;;  %s10553_s11 = inlined_call_operand.hbm [shape: f32[1,128], index: 11, kind: input, shape index: {}]   ;;  %s10554_s12 = inlined_call_operand.hbm [shape: f32[32,128], index: 12, kind: output, shape index: {0}]   ;;  %s10555_s13 = inlined_call_operand.hbm [shape: bf16[32,1536], index: 13, kind: output, shape index: {1}]  }
   0x1   :  { %20 = vsyncpa [#allocation6], 0 }
   0x2   :  { %21 = vsyncpa [#allocation9], 0 }
   0x3   :  { %22 = vsyncpa [#allocation12], 0 }
   0x4   :  { %23 = vsyncpa [#allocation15], 0 }
   0x5   :  { %24 = vsyncpa [#allocation18], 0 }
   0x6   :  { %25 = vsyncpa [#allocation21], 0 }
   0x7   :  { %26 = vsyncpa [#allocation4], 0 }
   0x8   :  { %27 = vsyncpa [#allocation24], 0  ;;  %s9843_s25 = smov [#allocation5]   ;;  %s9844_s27 = smov [#allocation8]  }
   0x9   :  { %s45_s26 = sshll.u32 %s9843_s25, 4  ;;  %s67_s28 = sshll.u32 %s9844_s27, 4  ;;  %s46_s26 = int_to_ptr.vmem [resolvable:$true] %s45_s26  ;;  %s68_s28 = int_to_ptr.vmem [resolvable:$true] %s67_s28 }
   0xa   :  { %s9553_s29 = scalar_lea.vmem %s46_s26, 65536  ;;  %p9558_p1 = scmp.lt.s32.totalorder %s46_s26, %s46_s26 }
   0xb   :  { %p9554_p0 = scmp.ne.s32.totalorder %s46_s26, %s9553_s29  ;;  %p9559_p2 = scmp.lt.s32.totalorder %s9553_s29, %s9553_s29 }
   0xd   :  { %p9560_p3 = por %p9559_p2, %p9558_p1 }
   0xf   :  { %p9561_p4 = pnand %p9560_p3, %p9554_p0 }
  0x11   :  { %9564 = shalt.err (!%p9561_p4)
}
  0x12   :  { %s9845_s30 = smov 512   ;;  %s9846_s14 = smov 32  }
  0x13   :  { %51 = dma.hbm_to_vmem [thread:$0]  %s10543_s1, 65536, %s46_s26, [#allocation6], %s9845_s30, %s9845_s30, %s9846_s14  }
  0x14   :  { %s9573_s17 = scalar_lea.vmem %s68_s28, 16384  ;;  %p9578_p6 = scmp.lt.s32.totalorder %s68_s28, %s68_s28 }
  0x15   :  { %p9574_p5 = scmp.ne.s32.totalorder %s68_s28, %s9573_s17  ;;  %p9579_p7 = scmp.lt.s32.totalorder %s9573_s17, %s9573_s17 }
  0x17   :  { %p9580_p8 = por %p9579_p7, %p9578_p6 }
  0x19   :  { %p9581_p9 = pnand %p9580_p8, %p9574_p5 }
  0x1b   :  { %9584 = shalt.err (!%p9581_p9)
}
  0x1c   :  { %s9847_s18 = smov 128   ;;  %s9848_s19 = smov 8  }
  0x1d   :  { %73 = dma.hbm_to_vmem [thread:$0]  %s10545_s3, 16384, %s68_s28, [#allocation9], %s9847_s18, %s9847_s18, %s9848_s19  }
  0x1e   :  { %s9849_s22 = smov [#allocation11]   ;;  %s9850_s24 = smov [#allocation14]  }
  0x1f   :  { %s89_s23 = sshll.u32 %s9849_s22, 4  ;;  %s114_s1 = sshll.u32 %s9850_s24, 4  ;;  %s90_s23 = int_to_ptr.vmem [resolvable:$true] %s89_s23  ;;  %s115_s1 = int_to_ptr.vmem [resolvable:$true] %s114_s1 }
  0x20   :  { %s9593_s25 = scalar_lea.vmem %s90_s23, 16384  ;;  %p9598_p11 = scmp.lt.s32.totalorder %s90_s23, %s90_s23 }
  0x21   :  { %p9594_p10 = scmp.ne.s32.totalorder %s90_s23, %s9593_s25  ;;  %p9599_p12 = scmp.lt.s32.totalorder %s9593_s25, %s9593_s25 }
  0x23   :  { %p9600_p13 = por %p9599_p12, %p9598_p11 }
  0x25   :  { %p9601_p0 = pnand %p9600_p13, %p9594_p10 }
  0x27   :  { %9604 = shalt.err (!%p9601_p0)
}
  0x28   :  { %95 = dma.hbm_to_vmem [thread:$0]  %s10547_s5, 16384, %s90_s23, [#allocation12], %s9847_s18, %s9847_s18, %s9848_s19  }
  0x29   :  { %s9613_s3 = scalar_lea.vmem %s115_s1, 32  ;;  %p9618_p2 = scmp.lt.s32.totalorder %s115_s1, %s115_s1 }
  0x2a   :  { %p9614_p1 = scmp.ne.s32.totalorder %s115_s1, %s9613_s3  ;;  %p9619_p3 = scmp.lt.s32.totalorder %s9613_s3, %s9613_s3 }
  0x2c   :  { %p9620_p4 = por %p9619_p3, %p9618_p2 }
  0x2e   :  { %p9621_p5 = pnand %p9620_p4, %p9614_p1 }
  0x30   :  { %9624 = shalt.err (!%p9621_p5)
}
  0x31   :  { %117 = dma.hbm_to_vmem [thread:$0]  %s10549_s7, 32, %s115_s1, [#allocation15]  }
  0x32   :  { %s9851_s15 = smov [#allocation17]   ;;  %s9852_s17 = smov [#allocation2]  }
  0x33   :  { %s135_s16 = sshll.u32 %s9851_s15, 4  ;;  %s33_s20 = sshll.u32 %s9852_s17, 4  ;;  %s136_s16 = int_to_ptr.vmem [resolvable:$true] %s135_s16  ;;  %s34_s20 = int_to_ptr.vmem [resolvable:$true] %s33_s20 }
  0x34   :  { %s9633_s21 = scalar_lea.vmem %s136_s16, 2048  ;;  %p9638_p7 = scmp.lt.s32.totalorder %s136_s16, %s136_s16 }
  0x35   :  { %p9634_p6 = scmp.ne.s32.totalorder %s136_s16, %s9633_s21  ;;  %p9639_p8 = scmp.lt.s32.totalorder %s9633_s21, %s9633_s21 }
  0x37   :  { %p9640_p9 = por %p9639_p8, %p9638_p7 }
  0x39   :  { %p9641_p10 = pnand %p9640_p9, %p9634_p6 }
  0x3b   :  { %9644 = shalt.err (!%p9641_p10)
}
  0x3c   :  { %s9853_s5 = smov 64   ;;  %s9854_s22 = smov 4  }
  0x3d   :  { %141 = dma.hbm_to_vmem [thread:$0]  %s10551_s9, 2048, %s136_s16, [#allocation18], %s9853_s5, %s9853_s5, %s9854_s22  }
  0x3e   :  { %s9653_s24 = scalar_lea.vmem %s34_s20, 2048  ;;  %p9658_p12 = scmp.lt.s32.totalorder %s34_s20, %s34_s20 }
  0x3f   :  { %p9654_p11 = scmp.ne.s32.totalorder %s34_s20, %s9653_s24  ;;  %p9659_p13 = scmp.lt.s32.totalorder %s9653_s24, %s9653_s24 }
  0x41   :  { %p9660_p0 = por %p9659_p13, %p9658_p12 }
  0x43   :  { %p9661_p1 = pnand %p9660_p0, %p9654_p11 }
  0x45   :  { %9664 = shalt.err (!%p9661_p1)
}
  0x46   :  { %39 = dma.hbm_to_vmem [thread:$0]  %s10542_s0, 2048, %s34_s20, [#allocation3], %s9845_s30, %s9845_s30, %s9846_s14  }
  0x47   :  { %s9855_s26 = smov [#allocation7]   ;;  %s9856_s3 = smov [#allocation10]  }
  0x48   :  { %s58_s27 = sshll.u32 %s9855_s26, 4  ;;  %s80_s28 = sshll.u32 %s9856_s3, 4  ;;  %s59_s27 = int_to_ptr.vmem [resolvable:$true] %s58_s27  ;;  %s81_s28 = int_to_ptr.vmem [resolvable:$true] %s80_s28 }
  0x49   :  { %s9673_s9 = scalar_lea.vmem %s59_s27, 128  ;;  %p9678_p3 = scmp.lt.s32.totalorder %s59_s27, %s59_s27 }
  0x4a   :  { %p9674_p2 = scmp.ne.s32.totalorder %s59_s27, %s9673_s9  ;;  %p9679_p4 = scmp.lt.s32.totalorder %s9673_s9, %s9673_s9 }
  0x4c   :  { %p9680_p5 = por %p9679_p4, %p9678_p3 }
  0x4e   :  { %p9681_p6 = pnand %p9680_p5, %p9674_p2 }
  0x50   :  { %9684 = shalt.err (!%p9681_p6)
}
  0x51   :  { %61 = dma.hbm_to_vmem [thread:$0]  %s10544_s2, 128, %s59_s27, [#allocation6]  }
  0x52   :  { %s9693_s16 = scalar_lea.vmem %s81_s28, 32  ;;  %p9698_p8 = scmp.lt.s32.totalorder %s81_s28, %s81_s28 }
  0x53   :  { %p9694_p7 = scmp.ne.s32.totalorder %s81_s28, %s9693_s16  ;;  %p9699_p9 = scmp.lt.s32.totalorder %s9693_s16, %s9693_s16 }
  0x55   :  { %p9700_p10 = por %p9699_p9, %p9698_p8 }
  0x57   :  { %p9701_p11 = pnand %p9700_p10, %p9694_p7 }
  0x59   :  { %9704 = shalt.err (!%p9701_p11)
}
  0x5a   :  { %83 = dma.hbm_to_vmem [thread:$0]  %s10546_s4, 32, %s81_s28, [#allocation9]  }
  0x5b   :  { %s9857_s14 = smov [#allocation13]   ;;  %s9858_s20 = smov [#allocation16]  }
  0x5c   :  { %s101_s17 = sshll.u32 %s9857_s14, 4  ;;  %s123_s21 = sshll.u32 %s9858_s20, 4  ;;  %s102_s17 = int_to_ptr.vmem [resolvable:$true] %s101_s17  ;;  %s124_s21 = int_to_ptr.vmem [resolvable:$true] %s123_s21 }
  0x5d   :  { %s9713_s23 = scalar_lea.vmem %s102_s17, 4096  ;;  %p9718_p13 = scmp.lt.s32.totalorder %s102_s17, %s102_s17 }
  0x5e   :  { %p9714_p12 = scmp.ne.s32.totalorder %s102_s17, %s9713_s23  ;;  %p9719_p0 = scmp.lt.s32.totalorder %s9713_s23, %s9713_s23 }
  0x60   :  { %p9720_p1 = por %p9719_p0, %p9718_p13 }
  0x62   :  { %p9721_p2 = pnand %p9720_p1, %p9714_p12 }
  0x64   :  { %9724 = shalt.err (!%p9721_p2)
}
  0x65   :  { %107 = dma.hbm_to_vmem [thread:$0]  %s10548_s6, 4096, %s102_s17, [#allocation12], %s9847_s18, %s9847_s18, %s9848_s19  }
  0x66   :  { %s9733_s4 = scalar_lea.vmem %s124_s21, 8192  ;;  %p9738_p4 = scmp.lt.s32.totalorder %s124_s21, %s124_s21 }
  0x67   :  { %p9734_p3 = scmp.ne.s32.totalorder %s124_s21, %s9733_s4  ;;  %p9739_p5 = scmp.lt.s32.totalorder %s9733_s4, %s9733_s4 }
  0x69   :  { %p9740_p6 = por %p9739_p5, %p9738_p4 }
  0x6b   :  { %p9741_p7 = pnand %p9740_p6, %p9734_p3 }
  0x6d   :  { %9744 = shalt.err (!%p9741_p7)
}
  0x6e   :  { %129 = dma.hbm_to_vmem [thread:$0]  %s10550_s8, 8192, %s124_s21, [#allocation15], %s9853_s5, %s9853_s5, %s9854_s22  }
  0x6f   :  { %s9859_s25 = smov [#allocation19]   ;;  %s9860_s27 = smov [#allocation20]  }
  0x70   :  { %s147_s26 = sshll.u32 %s9859_s25, 4  ;;  %s160_s3 = sshll.u32 %s9860_s27, 4  ;;  %s148_s26 = int_to_ptr.vmem [resolvable:$true] %s147_s26  ;;  %s161_s3 = int_to_ptr.vmem [resolvable:$true] %s160_s3 }
  0x71   :  { %s9753_s6 = scalar_lea.vmem %s148_s26, 2048  ;;  %p9758_p9 = scmp.lt.s32.totalorder %s148_s26, %s148_s26 }
  0x72   :  { %p9754_p8 = scmp.ne.s32.totalorder %s148_s26, %s9753_s6  ;;  %p9759_p10 = scmp.lt.s32.totalorder %s9753_s6, %s9753_s6 }
  0x74   :  { %p9760_p11 = por %p9759_p10, %p9758_p9 }
  0x76   :  { %p9761_p12 = pnand %p9760_p11, %p9754_p8 }
  0x78   :  { %9764 = shalt.err (!%p9761_p12)
}
  0x79   :  { %153 = dma.hbm_to_vmem [thread:$0]  %s10552_s10, 2048, %s148_s26, [#allocation18], %s9853_s5, %s9853_s5, %s9854_s22  }
  0x7a   :  { %s9773_s8 = scalar_lea.vmem %s161_s3, 16  ;;  %s9777_s29 = scalar_lea.vmem %s161_s3, 32 }
  0x7b   :  { %p9774_p13 = scmp.ne.s32.totalorder %s161_s3, %s9773_s8  ;;  %p9778_p0 = scmp.lt.s32.totalorder %s161_s3, %s161_s3 }
  0x7c   :  { %p9779_p1 = scmp.lt.s32.totalorder %s9777_s29, %s9773_s8 }
  0x7e   :  { %p9780_p2 = por %p9779_p1, %p9778_p0 }
  0x80   :  { %p9781_p3 = pnand %p9780_p2, %p9774_p13 }
  0x82   :  { %9784 = shalt.err (!%p9781_p3)
}
  0x83   :  { %163 = dma.hbm_to_vmem [thread:$0]  %s10553_s11, 16, %s161_s3, [#allocation21]  }
  0x84   :  { %9825 = dma.done.wait [#allocation3], 2048  }
  0x85   :  { %9826 = vsyncadd [#allocation3], 4294965248 }
  0x86   :  { %9827 = dma.done.wait [#allocation6], 65664  }
  0x87   :  { %9828 = vsyncadd [#allocation6], 4294901632 }
  0x88   :  { %9829 = dma.done.wait [#allocation9], 16416  }
  0x89   :  { %9830 = vsyncadd [#allocation9], 4294950880 }
  0x8a   :  { %9831 = dma.done.wait [#allocation12], 20480  }
  0x8b   :  { %9832 = vsyncadd [#allocation12], 4294946816 }
  0x8c   :  { %9833 = dma.done.wait [#allocation15], 8224  }
  0x8d   :  { %9834 = vsyncadd [#allocation15], 4294959072 }
  0x8e   :  { %9835 = dma.done.wait [#allocation18], 4096  }
  0x8f   :  { %9836 = vsyncadd [#allocation18], 4294963200 }
  0x90   :  { %9837 = dma.done.wait [#allocation21], 16  }
  0x91   :  { %9838 = vsyncadd [#allocation21], 4294967280  ;;  %v273_v0 = vld [vmem:[#allocation5 + $0x1c0] sm:$0xff]  ;;  %v10003_v59 = vld [vmem:[#allocation2 + $0x8] sm:$0xff]  ;;  %s9861_s10 = smov [#allocation23]  }
  0x92   :  { %v277_v1 = vld [vmem:[#allocation5 + $0x1e0] sm:$0xff]  ;;  %v10005_v60 = vld [vmem:[#allocation2 + $0x28] sm:$0xff]  ;;  %s7810_s11 = sshll.u32 %s9861_s10, 4  ;;  %s7811_s11 = int_to_ptr.vmem [resolvable:$true] %s7810_s11 }
  0x93   :  { %v401_v2 = vld [vmem:[#allocation5 + $0x5c0] sm:$0xff]  ;;  %v7905_v3 = vcombine.high %v273_v0, %v277_v1  ;;  %v7904_v5 = vcombine.low %v273_v0, %v277_v1  ;;  %v10009_v63 = vcombine.high %v10003_v59, %v10005_v60  ;;  %s9785_s5 = scalar_lea.vmem %s7811_s11, 3072  ;;  %p9790_p5 = scmp.lt.s32.totalorder %s7811_s11, %s7811_s11 }
  0x94   :  { %v405_v4 = vld [vmem:[#allocation5 + $0x5e0] sm:$0xff]  ;;  %p9786_p4 = scmp.ne.s32.totalorder %s7811_s11, %s9785_s5  ;;  %p9791_p6 = scmp.lt.s32.totalorder %s9785_s5, %s9785_s5 }
  0x95   :  { %v265_v6 = vld [vmem:[#allocation5 + $0x180] sm:$0xff]  ;;  %v8033_v8 = vcombine.high %v401_v2, %v405_v4  ;;  %v8032_v9 = vcombine.low %v401_v2, %v405_v4  ;;  %3411 = vmatprep.subr.bf16.mxu0 %v7905_v3  ;;  %3496 = vmatprep.mubr.bf16.mxu1 %v10009_v63 }
  0x96   :  { %v269_v7 = vld [vmem:[#allocation5 + $0x1a0] sm:$0xff]  ;;  %3412 = vmatpush1.bf16.msra.mxu0 %v7904_v5  ;;  %p9792_p7 = por %p9791_p6, %p9790_p5 }
  0x97   :  { %v7897_v10 = vcombine.high %v265_v6, %v269_v7  ;;  %v393_v11 = vld [vmem:[#allocation5 + $0x580] sm:$0xff]  ;;  %3464 = vmatprep.subr.bf16.mxu1 %v8033_v8  ;;  %v7896_v18 = vcombine.low %v265_v6, %v269_v7 }
  0x98   :  { %v397_v12 = vld [vmem:[#allocation5 + $0x5a0] sm:$0xff]  ;;  %3465 = vmatpush1.bf16.msra.mxu1 %v8032_v9  ;;  %p9793_p8 = pnand %p9792_p7, %p9786_p4 }
  0x99   :  { %v257_v13 = vld [vmem:[#allocation5 + $0x140] sm:$0xff]  ;;  %v8025_v14 = vcombine.high %v393_v11, %v397_v12  ;;  %3413 = vmatprep.subr.bf16.mxu0 %v7897_v10  ;;  %v8024_v19 = vcombine.low %v393_v11, %v397_v12 }
  0x9a   :  { %v261_v15 = vld [vmem:[#allocation5 + $0x160] sm:$0xff]  ;;  %3414 = vmatpush1.bf16.msra.mxu0 %v7896_v18 }
  0x9b   :  { %v385_v16 = vld [vmem:[#allocation5 + $0x540] sm:$0xff]  ;;  %v7889_v20 = vcombine.high %v257_v13, %v261_v15  ;;  %3466 = vmatprep.subr.bf16.mxu1 %v8025_v14  ;;  %v7888_v26 = vcombine.low %v257_v13, %v261_v15 }
  0x9c   :  { %v389_v17 = vld [vmem:[#allocation5 + $0x560] sm:$0xff]  ;;  %3467 = vmatpush1.bf16.msra.mxu1 %v8024_v19 }
  0x9d   :  { %v8017_v21 = vcombine.high %v385_v16, %v389_v17  ;;  %v249_v22 = vld [vmem:[#allocation5 + $0x100] sm:$0xff]  ;;  %3415 = vmatprep.subr.bf16.mxu0 %v7889_v20  ;;  %v8016_v27 = vcombine.low %v385_v16, %v389_v17 }
  0x9e   :  { %v253_v23 = vld [vmem:[#allocation5 + $0x120] sm:$0xff]  ;;  %3416 = vmatpush1.bf16.msra.mxu0 %v7888_v26 }
  0x9f   :  { %v377_v24 = vld [vmem:[#allocation5 + $0x500] sm:$0xff]  ;;  %v7881_v28 = vcombine.high %v249_v22, %v253_v23  ;;  %3468 = vmatprep.subr.bf16.mxu1 %v8017_v21  ;;  %v7880_v34 = vcombine.low %v249_v22, %v253_v23 }
  0xa0   :  { %v381_v25 = vld [vmem:[#allocation5 + $0x520] sm:$0xff]  ;;  %3469 = vmatpush1.bf16.msra.mxu1 %v8016_v27 }
  0xa1   :  { %v8009_v29 = vcombine.high %v377_v24, %v381_v25  ;;  %v241_v30 = vld [vmem:[#allocation5 + $0xc0] sm:$0xff]  ;;  %3417 = vmatprep.subr.bf16.mxu0 %v7881_v28  ;;  %v8008_v35 = vcombine.low %v377_v24, %v381_v25 }
  0xa2   :  { %v245_v31 = vld [vmem:[#allocation5 + $0xe0] sm:$0xff]  ;;  %3418 = vmatpush1.bf16.msra.mxu0 %v7880_v34 }
  0xa3   :  { %v369_v32 = vld [vmem:[#allocation5 + $0x4c0] sm:$0xff]  ;;  %v7873_v36 = vcombine.high %v241_v30, %v245_v31  ;;  %3470 = vmatprep.subr.bf16.mxu1 %v8009_v29  ;;  %v7872_v42 = vcombine.low %v241_v30, %v245_v31 }
  0xa4   :  { %v373_v33 = vld [vmem:[#allocation5 + $0x4e0] sm:$0xff]  ;;  %3471 = vmatpush1.bf16.msra.mxu1 %v8008_v35 }
  0xa5   :  { %v8001_v37 = vcombine.high %v369_v32, %v373_v33  ;;  %v233_v38 = vld [vmem:[#allocation5 + $0x80] sm:$0xff]  ;;  %3419 = vmatprep.subr.bf16.mxu0 %v7873_v36  ;;  %v8000_v43 = vcombine.low %v369_v32, %v373_v33 }
  0xa6   :  { %v237_v39 = vld [vmem:[#allocation5 + $0xa0] sm:$0xff]  ;;  %3420 = vmatpush1.bf16.msra.mxu0 %v7872_v42 }
  0xa7   :  { %v361_v40 = vld [vmem:[#allocation5 + $0x480] sm:$0xff]  ;;  %v7865_v44 = vcombine.high %v233_v38, %v237_v39  ;;  %3472 = vmatprep.subr.bf16.mxu1 %v8001_v37  ;;  %v7864_v50 = vcombine.low %v233_v38, %v237_v39 }
  0xa8   :  { %v365_v41 = vld [vmem:[#allocation5 + $0x4a0] sm:$0xff]  ;;  %3473 = vmatpush1.bf16.msra.mxu1 %v8000_v43 }
  0xa9   :  { %v7993_v45 = vcombine.high %v361_v40, %v365_v41  ;;  %v225_v46 = vld [vmem:[#allocation5 + $0x40] sm:$0xff]  ;;  %3421 = vmatprep.subr.bf16.mxu0 %v7865_v44  ;;  %v7992_v51 = vcombine.low %v361_v40, %v365_v41 }
  0xaa   :  { %v229_v47 = vld [vmem:[#allocation5 + $0x60] sm:$0xff]  ;;  %3422 = vmatpush1.bf16.msra.mxu0 %v7864_v50 }
  0xab   :  { %v353_v48 = vld [vmem:[#allocation5 + $0x440] sm:$0xff]  ;;  %v7857_v52 = vcombine.high %v225_v46, %v229_v47  ;;  %3474 = vmatprep.subr.bf16.mxu1 %v7993_v45  ;;  %v7856_v0 = vcombine.low %v225_v46, %v229_v47 }
  0xac   :  { %v357_v49 = vld [vmem:[#allocation5 + $0x460] sm:$0xff]  ;;  %3475 = vmatpush1.bf16.msra.mxu1 %v7992_v51 }
  0xad   :  { %v217_v53 = vld [vmem:[#allocation5] sm:$0xff]  ;;  %v7985_v56 = vcombine.high %v353_v48, %v357_v49  ;;  %3423 = vmatprep.subr.bf16.mxu0 %v7857_v52  ;;  %v7984_v1 = vcombine.low %v353_v48, %v357_v49 }
  0xae   :  { %v9995_v54 = vld [vmem:[#allocation2] sm:$0xff]  ;;  %3424 = vmatpush1.bf16.msra.mxu0 %v7856_v0 }
  0xaf   :  { %v9997_v55 = vld [vmem:[#allocation2 + $0x20] sm:$0xff]  ;;  %3476 = vmatprep.subr.bf16.mxu1 %v7985_v56 }
  0xb0   :  { %v221_v57 = vld [vmem:[#allocation5 + $0x20] sm:$0xff]  ;;  %v10001_v58 = vcombine.high %v9995_v54, %v9997_v55  ;;  %3477 = vmatpush1.bf16.msra.mxu1 %v7984_v1 }
  0xb1   :  { %v345_v61 = vld [vmem:[#allocation5 + $0x400] sm:$0xff]  ;;  %v7849_v2 = vcombine.high %v217_v53, %v221_v57  ;;  %v7848_v8 = vcombine.low %v217_v53, %v221_v57 }
  0xb2   :  { %v349_v62 = vld [vmem:[#allocation5 + $0x420] sm:$0xff]  ;;  %3443 = vmatprep.mubr.bf16.mxu0 %v10001_v58 }
  0xb3   :  { %v7977_v3 = vcombine.high %v345_v61, %v349_v62  ;;  %v337_v4 = vld [vmem:[#allocation5 + $0x3c0] sm:$0xff]  ;;  %3425 = vmatprep.subr.bf16.mxu0 %v7849_v2  ;;  %v7976_v9 = vcombine.low %v345_v61, %v349_v62 }
  0xb4   :  { %v341_v5 = vld [vmem:[#allocation5 + $0x3e0] sm:$0xff]  ;;  %3426 = vmatpush1.bf16.msra.mxu0 %v7848_v8 }
  0xb5   :  { %v465_v6 = vld [vmem:[#allocation5 + $0x7c0] sm:$0xff]  ;;  %v7969_v10 = vcombine.high %v337_v4, %v341_v5  ;;  %3478 = vmatprep.subr.bf16.mxu1 %v7977_v3  ;;  %v7968_v16 = vcombine.low %v337_v4, %v341_v5 }
  0xb6   :  { %v469_v7 = vld [vmem:[#allocation5 + $0x7e0] sm:$0xff]  ;;  %3479 = vmatpush1.bf16.msra.mxu1 %v7976_v9 }
  0xb7   :  { %v8097_v11 = vcombine.high %v465_v6, %v469_v7  ;;  %v329_v12 = vld [vmem:[#allocation5 + $0x380] sm:$0xff]  ;;  %3427 = vmatprep.subr.bf16.mxu0 %v7969_v10  ;;  %v8096_v17 = vcombine.low %v465_v6, %v469_v7 }
  0xb8   :  { %v333_v13 = vld [vmem:[#allocation5 + $0x3a0] sm:$0xff]  ;;  %3428 = vmatpush2.bf16.msra.mxu0 %v7968_v16 }
  0xb9   :  { %v457_v14 = vld [vmem:[#allocation5 + $0x780] sm:$0xff]  ;;  %v7961_v18 = vcombine.high %v329_v12, %v333_v13  ;;  %3480 = vmatprep.subr.bf16.mxu1 %v8097_v11  ;;  %v7960_v24 = vcombine.low %v329_v12, %v333_v13 }
  0xba   :  { %v461_v15 = vld [vmem:[#allocation5 + $0x7a0] sm:$0xff]  ;;  %3481 = vmatpush2.bf16.msra.mxu1 %v8096_v17 }
  0xbb   :  { %v8089_v19 = vcombine.high %v457_v14, %v461_v15  ;;  %v321_v20 = vld [vmem:[#allocation5 + $0x340] sm:$0xff]  ;;  %3429 = vmatprep.subr.bf16.mxu0 %v7961_v18  ;;  %v8088_v25 = vcombine.low %v457_v14, %v461_v15 }
  0xbc   :  { %v325_v21 = vld [vmem:[#allocation5 + $0x360] sm:$0xff]  ;;  %3430 = vmatpush2.bf16.msra.mxu0 %v7960_v24 }
  0xbd   :  { %v449_v22 = vld [vmem:[#allocation5 + $0x740] sm:$0xff]  ;;  %v7953_v26 = vcombine.high %v321_v20, %v325_v21  ;;  %3482 = vmatprep.subr.bf16.mxu1 %v8089_v19  ;;  %v7952_v32 = vcombine.low %v321_v20, %v325_v21  ;;  %v10015_v21 = vcombine.low %v9995_v54, %v9997_v55 }
  0xbe   :  { %v453_v23 = vld [vmem:[#allocation5 + $0x760] sm:$0xff]  ;;  %3483 = vmatpush2.bf16.msra.mxu1 %v8088_v25  ;;  %v10019_v25 = vcombine.low %v10003_v59, %v10005_v60 }
  0xbf   :  { %v8081_v27 = vcombine.high %v449_v22, %v453_v23  ;;  %v313_v28 = vld [vmem:[#allocation5 + $0x300] sm:$0xff]  ;;  %3431 = vmatprep.subr.bf16.mxu0 %v7953_v26  ;;  %v8080_v33 = vcombine.low %v449_v22, %v453_v23 }
  0xc0   :  { %v317_v29 = vld [vmem:[#allocation5 + $0x320] sm:$0xff]  ;;  %3432 = vmatpush2.bf16.msra.mxu0 %v7952_v32 }
  0xc1   :  { %v441_v30 = vld [vmem:[#allocation5 + $0x700] sm:$0xff]  ;;  %v7945_v34 = vcombine.high %v313_v28, %v317_v29  ;;  %3484 = vmatprep.subr.bf16.mxu1 %v8081_v27  ;;  %v7944_v40 = vcombine.low %v313_v28, %v317_v29  ;;  %v210_v27 = vld [vmem:[#allocation2 + $0x48] sm:$0xff] }
  0xc2   :  { %v445_v31 = vld [vmem:[#allocation5 + $0x720] sm:$0xff]  ;;  %3485 = vmatpush2.bf16.msra.mxu1 %v8080_v33  ;;  %v214_v28 = vld [vmem:[#allocation2 + $0x68] sm:$0xff] }
  0xc3   :  { %v8073_v35 = vcombine.high %v441_v30, %v445_v31  ;;  %v305_v36 = vld [vmem:[#allocation5 + $0x2c0] sm:$0xff]  ;;  %3433 = vmatprep.subr.bf16.mxu0 %v7945_v34  ;;  %v8072_v41 = vcombine.low %v441_v30, %v445_v31 }
  0xc4   :  { %v309_v37 = vld [vmem:[#allocation5 + $0x2e0] sm:$0xff]  ;;  %3434 = vmatpush2.bf16.msra.mxu0 %v7944_v40 }
  0xc5   :  { %v433_v38 = vld [vmem:[#allocation5 + $0x6c0] sm:$0xff]  ;;  %v7937_v42 = vcombine.high %v305_v36, %v309_v37  ;;  %3486 = vmatprep.subr.bf16.mxu1 %v8073_v35  ;;  %v7936_v48 = vcombine.low %v305_v36, %v309_v37  ;;  %v10024_v35 = vcombine.high %v210_v27, %v214_v28 }
  0xc6   :  { %v437_v39 = vld [vmem:[#allocation5 + $0x6e0] sm:$0xff]  ;;  %3487 = vmatpush2.bf16.msra.mxu1 %v8072_v41 }
  0xc7   :  { %v8065_v43 = vcombine.high %v433_v38, %v437_v39  ;;  %v297_v44 = vld [vmem:[#allocation5 + $0x280] sm:$0xff]  ;;  %3435 = vmatprep.subr.bf16.mxu0 %v7937_v42  ;;  %v8064_v49 = vcombine.low %v433_v38, %v437_v39  ;;  %v10028_v42 = vld [vmem:[#allocation2 + $0x10] sm:$0xff] }
  0xc8   :  { %v301_v45 = vld [vmem:[#allocation5 + $0x2a0] sm:$0xff]  ;;  %3436 = vmatpush2.bf16.msra.mxu0 %v7936_v48  ;;  %v10039_v48 = vcombine.low %v210_v27, %v214_v28 }
  0xc9   :  { %v425_v46 = vld [vmem:[#allocation5 + $0x680] sm:$0xff]  ;;  %v7929_v50 = vcombine.high %v297_v44, %v301_v45  ;;  %3488 = vmatprep.subr.bf16.mxu1 %v8065_v43  ;;  %v7928_v61 = vcombine.low %v297_v44, %v301_v45  ;;  %v10033_v44 = vld [vmem:[#allocation2 + $0x30] sm:$0xff]  ;;  %v10035_v45 = vld [vmem:[#allocation2 + $0x18] sm:$0xff] }
  0xca   :  { %v429_v47 = vld [vmem:[#allocation5 + $0x6a0] sm:$0xff]  ;;  %3489 = vmatpush2.bf16.msra.mxu1 %v8064_v49 }
  0xcb   :  { %v8057_v51 = vcombine.high %v425_v46, %v429_v47  ;;  %v289_v52 = vld [vmem:[#allocation5 + $0x240] sm:$0xff]  ;;  %3437 = vmatprep.subr.bf16.mxu0 %v7929_v50  ;;  %v8056_v62 = vcombine.low %v425_v46, %v429_v47  ;;  %v10037_v46 = vld [vmem:[#allocation2 + $0x38] sm:$0xff] }
  0xcc   :  { %v293_v53 = vld [vmem:[#allocation5 + $0x260] sm:$0xff]  ;;  %3438 = vmatpush2.bf16.msra.mxu0 %v7928_v61  ;;  %v10043_v61 = vcombine.high %v10028_v42, %v10033_v44 }
  0xcd   :  { %v417_v56 = vld [vmem:[#allocation5 + $0x640] sm:$0xff]  ;;  %v7921_v0 = vcombine.high %v289_v52, %v293_v53  ;;  %3490 = vmatprep.subr.bf16.mxu1 %v8057_v51  ;;  %v7920_v6 = vcombine.low %v289_v52, %v293_v53 }
  0xce   :  { %v421_v57 = vld [vmem:[#allocation5 + $0x660] sm:$0xff]  ;;  %3491 = vmatpush2.bf16.msra.mxu1 %v8056_v62  ;;  %v10048_v62 = vcombine.high %v10035_v45, %v10037_v46 }
  0xcf   :  { %v8049_v1 = vcombine.high %v417_v56, %v421_v57  ;;  %v281_v2 = vld [vmem:[#allocation5 + $0x200] sm:$0xff]  ;;  %3439 = vmatprep.subr.bf16.mxu0 %v7921_v0  ;;  %v8048_v7 = vcombine.low %v417_v56, %v421_v57 }
  0xd0   :  { %v285_v3 = vld [vmem:[#allocation5 + $0x220] sm:$0xff]  ;;  %3440 = vmatpush2.bf16.msra.mxu0 %v7920_v6 }
  0xd1   :  { %v409_v4 = vld [vmem:[#allocation5 + $0x600] sm:$0xff]  ;;  %v7913_v8 = vcombine.high %v281_v2, %v285_v3  ;;  %3492 = vmatprep.subr.bf16.mxu1 %v8049_v1  ;;  %v7912_v14 = vcombine.low %v281_v2, %v285_v3 }
  0xd2   :  { %v413_v5 = vld [vmem:[#allocation5 + $0x620] sm:$0xff]  ;;  %3493 = vmatpush2.bf16.msra.mxu1 %v8048_v7 }
  0xd3   :  { %v8041_v9 = vcombine.high %v409_v4, %v413_v5  ;;  %v529_v10 = vld [vmem:[#allocation5 + $0x9c0] sm:$0xff]  ;;  %3441 = vmatprep.subr.bf16.mxu0 %v7913_v8  ;;  %v8040_v15 = vcombine.low %v409_v4, %v413_v5 }
  0xd4   :  { %v533_v11 = vld [vmem:[#allocation5 + $0x9e0] sm:$0xff]  ;;  %3442 = vmatpush2.bf16.msra.mxu0 %v7912_v14 }
  0xd5   :  { %v657_v12 = vld [vmem:[#allocation5 + $0xdc0] sm:$0xff]  ;;  %v8161_v16 = vcombine.high %v529_v10, %v533_v11  ;;  %3494 = vmatprep.subr.bf16.mxu1 %v8041_v9  ;;  %v8160_v26 = vcombine.low %v529_v10, %v533_v11 }
  0xd6   :  { %v661_v13 = vld [vmem:[#allocation5 + $0xde0] sm:$0xff]  ;;  %3495 = vmatpush2.bf16.msra.mxu1 %v8040_v15 }
  0xd7   :  { %v8289_v17 = vcombine.high %v657_v12, %v661_v13  ;;  %v521_v18 = vld [vmem:[#allocation5 + $0x980] sm:$0xff]  ;;  %3517 = vmatprep.subr.bf16.mxu0 %v8161_v16  ;;  %v8288_v29 = vcombine.low %v657_v12, %v661_v13  ;;  %3444 = vmatmul.mubr.bf16.vlgmr.msra.gmra.mxu0 %v10015_v21 }
  0xd8   :  { %v525_v19 = vld [vmem:[#allocation5 + $0x9a0] sm:$0xff]  ;;  %3518 = vmatpush1.bf16.msra.mxu0 %v8160_v26 }
  0xd9   :  { %v649_v20 = vld [vmem:[#allocation5 + $0xd80] sm:$0xff]  ;;  %v8153_v30 = vcombine.high %v521_v18, %v525_v19  ;;  %3570 = vmatprep.subr.bf16.mxu1 %v8289_v17  ;;  %3497 = vmatmul.mubr.bf16.vlgmr.msra.gmra.mxu1 %v10019_v25  ;;  %v8152_v59 = vcombine.low %v521_v18, %v525_v19 }
  0xda   :  { %v653_v22 = vld [vmem:[#allocation5 + $0xda0] sm:$0xff]  ;;  %3571 = vmatpush1.bf16.msra.mxu1 %v8288_v29  ;;  %3506 = vmatprep.mubr.bf16.mxu1 %v10024_v35 }
  0xdb   :  { %v209_v23 = vld [vmem:[#allocation2 + $0x40] sm:$0xff]  ;;  %v8281_v31 = vcombine.high %v649_v20, %v653_v22  ;;  %3519 = vmatprep.subr.bf16.mxu0 %v8153_v30  ;;  %v8280_v60 = vcombine.low %v649_v20, %v653_v22 }
  0xdc   :  { %v213_v24 = vld [vmem:[#allocation2 + $0x60] sm:$0xff]  ;;  %3520 = vmatpush1.bf16.msra.mxu0 %v8152_v59 }
  0xdd   :  { %v513_v32 = vld [vmem:[#allocation5 + $0x940] sm:$0xff]  ;;  %v10021_v55 = vcombine.high %v209_v23, %v213_v24  ;;  %3572 = vmatprep.subr.bf16.mxu1 %v8281_v31  ;;  %v10030_v43 = vcombine.low %v209_v23, %v213_v24 }
  0xde   :  { %v517_v54 = vld [vmem:[#allocation5 + $0x960] sm:$0xff]  ;;  %3573 = vmatpush1.bf16.msra.mxu1 %v8280_v60 }
  0xdf   :  { %v641_v33 = vld [vmem:[#allocation5 + $0xd40] sm:$0xff]  ;;  %v8145_v36 = vcombine.high %v513_v32, %v517_v54  ;;  %3453 = vmatprep.mubr.bf16.mxu0 %v10021_v55  ;;  %v8144_v47 = vcombine.low %v513_v32, %v517_v54 }
  0xe0   :  { %v645_v34 = vld [vmem:[#allocation5 + $0xd60] sm:$0xff]  ;;  %3454 = vmatmul.mubr.bf16.gmra.mxu0 %v10030_v43 }
  0xe1   :  { %v505_v37 = vld [vmem:[#allocation5 + $0x900] sm:$0xff]  ;;  %v8273_v39 = vcombine.high %v641_v33, %v645_v34  ;;  %3521 = vmatprep.subr.bf16.mxu0 %v8145_v36  ;;  %v8272_v49 = vcombine.low %v641_v33, %v645_v34  ;;  %3507 = vmatmul.mubr.bf16.gmra.mxu1 %v10039_v48 }
  0xe2   :  { %v509_v38 = vld [vmem:[#allocation5 + $0x920] sm:$0xff]  ;;  %3522 = vmatpush1.bf16.msra.mxu0 %v8144_v47  ;;  %3549 = vmatprep.mubr.bf16.mxu0 %v10043_v61 }
  0xe3   :  { %v633_v40 = vld [vmem:[#allocation5 + $0xd00] sm:$0xff]  ;;  %v8137_v50 = vcombine.high %v505_v37, %v509_v38  ;;  %3574 = vmatprep.subr.bf16.mxu1 %v8273_v39  ;;  %v8136_v0 = vcombine.low %v505_v37, %v509_v38  ;;  %3602 = vmatprep.mubr.bf16.mxu1 %v10048_v62 }
  0xe4   :  { %v637_v41 = vld [vmem:[#allocation5 + $0xd20] sm:$0xff]  ;;  %3575 = vmatpush1.bf16.msra.mxu1 %v8272_v49 }
  0xe5   :  { %v497_v51 = vld [vmem:[#allocation5 + $0x8c0] sm:$0xff]  ;;  %v8265_v56 = vcombine.high %v633_v40, %v637_v41  ;;  %3523 = vmatprep.subr.bf16.mxu0 %v8137_v50  ;;  %v8264_v1 = vcombine.low %v633_v40, %v637_v41 }
  0xe6   :  { %v501_v52 = vld [vmem:[#allocation5 + $0x8e0] sm:$0xff]  ;;  %3524 = vmatpush1.bf16.msra.mxu0 %v8136_v0 }
  0xe7   :  { %v625_v53 = vld [vmem:[#allocation5 + $0xcc0] sm:$0xff]  ;;  %v8129_v2 = vcombine.high %v497_v51, %v501_v52  ;;  %3576 = vmatprep.subr.bf16.mxu1 %v8265_v56  ;;  %v8128_v8 = vcombine.low %v497_v51, %v501_v52 }
  0xe8   :  { %v629_v57 = vld [vmem:[#allocation5 + $0xce0] sm:$0xff]  ;;  %3577 = vmatpush1.bf16.msra.mxu1 %v8264_v1 }
  0xe9   :  { %v489_v3 = vld [vmem:[#allocation5 + $0x880] sm:$0xff]  ;;  %v8257_v6 = vcombine.high %v625_v53, %v629_v57  ;;  %3525 = vmatprep.subr.bf16.mxu0 %v8129_v2  ;;  %v8256_v9 = vcombine.low %v625_v53, %v629_v57 }
  0xea   :  { %v493_v4 = vld [vmem:[#allocation5 + $0x8a0] sm:$0xff]  ;;  %3526 = vmatpush1.bf16.msra.mxu0 %v8128_v8 }
  0xeb   :  { %v617_v5 = vld [vmem:[#allocation5 + $0xc80] sm:$0xff]  ;;  %v8121_v10 = vcombine.high %v489_v3, %v493_v4  ;;  %3578 = vmatprep.subr.bf16.mxu1 %v8257_v6  ;;  %v8120_v16 = vcombine.low %v489_v3, %v493_v4 }
  0xec   :  { %v621_v7 = vld [vmem:[#allocation5 + $0xca0] sm:$0xff]  ;;  %3579 = vmatpush1.bf16.msra.mxu1 %v8256_v9 }
  0xed   :  { %v481_v11 = vld [vmem:[#allocation5 + $0x840] sm:$0xff]  ;;  %v8249_v14 = vcombine.high %v617_v5, %v621_v7  ;;  %3527 = vmatprep.subr.bf16.mxu0 %v8121_v10  ;;  %v8248_v17 = vcombine.low %v617_v5, %v621_v7 }
  0xee   :  { %v485_v12 = vld [vmem:[#allocation5 + $0x860] sm:$0xff]  ;;  %3528 = vmatpush1.bf16.msra.mxu0 %v8120_v16 }
  0xef   :  { %v609_v13 = vld [vmem:[#allocation5 + $0xc40] sm:$0xff]  ;;  %v8113_v18 = vcombine.high %v481_v11, %v485_v12  ;;  %3580 = vmatprep.subr.bf16.mxu1 %v8249_v14  ;;  %v8112_v26 = vcombine.low %v481_v11, %v485_v12 }
  0xf0   :  { %v613_v15 = vld [vmem:[#allocation5 + $0xc60] sm:$0xff]  ;;  %3581 = vmatpush1.bf16.msra.mxu1 %v8248_v17 }
  0xf1   :  { %v473_v19 = vld [vmem:[#allocation5 + $0x800] sm:$0xff]  ;;  %v8241_v23 = vcombine.high %v609_v13, %v613_v15  ;;  %3529 = vmatprep.subr.bf16.mxu0 %v8113_v18  ;;  %v8240_v27 = vcombine.low %v609_v13, %v613_v15 }
  0xf2   :  { %v477_v20 = vld [vmem:[#allocation5 + $0x820] sm:$0xff]  ;;  %3530 = vmatpush1.bf16.msra.mxu0 %v8112_v26 }
  0xf3   :  { %v601_v22 = vld [vmem:[#allocation5 + $0xc00] sm:$0xff]  ;;  %v8105_v28 = vcombine.high %v473_v19, %v477_v20  ;;  %3582 = vmatprep.subr.bf16.mxu1 %v8241_v23  ;;  %v8104_v33 = vcombine.low %v473_v19, %v477_v20 }
  0xf4   :  { %v605_v24 = vld [vmem:[#allocation5 + $0xc20] sm:$0xff]  ;;  %3583 = vmatpush1.bf16.msra.mxu1 %v8240_v27 }
  0xf5   :  { %v593_v29 = vld [vmem:[#allocation5 + $0xbc0] sm:$0xff]  ;;  %v8233_v32 = vcombine.high %v601_v22, %v605_v24  ;;  %3531 = vmatprep.subr.bf16.mxu0 %v8105_v28  ;;  %v8232_v34 = vcombine.low %v601_v22, %v605_v24 }
  0xf6   :  { %v597_v30 = vld [vmem:[#allocation5 + $0xbe0] sm:$0xff]  ;;  %3532 = vmatpush1.bf16.msra.mxu0 %v8104_v33 }
  0xf7   :  { %v721_v31 = vld [vmem:[#allocation5 + $0xfc0] sm:$0xff]  ;;  %v8225_v59 = vcombine.high %v593_v29, %v597_v30  ;;  %3584 = vmatprep.subr.bf16.mxu1 %v8233_v32  ;;  %v8224_v40 = vcombine.low %v593_v29, %v597_v30 }
  0xf8   :  { %v725_v54 = vld [vmem:[#allocation5 + $0xfe0] sm:$0xff]  ;;  %3585 = vmatpush1.bf16.msra.mxu1 %v8232_v34 }
  0xf9   :  { %v585_v60 = vld [vmem:[#allocation5 + $0xb80] sm:$0xff]  ;;  %v8353_v38 = vcombine.high %v721_v31, %v725_v54  ;;  %3533 = vmatprep.subr.bf16.mxu0 %v8225_v59  ;;  %v8352_v41 = vcombine.low %v721_v31, %v725_v54 }
  0xfa   :  { %v589_v36 = vld [vmem:[#allocation5 + $0xba0] sm:$0xff]  ;;  %3534 = vmatpush2.bf16.msra.mxu0 %v8224_v40 }
  0xfb   :  { %v713_v37 = vld [vmem:[#allocation5 + $0xf80] sm:$0xff]  ;;  %v8217_v47 = vcombine.high %v585_v60, %v589_v36  ;;  %3586 = vmatprep.subr.bf16.mxu1 %v8353_v38  ;;  %v8216_v56 = vcombine.low %v585_v60, %v589_v36 }
  0xfc   :  { %v717_v39 = vld [vmem:[#allocation5 + $0xfa0] sm:$0xff]  ;;  %3587 = vmatpush2.bf16.msra.mxu1 %v8352_v41  ;;  %v274_v41 = vld [vmem:[#allocation5 + $0x1c8] sm:$0xff] }
  0xfd   :  { %v577_v49 = vld [vmem:[#allocation5 + $0xb40] sm:$0xff]  ;;  %v8345_v52 = vcombine.high %v713_v37, %v717_v39  ;;  %3535 = vmatprep.subr.bf16.mxu0 %v8217_v47  ;;  %v8344_v57 = vcombine.low %v713_v37, %v717_v39  ;;  %v278_v47 = vld [vmem:[#allocation5 + $0x1e8] sm:$0xff] }
  0xfe   :  { %v581_v50 = vld [vmem:[#allocation5 + $0xb60] sm:$0xff]  ;;  %3536 = vmatpush2.bf16.msra.mxu0 %v8216_v56  ;;  %v270_v56 = vld [vmem:[#allocation5 + $0x1a8] sm:$0xff] }
  0xff   :  { %v705_v51 = vld [vmem:[#allocation5 + $0xf40] sm:$0xff]  ;;  %v8209_v0 = vcombine.high %v577_v49, %v581_v50  ;;  %3588 = vmatprep.subr.bf16.mxu1 %v8345_v52  ;;  %v8208_v6 = vcombine.low %v577_v49, %v581_v50  ;;  %v402_v49 = vld [vmem:[#allocation5 + $0x5c8] sm:$0xff] }
 0x100   :  { %v709_v53 = vld [vmem:[#allocation5 + $0xf60] sm:$0xff]  ;;  %3589 = vmatpush2.bf16.msra.mxu1 %v8344_v57 }
 0x101   :  { %v569_v1 = vld [vmem:[#allocation5 + $0xb00] sm:$0xff]  ;;  %v8337_v4 = vcombine.high %v705_v51, %v709_v53  ;;  %3537 = vmatprep.subr.bf16.mxu0 %v8209_v0  ;;  %v8336_v7 = vcombine.low %v705_v51, %v709_v53  ;;  %v406_v51 = vld [vmem:[#allocation5 + $0x5e8] sm:$0xff]  ;;  %v7907_v0 = vcombine.high %v274_v41, %v278_v47 }
 0x102   :  { %v573_v2 = vld [vmem:[#allocation5 + $0xb20] sm:$0xff]  ;;  %3538 = vmatpush2.bf16.msra.mxu0 %v8208_v6  ;;  %v266_v53 = vld [vmem:[#allocation5 + $0x188] sm:$0xff]  ;;  %v212_v6 = vld [vmem:[#allocation2 + $0x58] sm:$0xff] }
 0x103   :  { %v697_v3 = vld [vmem:[#allocation5 + $0xf00] sm:$0xff]  ;;  %v8201_v8 = vcombine.high %v569_v1, %v573_v2  ;;  %3590 = vmatprep.subr.bf16.mxu1 %v8337_v4  ;;  %v8200_v14 = vcombine.low %v569_v1, %v573_v2  ;;  %v394_v1 = vld [vmem:[#allocation5 + $0x588] sm:$0xff]  ;;  %v215_v4 = vld [vmem:[#allocation2 + $0x70] sm:$0xff] }
 0x104   :  { %v701_v5 = vld [vmem:[#allocation5 + $0xf20] sm:$0xff]  ;;  %3591 = vmatpush2.bf16.msra.mxu1 %v8336_v7  ;;  %v398_v2 = vld [vmem:[#allocation5 + $0x5a8] sm:$0xff]  ;;  %v216_v7 = vld [vmem:[#allocation2 + $0x78] sm:$0xff] }
 0x105   :  { %v561_v9 = vld [vmem:[#allocation5 + $0xac0] sm:$0xff]  ;;  %v8329_v12 = vcombine.high %v697_v3, %v701_v5  ;;  %3539 = vmatprep.subr.bf16.mxu0 %v8201_v8  ;;  %v8328_v15 = vcombine.low %v697_v3, %v701_v5  ;;  %v211_v3 = vld [vmem:[#allocation2 + $0x50] sm:$0xff]  ;;  %v8035_v5 = vcombine.high %v402_v49, %v406_v51  ;;  %v10055_v8 = vcombine.low %v10028_v42, %v10033_v44 }
 0x106   :  { %v565_v10 = vld [vmem:[#allocation5 + $0xae0] sm:$0xff]  ;;  %3540 = vmatpush2.bf16.msra.mxu0 %v8200_v14  ;;  %v262_v14 = vld [vmem:[#allocation5 + $0x168] sm:$0xff]  ;;  %v10064_v42 = vcombine.high %v212_v6, %v216_v7  ;;  %v7898_v44 = vcombine.low %v266_v53, %v270_v56 }
 0x107   :  { %v689_v11 = vld [vmem:[#allocation5 + $0xec0] sm:$0xff]  ;;  %v8193_v16 = vcombine.high %v561_v9, %v565_v10  ;;  %3592 = vmatprep.subr.bf16.mxu1 %v8329_v12  ;;  %v8192_v23 = vcombine.low %v561_v9, %v565_v10  ;;  %v10059_v9 = vcombine.low %v10035_v45, %v10037_v46  ;;  %v7906_v10 = vcombine.low %v274_v41, %v278_v47  ;;  %v366_v41 = vld [vmem:[#allocation5 + $0x4a8] sm:$0xff] }
 0x108   :  { %v693_v13 = vld [vmem:[#allocation5 + $0xee0] sm:$0xff]  ;;  %3593 = vmatpush2.bf16.msra.mxu1 %v8328_v15  ;;  %v7899_v12 = vcombine.high %v266_v53, %v270_v56  ;;  %v8027_v15 = vcombine.high %v394_v1, %v398_v2  ;;  %v8026_v45 = vcombine.low %v394_v1, %v398_v2  ;;  %v354_v53 = vld [vmem:[#allocation5 + $0x448] sm:$0xff] }
 0x109   :  { %v553_v17 = vld [vmem:[#allocation5 + $0xa80] sm:$0xff]  ;;  %v8321_v20 = vcombine.high %v689_v11, %v693_v13  ;;  %3541 = vmatprep.subr.bf16.mxu0 %v8193_v16  ;;  %v8320_v24 = vcombine.low %v689_v11, %v693_v13  ;;  %v8034_v11 = vcombine.low %v402_v49, %v406_v51  ;;  %v258_v13 = vld [vmem:[#allocation5 + $0x148] sm:$0xff]  ;;  %v10061_v16 = vcombine.high %v211_v3, %v215_v4 }
 0x10a   :  { %v557_v18 = vld [vmem:[#allocation5 + $0xaa0] sm:$0xff]  ;;  %3542 = vmatpush2.bf16.msra.mxu0 %v8192_v23  ;;  %v7891_v46 = vcombine.high %v258_v13, %v262_v14  ;;  %v226_v51 = vld [vmem:[#allocation5 + $0x48] sm:$0xff] }
 0x10b   :  { %v681_v19 = vld [vmem:[#allocation5 + $0xe80] sm:$0xff]  ;;  %v8185_v26 = vcombine.high %v553_v17, %v557_v18  ;;  %3594 = vmatprep.subr.bf16.mxu1 %v8321_v20  ;;  %v8184_v32 = vcombine.low %v553_v17, %v557_v18  ;;  %v386_v17 = vld [vmem:[#allocation5 + $0x548] sm:$0xff] }
 0x10c   :  { %v685_v22 = vld [vmem:[#allocation5 + $0xea0] sm:$0xff]  ;;  %3595 = vmatpush2.bf16.msra.mxu1 %v8320_v24  ;;  %v390_v18 = vld [vmem:[#allocation5 + $0x568] sm:$0xff] }
 0x10d   :  { %v545_v27 = vld [vmem:[#allocation5 + $0xa40] sm:$0xff]  ;;  %v8313_v30 = vcombine.high %v681_v19, %v685_v22  ;;  %3543 = vmatprep.subr.bf16.mxu0 %v8185_v26  ;;  %v8312_v54 = vcombine.low %v681_v19, %v685_v22  ;;  %v250_v19 = vld [vmem:[#allocation5 + $0x108] sm:$0xff]  ;;  %v8019_v23 = vcombine.high %v386_v17, %v390_v18  ;;  %v10068_v26 = vcombine.low %v211_v3, %v215_v4 }
 0x10e   :  { %v549_v28 = vld [vmem:[#allocation5 + $0xa60] sm:$0xff]  ;;  %3544 = vmatpush2.bf16.msra.mxu0 %v8184_v32  ;;  %v254_v20 = vld [vmem:[#allocation5 + $0x128] sm:$0xff] }
 0x10f   :  { %v673_v29 = vld [vmem:[#allocation5 + $0xe40] sm:$0xff]  ;;  %v8177_v33 = vcombine.high %v545_v27, %v549_v28  ;;  %3596 = vmatprep.subr.bf16.mxu1 %v8313_v30  ;;  %v8176_v38 = vcombine.low %v545_v27, %v549_v28  ;;  %v378_v22 = vld [vmem:[#allocation5 + $0x508] sm:$0xff]  ;;  %v7890_v27 = vcombine.low %v258_v13, %v262_v14  ;;  %v10071_v28 = vcombine.low %v212_v6, %v216_v7 }
 0x110   :  { %v677_v31 = vld [vmem:[#allocation5 + $0xe60] sm:$0xff]  ;;  %3597 = vmatpush2.bf16.msra.mxu1 %v8312_v54  ;;  %v382_v24 = vld [vmem:[#allocation5 + $0x528] sm:$0xff]  ;;  %v7883_v30 = vcombine.high %v250_v19, %v254_v20 }
 0x111   :  { %v537_v34 = vld [vmem:[#allocation5 + $0xa00] sm:$0xff]  ;;  %v8305_v36 = vcombine.high %v673_v29, %v677_v31  ;;  %3545 = vmatprep.subr.bf16.mxu0 %v8177_v33  ;;  %v8304_v39 = vcombine.low %v673_v29, %v677_v31  ;;  %v8018_v29 = vcombine.low %v386_v17, %v390_v18  ;;  %v242_v31 = vld [vmem:[#allocation5 + $0xc8] sm:$0xff]  ;;  %v8011_v33 = vcombine.high %v378_v22, %v382_v24 }
 0x112   :  { %v541_v59 = vld [vmem:[#allocation5 + $0xa20] sm:$0xff]  ;;  %3546 = vmatpush2.bf16.msra.mxu0 %v8176_v38  ;;  %v246_v32 = vld [vmem:[#allocation5 + $0xe8] sm:$0xff] }
 0x113   :  { %v665_v60 = vld [vmem:[#allocation5 + $0xe00] sm:$0xff]  ;;  %v8169_v40 = vcombine.high %v537_v34, %v541_v59  ;;  %3598 = vmatprep.subr.bf16.mxu1 %v8305_v36  ;;  %v8168_v52 = vcombine.low %v537_v34, %v541_v59  ;;  %v370_v54 = vld [vmem:[#allocation5 + $0x4c8] sm:$0xff]  ;;  %v7882_v59 = vcombine.low %v250_v19, %v254_v20  ;;  %v7875_v36 = vcombine.high %v242_v31, %v246_v32 }
 0x114   :  { %v669_v37 = vld [vmem:[#allocation5 + $0xe20] sm:$0xff]  ;;  %3599 = vmatpush2.bf16.msra.mxu1 %v8304_v39  ;;  %v374_v34 = vld [vmem:[#allocation5 + $0x4e8] sm:$0xff]  ;;  %v7874_v47 = vcombine.low %v242_v31, %v246_v32 }
 0x115   :  { %v8297_v50 = vcombine.high %v665_v60, %v669_v37  ;;  %3547 = vmatprep.subr.bf16.mxu0 %v8169_v40  ;;  %v8296_v57 = vcombine.low %v665_v60, %v669_v37  ;;  %v8010_v60 = vcombine.low %v378_v22, %v382_v24  ;;  %v234_v37 = vld [vmem:[#allocation5 + $0x88] sm:$0xff]  ;;  %v8003_v40 = vcombine.high %v370_v54, %v374_v34 }
 0x116   :  { %3548 = vmatpush2.bf16.msra.mxu0 %v8168_v52  ;;  %v238_v38 = vld [vmem:[#allocation5 + $0xa8] sm:$0xff]  ;;  %v8002_v49 = vcombine.low %v370_v54, %v374_v34 }
 0x117   :  { %3600 = vmatprep.subr.bf16.mxu1 %v8297_v50  ;;  %3623 = vmatprep.subr.bf16.mxu0 %v7907_v0  ;;  %v362_v39 = vld [vmem:[#allocation5 + $0x488] sm:$0xff]  ;;  %v7867_v50 = vcombine.high %v234_v37, %v238_v38  ;;  %v7866_v0 = vcombine.low %v234_v37, %v238_v38 }
 0x118   :  { %3601 = vmatpush2.bf16.msra.mxu1 %v8296_v57  ;;  %v230_v52 = vld [vmem:[#allocation5 + $0x68] sm:$0xff]  ;;  %v7995_v56 = vcombine.high %v362_v39, %v366_v41  ;;  %v7994_v1 = vcombine.low %v362_v39, %v366_v41 }
 0x119   :  { %3676 = vmatprep.subr.bf16.mxu1 %v8035_v5  ;;  %3550 = vmatmul.mubr.bf16.vlgmr.msra.gmra.mxu0 %v10055_v8  ;;  %v358_v57 = vld [vmem:[#allocation5 + $0x468] sm:$0xff]  ;;  %v7859_v2 = vcombine.high %v226_v51, %v230_v52 }
 0x11a   :  { %3624 = vmatpush1.bf16.msra.mxu0 %v7906_v10  ;;  %3559 = vmatprep.mubr.bf16.mxu0 %v10061_v16  ;;  %v218_v3 = vld [vmem:[#allocation5 + $0x8] sm:$0xff]  ;;  %v7987_v6 = vcombine.high %v354_v53, %v358_v57  ;;  %v7858_v10 = vcombine.low %v226_v51, %v230_v52 }
 0x11b   :  { %3603 = vmatmul.mubr.bf16.vlgmr.msra.gmra.mxu1 %v10059_v9  ;;  %3625 = vmatprep.subr.bf16.mxu0 %v7899_v12  ;;  %v222_v4 = vld [vmem:[#allocation5 + $0x28] sm:$0xff] }
 0x11c   :  { %3677 = vmatpush1.bf16.msra.mxu1 %v8034_v11  ;;  %3612 = vmatprep.mubr.bf16.mxu1 %v10064_v42  ;;  %v346_v5 = vld [vmem:[#allocation5 + $0x408] sm:$0xff]  ;;  %v7986_v11 = vcombine.low %v354_v53, %v358_v57  ;;  %v7851_v12 = vcombine.high %v218_v3, %v222_v4 }
 0x11d   :  { %3678 = vmatprep.subr.bf16.mxu1 %v8027_v15  ;;  %v350_v7 = vld [vmem:[#allocation5 + $0x428] sm:$0xff] }
 0x11e   :  { %3626 = vmatpush1.bf16.msra.mxu0 %v7898_v44  ;;  %v338_v13 = vld [vmem:[#allocation5 + $0x3c8] sm:$0xff]  ;;  %v7979_v17 = vcombine.high %v346_v5, %v350_v7  ;;  %v7850_v44 = vcombine.low %v218_v3, %v222_v4 }
 0x11f   :  { %3627 = vmatprep.subr.bf16.mxu0 %v7891_v46  ;;  %v342_v14 = vld [vmem:[#allocation5 + $0x3e8] sm:$0xff] }
 0x120   :  { %3679 = vmatpush1.bf16.msra.mxu1 %v8026_v45  ;;  %v466_v15 = vld [vmem:[#allocation5 + $0x7c8] sm:$0xff]  ;;  %v7978_v45 = vcombine.low %v346_v5, %v350_v7  ;;  %v7971_v46 = vcombine.high %v338_v13, %v342_v14 }
 0x121   :  { %3680 = vmatprep.subr.bf16.mxu1 %v8019_v23  ;;  %3560 = vmatmul.mubr.bf16.gmra.mxu0 %v10068_v26  ;;  %v470_v18 = vld [vmem:[#allocation5 + $0x7e8] sm:$0xff] }
 0x122   :  { %3628 = vmatpush1.bf16.msra.mxu0 %v7890_v27  ;;  %3655 = vmatprep.mubr.bf16.mxu0 %v10001_v58  ;;  %v330_v19 = vld [vmem:[#allocation5 + $0x388] sm:$0xff]  ;;  %v8099_v23 = vcombine.high %v466_v15, %v470_v18  ;;  %v7970_v27 = vcombine.low %v338_v13, %v342_v14 }
 0x123   :  { %3613 = vmatmul.mubr.bf16.gmra.mxu1 %v10071_v28  ;;  %3629 = vmatprep.subr.bf16.mxu0 %v7883_v30  ;;  %v334_v20 = vld [vmem:[#allocation5 + $0x3a8] sm:$0xff] }
 0x124   :  { %3681 = vmatpush1.bf16.msra.mxu1 %v8018_v29  ;;  %3708 = vmatprep.mubr.bf16.mxu1 %v10009_v63  ;;  %v458_v22 = vld [vmem:[#allocation5 + $0x788] sm:$0xff]  ;;  %v8098_v29 = vcombine.low %v466_v15, %v470_v18  ;;  %v7963_v30 = vcombine.high %v330_v19, %v334_v20 }
 0x125   :  { %3682 = vmatprep.subr.bf16.mxu1 %v8011_v33  ;;  %v462_v24 = vld [vmem:[#allocation5 + $0x7a8] sm:$0xff] }
 0x126   :  { %3630 = vmatpush1.bf16.msra.mxu0 %v7882_v59  ;;  %v322_v31 = vld [vmem:[#allocation5 + $0x348] sm:$0xff]  ;;  %v8091_v33 = vcombine.high %v458_v22, %v462_v24  ;;  %v7962_v59 = vcombine.low %v330_v19, %v334_v20 }
 0x127   :  { %3631 = vmatprep.subr.bf16.mxu0 %v7875_v36  ;;  %v326_v32 = vld [vmem:[#allocation5 + $0x368] sm:$0xff] }
 0x128   :  { %3683 = vmatpush1.bf16.msra.mxu1 %v8010_v60  ;;  %v450_v54 = vld [vmem:[#allocation5 + $0x748] sm:$0xff]  ;;  %v8090_v60 = vcombine.low %v458_v22, %v462_v24  ;;  %v7955_v36 = vcombine.high %v322_v31, %v326_v32 }
 0x129   :  { %3684 = vmatprep.subr.bf16.mxu1 %v8003_v40  ;;  %v454_v34 = vld [vmem:[#allocation5 + $0x768] sm:$0xff] }
 0x12a   :  { %3632 = vmatpush1.bf16.msra.mxu0 %v7874_v47  ;;  %v314_v37 = vld [vmem:[#allocation5 + $0x308] sm:$0xff]  ;;  %v8083_v40 = vcombine.high %v450_v54, %v454_v34  ;;  %v7954_v47 = vcombine.low %v322_v31, %v326_v32 }
 0x12b   :  { %3633 = vmatprep.subr.bf16.mxu0 %v7867_v50  ;;  %v318_v38 = vld [vmem:[#allocation5 + $0x328] sm:$0xff] }
 0x12c   :  { %3685 = vmatpush1.bf16.msra.mxu1 %v8002_v49  ;;  %v442_v39 = vld [vmem:[#allocation5 + $0x708] sm:$0xff]  ;;  %v8082_v49 = vcombine.low %v450_v54, %v454_v34  ;;  %v7947_v50 = vcombine.high %v314_v37, %v318_v38 }
 0x12d   :  { %3686 = vmatprep.subr.bf16.mxu1 %v7995_v56  ;;  %v446_v41 = vld [vmem:[#allocation5 + $0x728] sm:$0xff] }
 0x12e   :  { %3634 = vmatpush1.bf16.msra.mxu0 %v7866_v0  ;;  %v306_v51 = vld [vmem:[#allocation5 + $0x2c8] sm:$0xff]  ;;  %v8075_v56 = vcombine.high %v442_v39, %v446_v41  ;;  %v7946_v0 = vcombine.low %v314_v37, %v318_v38 }
 0x12f   :  { %3635 = vmatprep.subr.bf16.mxu0 %v7859_v2  ;;  %v310_v52 = vld [vmem:[#allocation5 + $0x2e8] sm:$0xff] }
 0x130   :  { %3687 = vmatpush1.bf16.msra.mxu1 %v7994_v1  ;;  %v434_v53 = vld [vmem:[#allocation5 + $0x6c8] sm:$0xff]  ;;  %v8074_v1 = vcombine.low %v442_v39, %v446_v41  ;;  %v7939_v2 = vcombine.high %v306_v51, %v310_v52 }
 0x131   :  { %3688 = vmatprep.subr.bf16.mxu1 %v7987_v6  ;;  %v438_v57 = vld [vmem:[#allocation5 + $0x6e8] sm:$0xff] }
 0x132   :  { %3636 = vmatpush1.bf16.msra.mxu0 %v7858_v10  ;;  %v298_v3 = vld [vmem:[#allocation5 + $0x288] sm:$0xff]  ;;  %v8067_v6 = vcombine.high %v434_v53, %v438_v57  ;;  %v7938_v10 = vcombine.low %v306_v51, %v310_v52 }
 0x133   :  { %3637 = vmatprep.subr.bf16.mxu0 %v7851_v12  ;;  %v302_v4 = vld [vmem:[#allocation5 + $0x2a8] sm:$0xff] }
 0x134   :  { %3689 = vmatpush1.bf16.msra.mxu1 %v7986_v11  ;;  %v426_v5 = vld [vmem:[#allocation5 + $0x688] sm:$0xff]  ;;  %v8066_v11 = vcombine.low %v434_v53, %v438_v57  ;;  %v7931_v12 = vcombine.high %v298_v3, %v302_v4 }
 0x135   :  { %3690 = vmatprep.subr.bf16.mxu1 %v7979_v17  ;;  %v430_v7 = vld [vmem:[#allocation5 + $0x6a8] sm:$0xff] }
 0x136   :  { %3638 = vmatpush1.bf16.msra.mxu0 %v7850_v44  ;;  %v290_v13 = vld [vmem:[#allocation5 + $0x248] sm:$0xff]  ;;  %v8059_v17 = vcombine.high %v426_v5, %v430_v7  ;;  %v7930_v44 = vcombine.low %v298_v3, %v302_v4 }
 0x137   :  { %3639 = vmatprep.subr.bf16.mxu0 %v7971_v46  ;;  %v294_v14 = vld [vmem:[#allocation5 + $0x268] sm:$0xff] }
 0x138   :  { %3691 = vmatpush1.bf16.msra.mxu1 %v7978_v45  ;;  %v418_v15 = vld [vmem:[#allocation5 + $0x648] sm:$0xff]  ;;  %v8058_v45 = vcombine.low %v426_v5, %v430_v7  ;;  %v7923_v46 = vcombine.high %v290_v13, %v294_v14 }
 0x139   :  { %3692 = vmatprep.subr.bf16.mxu1 %v8099_v23  ;;  %v422_v18 = vld [vmem:[#allocation5 + $0x668] sm:$0xff] }
 0x13a   :  { %3640 = vmatpush2.bf16.msra.mxu0 %v7970_v27  ;;  %v282_v19 = vld [vmem:[#allocation5 + $0x208] sm:$0xff]  ;;  %v8051_v23 = vcombine.high %v418_v15, %v422_v18  ;;  %v7922_v27 = vcombine.low %v290_v13, %v294_v14 }
 0x13b   :  { %3641 = vmatprep.subr.bf16.mxu0 %v7963_v30  ;;  %v286_v20 = vld [vmem:[#allocation5 + $0x228] sm:$0xff] }
 0x13c   :  { %3693 = vmatpush2.bf16.msra.mxu1 %v8098_v29  ;;  %v410_v22 = vld [vmem:[#allocation5 + $0x608] sm:$0xff]  ;;  %v8050_v29 = vcombine.low %v418_v15, %v422_v18  ;;  %v7915_v30 = vcombine.high %v282_v19, %v286_v20 }
 0x13d   :  { %3694 = vmatprep.subr.bf16.mxu1 %v8091_v33  ;;  %v414_v24 = vld [vmem:[#allocation5 + $0x628] sm:$0xff] }
 0x13e   :  { %3642 = vmatpush2.bf16.msra.mxu0 %v7962_v59  ;;  %v530_v31 = vld [vmem:[#allocation5 + $0x9c8] sm:$0xff]  ;;  %v8043_v33 = vcombine.high %v410_v22, %v414_v24  ;;  %v7914_v59 = vcombine.low %v282_v19, %v286_v20 }
 0x13f   :  { %3643 = vmatprep.subr.bf16.mxu0 %v7955_v36  ;;  %v534_v32 = vld [vmem:[#allocation5 + $0x9e8] sm:$0xff] }
 0x140   :  { %3695 = vmatpush2.bf16.msra.mxu1 %v8090_v60  ;;  %v658_v54 = vld [vmem:[#allocation5 + $0xdc8] sm:$0xff]  ;;  %v8042_v60 = vcombine.low %v410_v22, %v414_v24  ;;  %v8163_v36 = vcombine.high %v530_v31, %v534_v32 }
 0x141   :  { %3696 = vmatprep.subr.bf16.mxu1 %v8083_v40  ;;  %v662_v34 = vld [vmem:[#allocation5 + $0xde8] sm:$0xff] }
 0x142   :  { %3644 = vmatpush2.bf16.msra.mxu0 %v7954_v47  ;;  %v522_v37 = vld [vmem:[#allocation5 + $0x988] sm:$0xff]  ;;  %v8291_v40 = vcombine.high %v658_v54, %v662_v34  ;;  %v8162_v47 = vcombine.low %v530_v31, %v534_v32 }
 0x143   :  { %3645 = vmatprep.subr.bf16.mxu0 %v7947_v50  ;;  %v526_v38 = vld [vmem:[#allocation5 + $0x9a8] sm:$0xff] }
 0x144   :  { %3697 = vmatpush2.bf16.msra.mxu1 %v8082_v49  ;;  %v650_v39 = vld [vmem:[#allocation5 + $0xd88] sm:$0xff]  ;;  %v8290_v49 = vcombine.low %v658_v54, %v662_v34  ;;  %v8155_v50 = vcombine.high %v522_v37, %v526_v38 }
 0x145   :  { %3698 = vmatprep.subr.bf16.mxu1 %v8075_v56  ;;  %v654_v41 = vld [vmem:[#allocation5 + $0xda8] sm:$0xff] }
 0x146   :  { %3646 = vmatpush2.bf16.msra.mxu0 %v7946_v0  ;;  %v514_v51 = vld [vmem:[#allocation5 + $0x948] sm:$0xff]  ;;  %v8283_v56 = vcombine.high %v650_v39, %v654_v41  ;;  %v8154_v0 = vcombine.low %v522_v37, %v526_v38 }
 0x147   :  { %3647 = vmatprep.subr.bf16.mxu0 %v7939_v2  ;;  %v518_v52 = vld [vmem:[#allocation5 + $0x968] sm:$0xff] }
 0x148   :  { %3699 = vmatpush2.bf16.msra.mxu1 %v8074_v1  ;;  %v642_v53 = vld [vmem:[#allocation5 + $0xd48] sm:$0xff]  ;;  %v8282_v1 = vcombine.low %v650_v39, %v654_v41  ;;  %v8147_v2 = vcombine.high %v514_v51, %v518_v52 }
 0x149   :  { %3700 = vmatprep.subr.bf16.mxu1 %v8067_v6  ;;  %v646_v57 = vld [vmem:[#allocation5 + $0xd68] sm:$0xff] }
 0x14a   :  { %3648 = vmatpush2.bf16.msra.mxu0 %v7938_v10  ;;  %v506_v3 = vld [vmem:[#allocation5 + $0x908] sm:$0xff]  ;;  %v8275_v6 = vcombine.high %v642_v53, %v646_v57  ;;  %v8146_v10 = vcombine.low %v514_v51, %v518_v52 }
 0x14b   :  { %3649 = vmatprep.subr.bf16.mxu0 %v7931_v12  ;;  %v510_v4 = vld [vmem:[#allocation5 + $0x928] sm:$0xff] }
 0x14c   :  { %3701 = vmatpush2.bf16.msra.mxu1 %v8066_v11  ;;  %v634_v5 = vld [vmem:[#allocation5 + $0xd08] sm:$0xff]  ;;  %v8274_v11 = vcombine.low %v642_v53, %v646_v57  ;;  %v8139_v12 = vcombine.high %v506_v3, %v510_v4 }
 0x14d   :  { %3702 = vmatprep.subr.bf16.mxu1 %v8059_v17  ;;  %v638_v7 = vld [vmem:[#allocation5 + $0xd28] sm:$0xff] }
 0x14e   :  { %3650 = vmatpush2.bf16.msra.mxu0 %v7930_v44  ;;  %v498_v13 = vld [vmem:[#allocation5 + $0x8c8] sm:$0xff]  ;;  %v8267_v17 = vcombine.high %v634_v5, %v638_v7  ;;  %v8138_v44 = vcombine.low %v506_v3, %v510_v4 }
 0x14f   :  { %3651 = vmatprep.subr.bf16.mxu0 %v7923_v46  ;;  %v502_v14 = vld [vmem:[#allocation5 + $0x8e8] sm:$0xff] }
 0x150   :  { %3703 = vmatpush2.bf16.msra.mxu1 %v8058_v45  ;;  %v626_v15 = vld [vmem:[#allocation5 + $0xcc8] sm:$0xff]  ;;  %v8266_v45 = vcombine.low %v634_v5, %v638_v7  ;;  %v8131_v46 = vcombine.high %v498_v13, %v502_v14 }
 0x151   :  { %3704 = vmatprep.subr.bf16.mxu1 %v8051_v23  ;;  %v630_v18 = vld [vmem:[#allocation5 + $0xce8] sm:$0xff] }
 0x152   :  { %3652 = vmatpush2.bf16.msra.mxu0 %v7922_v27  ;;  %v490_v19 = vld [vmem:[#allocation5 + $0x888] sm:$0xff]  ;;  %v8259_v23 = vcombine.high %v626_v15, %v630_v18  ;;  %v8130_v27 = vcombine.low %v498_v13, %v502_v14 }
 0x153   :  { %3653 = vmatprep.subr.bf16.mxu0 %v7915_v30  ;;  %v494_v20 = vld [vmem:[#allocation5 + $0x8a8] sm:$0xff] }
 0x154   :  { %3705 = vmatpush2.bf16.msra.mxu1 %v8050_v29  ;;  %v618_v22 = vld [vmem:[#allocation5 + $0xc88] sm:$0xff]  ;;  %v8258_v29 = vcombine.low %v626_v15, %v630_v18  ;;  %v8123_v30 = vcombine.high %v490_v19, %v494_v20 }
 0x155   :  { %3706 = vmatprep.subr.bf16.mxu1 %v8043_v33  ;;  %v622_v24 = vld [vmem:[#allocation5 + $0xca8] sm:$0xff] }
 0x156   :  { %3654 = vmatpush2.bf16.msra.mxu0 %v7914_v59  ;;  %v482_v31 = vld [vmem:[#allocation5 + $0x848] sm:$0xff]  ;;  %v8251_v33 = vcombine.high %v618_v22, %v622_v24  ;;  %v8122_v59 = vcombine.low %v490_v19, %v494_v20 }
 0x157   :  { %3729 = vmatprep.subr.bf16.mxu0 %v8163_v36  ;;  %v486_v32 = vld [vmem:[#allocation5 + $0x868] sm:$0xff] }
 0x158   :  { %3707 = vmatpush2.bf16.msra.mxu1 %v8042_v60  ;;  %v610_v54 = vld [vmem:[#allocation5 + $0xc48] sm:$0xff]  ;;  %v8250_v60 = vcombine.low %v618_v22, %v622_v24  ;;  %v8115_v36 = vcombine.high %v482_v31, %v486_v32 }
 0x159   :  { %3782 = vmatprep.subr.bf16.mxu1 %v8291_v40  ;;  %3656 = vmatmul.mubr.bf16.vlgmr.msra.gmra.mxu0 %v10015_v21  ;;  %v614_v34 = vld [vmem:[#allocation5 + $0xc68] sm:$0xff] }
 0x15a   :  { %3730 = vmatpush1.bf16.msra.mxu0 %v8162_v47  ;;  %3665 = vmatprep.mubr.bf16.mxu0 %v10021_v55  ;;  %v474_v37 = vld [vmem:[#allocation5 + $0x808] sm:$0xff]  ;;  %v8243_v40 = vcombine.high %v610_v54, %v614_v34  ;;  %v8114_v47 = vcombine.low %v482_v31, %v486_v32 }
 0x15b   :  { %3709 = vmatmul.mubr.bf16.vlgmr.msra.gmra.mxu1 %v10019_v25  ;;  %3731 = vmatprep.subr.bf16.mxu0 %v8155_v50  ;;  %v478_v38 = vld [vmem:[#allocation5 + $0x828] sm:$0xff] }
 0x15c   :  { %3783 = vmatpush1.bf16.msra.mxu1 %v8290_v49  ;;  %3718 = vmatprep.mubr.bf16.mxu1 %v10024_v35  ;;  %v602_v39 = vld [vmem:[#allocation5 + $0xc08] sm:$0xff]  ;;  %v8242_v49 = vcombine.low %v610_v54, %v614_v34  ;;  %v8107_v50 = vcombine.high %v474_v37, %v478_v38 }
 0x15d   :  { %3784 = vmatprep.subr.bf16.mxu1 %v8283_v56  ;;  %v606_v41 = vld [vmem:[#allocation5 + $0xc28] sm:$0xff] }
 0x15e   :  { %3732 = vmatpush1.bf16.msra.mxu0 %v8154_v0  ;;  %v594_v51 = vld [vmem:[#allocation5 + $0xbc8] sm:$0xff]  ;;  %v8235_v56 = vcombine.high %v602_v39, %v606_v41  ;;  %v8106_v0 = vcombine.low %v474_v37, %v478_v38 }
 0x15f   :  { %3733 = vmatprep.subr.bf16.mxu0 %v8147_v2  ;;  %v598_v52 = vld [vmem:[#allocation5 + $0xbe8] sm:$0xff] }
 0x160   :  { %3785 = vmatpush1.bf16.msra.mxu1 %v8282_v1  ;;  %v722_v53 = vld [vmem:[#allocation5 + $0xfc8] sm:$0xff]  ;;  %v8234_v1 = vcombine.low %v602_v39, %v606_v41  ;;  %v8227_v2 = vcombine.high %v594_v51, %v598_v52 }
 0x161   :  { %3786 = vmatprep.subr.bf16.mxu1 %v8275_v6  ;;  %3666 = vmatmul.mubr.bf16.gmra.mxu0 %v10030_v43  ;;  %v726_v57 = vld [vmem:[#allocation5 + $0xfe8] sm:$0xff] }
 0x162   :  { %3734 = vmatpush1.bf16.msra.mxu0 %v8146_v10  ;;  %3761 = vmatprep.mubr.bf16.mxu0 %v10043_v61  ;;  %v586_v3 = vld [vmem:[#allocation5 + $0xb88] sm:$0xff]  ;;  %v8355_v6 = vcombine.high %v722_v53, %v726_v57  ;;  %v8226_v10 = vcombine.low %v594_v51, %v598_v52 }
 0x163   :  { %3719 = vmatmul.mubr.bf16.gmra.mxu1 %v10039_v48  ;;  %3735 = vmatprep.subr.bf16.mxu0 %v8139_v12  ;;  %v590_v4 = vld [vmem:[#allocation5 + $0xba8] sm:$0xff] }
 0x164   :  { %3787 = vmatpush1.bf16.msra.mxu1 %v8274_v11  ;;  %3814 = vmatprep.mubr.bf16.mxu1 %v10048_v62  ;;  %v714_v5 = vld [vmem:[#allocation5 + $0xf88] sm:$0xff]  ;;  %v8354_v11 = vcombine.low %v722_v53, %v726_v57  ;;  %v8219_v12 = vcombine.high %v586_v3, %v590_v4 }
 0x165   :  { %3788 = vmatprep.subr.bf16.mxu1 %v8267_v17  ;;  %v718_v7 = vld [vmem:[#allocation5 + $0xfa8] sm:$0xff] }
 0x166   :  { %3736 = vmatpush1.bf16.msra.mxu0 %v8138_v44  ;;  %v578_v13 = vld [vmem:[#allocation5 + $0xb48] sm:$0xff]  ;;  %v8347_v17 = vcombine.high %v714_v5, %v718_v7  ;;  %v8218_v44 = vcombine.low %v586_v3, %v590_v4 }
 0x167   :  { %3737 = vmatprep.subr.bf16.mxu0 %v8131_v46  ;;  %v582_v14 = vld [vmem:[#allocation5 + $0xb68] sm:$0xff] }
 0x168   :  { %3789 = vmatpush1.bf16.msra.mxu1 %v8266_v45  ;;  %v706_v15 = vld [vmem:[#allocation5 + $0xf48] sm:$0xff]  ;;  %v8346_v45 = vcombine.low %v714_v5, %v718_v7  ;;  %v8211_v46 = vcombine.high %v578_v13, %v582_v14 }
 0x169   :  { %3790 = vmatprep.subr.bf16.mxu1 %v8259_v23  ;;  %v710_v18 = vld [vmem:[#allocation5 + $0xf68] sm:$0xff] }
 0x16a   :  { %3738 = vmatpush1.bf16.msra.mxu0 %v8130_v27  ;;  %v570_v19 = vld [vmem:[#allocation5 + $0xb08] sm:$0xff]  ;;  %v8339_v23 = vcombine.high %v706_v15, %v710_v18  ;;  %v8210_v27 = vcombine.low %v578_v13, %v582_v14  ;;  %v275_v13 = vld [vmem:[#allocation5 + $0x1d0] sm:$0xff] }
 0x16b   :  { %3739 = vmatprep.subr.bf16.mxu0 %v8123_v30  ;;  %v574_v20 = vld [vmem:[#allocation5 + $0xb28] sm:$0xff]  ;;  %v279_v14 = vld [vmem:[#allocation5 + $0x1f0] sm:$0xff] }
 0x16c   :  { %3791 = vmatpush1.bf16.msra.mxu1 %v8258_v29  ;;  %v698_v22 = vld [vmem:[#allocation5 + $0xf08] sm:$0xff]  ;;  %v8338_v29 = vcombine.low %v706_v15, %v710_v18  ;;  %v8203_v30 = vcombine.high %v570_v19, %v574_v20  ;;  %v403_v15 = vld [vmem:[#allocation5 + $0x5d0] sm:$0xff] }
 0x16d   :  { %3792 = vmatprep.subr.bf16.mxu1 %v8251_v33  ;;  %v702_v24 = vld [vmem:[#allocation5 + $0xf28] sm:$0xff]  ;;  %v407_v18 = vld [vmem:[#allocation5 + $0x5f0] sm:$0xff] }
 0x16e   :  { %3740 = vmatpush1.bf16.msra.mxu0 %v8122_v59  ;;  %v562_v31 = vld [vmem:[#allocation5 + $0xac8] sm:$0xff]  ;;  %v8331_v33 = vcombine.high %v698_v22, %v702_v24  ;;  %v8202_v59 = vcombine.low %v570_v19, %v574_v20  ;;  %v267_v19 = vld [vmem:[#allocation5 + $0x190] sm:$0xff] }
 0x16f   :  { %3741 = vmatprep.subr.bf16.mxu0 %v8115_v36  ;;  %v566_v32 = vld [vmem:[#allocation5 + $0xae8] sm:$0xff]  ;;  %v271_v20 = vld [vmem:[#allocation5 + $0x1b0] sm:$0xff] }
 0x170   :  { %3793 = vmatpush1.bf16.msra.mxu1 %v8250_v60  ;;  %v690_v54 = vld [vmem:[#allocation5 + $0xec8] sm:$0xff]  ;;  %v8330_v60 = vcombine.low %v698_v22, %v702_v24  ;;  %v8195_v36 = vcombine.high %v562_v31, %v566_v32  ;;  %v395_v22 = vld [vmem:[#allocation5 + $0x590] sm:$0xff] }
 0x171   :  { %3794 = vmatprep.subr.bf16.mxu1 %v8243_v40  ;;  %v694_v34 = vld [vmem:[#allocation5 + $0xee8] sm:$0xff]  ;;  %v399_v24 = vld [vmem:[#allocation5 + $0x5b0] sm:$0xff] }
 0x172   :  { %3742 = vmatpush1.bf16.msra.mxu0 %v8114_v47  ;;  %v554_v37 = vld [vmem:[#allocation5 + $0xa88] sm:$0xff]  ;;  %v8323_v40 = vcombine.high %v690_v54, %v694_v34  ;;  %v8194_v47 = vcombine.low %v562_v31, %v566_v32  ;;  %v259_v31 = vld [vmem:[#allocation5 + $0x150] sm:$0xff] }
 0x173   :  { %3743 = vmatprep.subr.bf16.mxu0 %v8107_v50  ;;  %v558_v38 = vld [vmem:[#allocation5 + $0xaa8] sm:$0xff]  ;;  %v263_v32 = vld [vmem:[#allocation5 + $0x170] sm:$0xff] }
 0x174   :  { %3795 = vmatpush1.bf16.msra.mxu1 %v8242_v49  ;;  %v682_v39 = vld [vmem:[#allocation5 + $0xe88] sm:$0xff]  ;;  %v8322_v49 = vcombine.low %v690_v54, %v694_v34  ;;  %v8187_v50 = vcombine.high %v554_v37, %v558_v38  ;;  %v387_v54 = vld [vmem:[#allocation5 + $0x550] sm:$0xff] }
 0x175   :  { %3796 = vmatprep.subr.bf16.mxu1 %v8235_v56  ;;  %v686_v41 = vld [vmem:[#allocation5 + $0xea8] sm:$0xff]  ;;  %v391_v34 = vld [vmem:[#allocation5 + $0x570] sm:$0xff] }
 0x176   :  { %3744 = vmatpush1.bf16.msra.mxu0 %v8106_v0  ;;  %v546_v51 = vld [vmem:[#allocation5 + $0xa48] sm:$0xff]  ;;  %v8315_v56 = vcombine.high %v682_v39, %v686_v41  ;;  %v8186_v0 = vcombine.low %v554_v37, %v558_v38  ;;  %v251_v37 = vld [vmem:[#allocation5 + $0x110] sm:$0xff] }
 0x177   :  { %3745 = vmatprep.subr.bf16.mxu0 %v8227_v2  ;;  %v550_v52 = vld [vmem:[#allocation5 + $0xa68] sm:$0xff]  ;;  %v255_v38 = vld [vmem:[#allocation5 + $0x130] sm:$0xff] }
 0x178   :  { %3797 = vmatpush1.bf16.msra.mxu1 %v8234_v1  ;;  %v674_v53 = vld [vmem:[#allocation5 + $0xe48] sm:$0xff]  ;;  %v8314_v1 = vcombine.low %v682_v39, %v686_v41  ;;  %v8179_v2 = vcombine.high %v546_v51, %v550_v52  ;;  %v379_v39 = vld [vmem:[#allocation5 + $0x510] sm:$0xff] }
 0x179   :  { %3798 = vmatprep.subr.bf16.mxu1 %v8355_v6  ;;  %v678_v57 = vld [vmem:[#allocation5 + $0xe68] sm:$0xff]  ;;  %v383_v41 = vld [vmem:[#allocation5 + $0x530] sm:$0xff] }
 0x17a   :  { %3746 = vmatpush2.bf16.msra.mxu0 %v8226_v10  ;;  %v538_v3 = vld [vmem:[#allocation5 + $0xa08] sm:$0xff]  ;;  %v8307_v6 = vcombine.high %v674_v53, %v678_v57  ;;  %v8178_v10 = vcombine.low %v546_v51, %v550_v52  ;;  %v243_v51 = vld [vmem:[#allocation5 + $0xd0] sm:$0xff] }
 0x17b   :  { %3747 = vmatprep.subr.bf16.mxu0 %v8219_v12  ;;  %v542_v4 = vld [vmem:[#allocation5 + $0xa28] sm:$0xff]  ;;  %v247_v52 = vld [vmem:[#allocation5 + $0xf0] sm:$0xff] }
 0x17c   :  { %3799 = vmatpush2.bf16.msra.mxu1 %v8354_v11  ;;  %v666_v5 = vld [vmem:[#allocation5 + $0xe08] sm:$0xff]  ;;  %v8306_v11 = vcombine.low %v674_v53, %v678_v57  ;;  %v8171_v12 = vcombine.high %v538_v3, %v542_v4  ;;  %v371_v53 = vld [vmem:[#allocation5 + $0x4d0] sm:$0xff] }
 0x17d   :  { %3800 = vmatprep.subr.bf16.mxu1 %v8347_v17  ;;  %v670_v7 = vld [vmem:[#allocation5 + $0xe28] sm:$0xff]  ;;  %v375_v57 = vld [vmem:[#allocation5 + $0x4f0] sm:$0xff] }
 0x17e   :  { %3748 = vmatpush2.bf16.msra.mxu0 %v8218_v44  ;;  %v8299_v17 = vcombine.high %v666_v5, %v670_v7  ;;  %v8170_v44 = vcombine.low %v538_v3, %v542_v4  ;;  %v235_v3 = vld [vmem:[#allocation5 + $0x90] sm:$0xff] }
 0x17f   :  { %3749 = vmatprep.subr.bf16.mxu0 %v8211_v46  ;;  %v7909_v46 = vcombine.high %v275_v13, %v279_v14  ;;  %v239_v4 = vld [vmem:[#allocation5 + $0xb0] sm:$0xff] }
 0x180   :  { %3801 = vmatpush2.bf16.msra.mxu1 %v8346_v45  ;;  %v8298_v45 = vcombine.low %v666_v5, %v670_v7  ;;  %v363_v5 = vld [vmem:[#allocation5 + $0x490] sm:$0xff] }
 0x181   :  { %3802 = vmatprep.subr.bf16.mxu1 %v8339_v23  ;;  %v8037_v23 = vcombine.high %v403_v15, %v407_v18  ;;  %v367_v7 = vld [vmem:[#allocation5 + $0x4b0] sm:$0xff] }
 0x182   :  { %3750 = vmatpush2.bf16.msra.mxu0 %v8210_v27  ;;  %v7908_v27 = vcombine.low %v275_v13, %v279_v14  ;;  %v227_v13 = vld [vmem:[#allocation5 + $0x50] sm:$0xff] }
 0x183   :  { %3751 = vmatprep.subr.bf16.mxu0 %v8203_v30  ;;  %v7901_v30 = vcombine.high %v267_v19, %v271_v20  ;;  %v231_v14 = vld [vmem:[#allocation5 + $0x70] sm:$0xff] }
 0x184   :  { %3803 = vmatpush2.bf16.msra.mxu1 %v8338_v29  ;;  %v8036_v29 = vcombine.low %v403_v15, %v407_v18  ;;  %v355_v15 = vld [vmem:[#allocation5 + $0x450] sm:$0xff] }
 0x185   :  { %3804 = vmatprep.subr.bf16.mxu1 %v8331_v33  ;;  %v8029_v33 = vcombine.high %v395_v22, %v399_v24  ;;  %v359_v18 = vld [vmem:[#allocation5 + $0x470] sm:$0xff] }
 0x186   :  { %3752 = vmatpush2.bf16.msra.mxu0 %v8202_v59  ;;  %v7900_v59 = vcombine.low %v267_v19, %v271_v20  ;;  %v219_v19 = vld [vmem:[#allocation5 + $0x10] sm:$0xff] }
 0x187   :  { %3753 = vmatprep.subr.bf16.mxu0 %v8195_v36  ;;  %v7893_v36 = vcombine.high %v259_v31, %v263_v32  ;;  %v223_v20 = vld [vmem:[#allocation5 + $0x30] sm:$0xff] }
 0x188   :  { %3805 = vmatpush2.bf16.msra.mxu1 %v8330_v60  ;;  %v8028_v60 = vcombine.low %v395_v22, %v399_v24  ;;  %v347_v22 = vld [vmem:[#allocation5 + $0x410] sm:$0xff] }
 0x189   :  { %3806 = vmatprep.subr.bf16.mxu1 %v8323_v40  ;;  %v8021_v40 = vcombine.high %v387_v54, %v391_v34  ;;  %v351_v24 = vld [vmem:[#allocation5 + $0x430] sm:$0xff] }
 0x18a   :  { %3754 = vmatpush2.bf16.msra.mxu0 %v8194_v47  ;;  %v7892_v47 = vcombine.low %v259_v31, %v263_v32  ;;  %v339_v31 = vld [vmem:[#allocation5 + $0x3d0] sm:$0xff] }
 0x18b   :  { %3755 = vmatprep.subr.bf16.mxu0 %v8187_v50  ;;  %v7885_v50 = vcombine.high %v251_v37, %v255_v38  ;;  %v343_v32 = vld [vmem:[#allocation5 + $0x3f0] sm:$0xff] }
 0x18c   :  { %3807 = vmatpush2.bf16.msra.mxu1 %v8322_v49  ;;  %v8020_v49 = vcombine.low %v387_v54, %v391_v34  ;;  %v467_v54 = vld [vmem:[#allocation5 + $0x7d0] sm:$0xff] }
 0x18d   :  { %3808 = vmatprep.subr.bf16.mxu1 %v8315_v56  ;;  %v8013_v56 = vcombine.high %v379_v39, %v383_v41  ;;  %v471_v34 = vld [vmem:[#allocation5 + $0x7f0] sm:$0xff] }
 0x18e   :  { %3756 = vmatpush2.bf16.msra.mxu0 %v8186_v0  ;;  %v7884_v0 = vcombine.low %v251_v37, %v255_v38  ;;  %v331_v37 = vld [vmem:[#allocation5 + $0x390] sm:$0xff] }
 0x18f   :  { %3757 = vmatprep.subr.bf16.mxu0 %v8179_v2  ;;  %v7877_v2 = vcombine.high %v243_v51, %v247_v52  ;;  %v335_v38 = vld [vmem:[#allocation5 + $0x3b0] sm:$0xff] }
 0x190   :  { %3809 = vmatpush2.bf16.msra.mxu1 %v8314_v1  ;;  %v8012_v1 = vcombine.low %v379_v39, %v383_v41  ;;  %v459_v39 = vld [vmem:[#allocation5 + $0x790] sm:$0xff] }
 0x191   :  { %3810 = vmatprep.subr.bf16.mxu1 %v8307_v6  ;;  %v8005_v6 = vcombine.high %v371_v53, %v375_v57  ;;  %v463_v41 = vld [vmem:[#allocation5 + $0x7b0] sm:$0xff] }
 0x192   :  { %3758 = vmatpush2.bf16.msra.mxu0 %v8178_v10  ;;  %v7876_v10 = vcombine.low %v243_v51, %v247_v52  ;;  %v323_v51 = vld [vmem:[#allocation5 + $0x350] sm:$0xff] }
 0x193   :  { %3759 = vmatprep.subr.bf16.mxu0 %v8171_v12  ;;  %v7869_v12 = vcombine.high %v235_v3, %v239_v4  ;;  %v327_v52 = vld [vmem:[#allocation5 + $0x370] sm:$0xff] }
 0x194   :  { %3811 = vmatpush2.bf16.msra.mxu1 %v8306_v11  ;;  %v8004_v11 = vcombine.low %v371_v53, %v375_v57  ;;  %v451_v53 = vld [vmem:[#allocation5 + $0x750] sm:$0xff] }
 0x195   :  { %3812 = vmatprep.subr.bf16.mxu1 %v8299_v17  ;;  %v7997_v17 = vcombine.high %v363_v5, %v367_v7  ;;  %v455_v57 = vld [vmem:[#allocation5 + $0x770] sm:$0xff] }
 0x196   :  { %3760 = vmatpush2.bf16.msra.mxu0 %v8170_v44  ;;  %v7868_v44 = vcombine.low %v235_v3, %v239_v4  ;;  %v315_v3 = vld [vmem:[#allocation5 + $0x310] sm:$0xff] }
 0x197   :  { %3835 = vmatprep.subr.bf16.mxu0 %v7909_v46  ;;  %v7861_v46 = vcombine.high %v227_v13, %v231_v14  ;;  %v319_v4 = vld [vmem:[#allocation5 + $0x330] sm:$0xff] }
 0x198   :  { %3813 = vmatpush2.bf16.msra.mxu1 %v8298_v45  ;;  %v7996_v45 = vcombine.low %v363_v5, %v367_v7  ;;  %v443_v5 = vld [vmem:[#allocation5 + $0x710] sm:$0xff] }
 0x199   :  { %3888 = vmatprep.subr.bf16.mxu1 %v8037_v23  ;;  %3762 = vmatmul.mubr.bf16.vlgmr.msra.gmra.mxu0 %v10055_v8  ;;  %v7989_v23 = vcombine.high %v355_v15, %v359_v18  ;;  %v447_v7 = vld [vmem:[#allocation5 + $0x730] sm:$0xff] }
 0x19a   :  { %3836 = vmatpush1.bf16.msra.mxu0 %v7908_v27  ;;  %3771 = vmatprep.mubr.bf16.mxu0 %v10061_v16  ;;  %v7860_v27 = vcombine.low %v227_v13, %v231_v14  ;;  %v8084_v13 = vcombine.low %v451_v53, %v455_v57  ;;  %v7949_v14 = vcombine.high %v315_v3, %v319_v4 }
 0x19b   :  { %3815 = vmatmul.mubr.bf16.vlgmr.msra.gmra.mxu1 %v10059_v9  ;;  %3837 = vmatprep.subr.bf16.mxu0 %v7901_v30  ;;  %v7853_v30 = vcombine.high %v219_v19, %v223_v20 }
 0x19c   :  { %3889 = vmatpush1.bf16.msra.mxu1 %v8036_v29  ;;  %3824 = vmatprep.mubr.bf16.mxu1 %v10064_v42  ;;  %v7988_v29 = vcombine.low %v355_v15, %v359_v18  ;;  %v307_v15 = vld [vmem:[#allocation5 + $0x2d0] sm:$0xff] }
 0x19d   :  { %3890 = vmatprep.subr.bf16.mxu1 %v8029_v33  ;;  %v7981_v33 = vcombine.high %v347_v22, %v351_v24  ;;  %v435_v18 = vld [vmem:[#allocation5 + $0x6d0] sm:$0xff] }
 0x19e   :  { %3838 = vmatpush1.bf16.msra.mxu0 %v7900_v59  ;;  %v7852_v59 = vcombine.low %v219_v19, %v223_v20  ;;  %v7948_v20 = vcombine.low %v315_v3, %v319_v4 }
 0x19f   :  { %3839 = vmatprep.subr.bf16.mxu0 %v7893_v36  ;;  %v7973_v36 = vcombine.high %v339_v31, %v343_v32 }
 0x1a0   :  { %3891 = vmatpush1.bf16.msra.mxu1 %v8028_v60  ;;  %v7980_v60 = vcombine.low %v347_v22, %v351_v24  ;;  %v8076_v22 = vcombine.low %v443_v5, %v447_v7  ;;  %v299_v24 = vld [vmem:[#allocation5 + $0x290] sm:$0xff] }
 0x1a1   :  { %3892 = vmatprep.subr.bf16.mxu1 %v8021_v40  ;;  %3772 = vmatmul.mubr.bf16.gmra.mxu0 %v10068_v26  ;;  %v8101_v40 = vcombine.high %v467_v54, %v471_v34 }
 0x1a2   :  { %3840 = vmatpush1.bf16.msra.mxu0 %v7892_v47  ;;  %3867 = vmatprep.mubr.bf16.mxu0 %v10001_v58  ;;  %v7972_v47 = vcombine.low %v339_v31, %v343_v32  ;;  %v431_v32 = vld [vmem:[#allocation5 + $0x6b0] sm:$0xff] }
 0x1a3   :  { %3825 = vmatmul.mubr.bf16.gmra.mxu1 %v10071_v28  ;;  %3841 = vmatprep.subr.bf16.mxu0 %v7885_v50  ;;  %v7965_v50 = vcombine.high %v331_v37, %v335_v38 }
 0x1a4   :  { %3893 = vmatpush1.bf16.msra.mxu1 %v8020_v49  ;;  %3920 = vmatprep.mubr.bf16.mxu1 %v10009_v63  ;;  %v8100_v49 = vcombine.low %v467_v54, %v471_v34 }
 0x1a5   :  { %3894 = vmatprep.subr.bf16.mxu1 %v8013_v56  ;;  %v8093_v56 = vcombine.high %v459_v39, %v463_v41 }
 0x1a6   :  { %3842 = vmatpush1.bf16.msra.mxu0 %v7884_v0  ;;  %v7964_v0 = vcombine.low %v331_v37, %v335_v38  ;;  %v295_v37 = vld [vmem:[#allocation5 + $0x270] sm:$0xff] }
 0x1a7   :  { %3843 = vmatprep.subr.bf16.mxu0 %v7877_v2  ;;  %v7957_v2 = vcombine.high %v323_v51, %v327_v52  ;;  %v419_v38 = vld [vmem:[#allocation5 + $0x650] sm:$0xff] }
 0x1a8   :  { %3895 = vmatpush1.bf16.msra.mxu1 %v8012_v1  ;;  %v8092_v1 = vcombine.low %v459_v39, %v463_v41  ;;  %v423_v41 = vld [vmem:[#allocation5 + $0x670] sm:$0xff] }
 0x1a9   :  { %3896 = vmatprep.subr.bf16.mxu1 %v8005_v6  ;;  %v8085_v6 = vcombine.high %v451_v53, %v455_v57  ;;  %v283_v57 = vld [vmem:[#allocation5 + $0x210] sm:$0xff]  ;;  %v8053_v4 = vcombine.high %v419_v38, %v423_v41 }
 0x1aa   :  { %3844 = vmatpush1.bf16.msra.mxu0 %v7876_v10  ;;  %v10093_v10 = vpop.f32.mrf.mxu0 }
 0x1ab   :  { %3845 = vmatprep.subr.bf16.mxu0 %v7869_v12  ;;  %v7956_v12 = vcombine.low %v323_v51, %v327_v52  ;;  %v729_v51 = vld [vmem:[#allocation7] sm:$0xff] }
 0x1ac   :  { %3897 = vmatpush1.bf16.msra.mxu1 %v8004_v11  ;;  %v10095_v11 = vpop.f32.mrf.mxu1 }
 0x1ad   :  { %3898 = vmatprep.subr.bf16.mxu1 %v7997_v17  ;;  %v311_v17 = vld [vmem:[#allocation5 + $0x2f0] sm:$0xff] }
 0x1ae   :  { %3846 = vmatpush1.bf16.msra.mxu0 %v7868_v44  ;;  %v8077_v44 = vcombine.high %v443_v5, %v447_v7  ;;  %v10099_v19 = vpop.f32.mrf.mxu1  ;;  %v7940_v34 = vcombine.low %v307_v15, %v311_v17  ;;  %v415_v5 = vld [vmem:[#allocation5 + $0x630] sm:$0xff] }
 0x1af   :  { %3847 = vmatprep.subr.bf16.mxu0 %v7861_v46  ;;  %v10097_v46 = vpop.f32.mrf.mxu0 }
 0x1b0   :  { %3899 = vmatpush1.bf16.msra.mxu1 %v7996_v45  ;;  %v439_v45 = vld [vmem:[#allocation5 + $0x6f0] sm:$0xff] }
 0x1b1   :  { %3900 = vmatprep.subr.bf16.mxu1 %v7989_v23  ;;  %v7941_v23 = vcombine.high %v307_v15, %v311_v17  ;;  %v8069_v31 = vcombine.high %v435_v18, %v439_v45  ;;  %v10101_v54 = vpop.f32.mrf.mxu0 }
 0x1b2   :  { %3848 = vmatpush1.bf16.msra.mxu0 %v7860_v27  ;;  %v303_v27 = vld [vmem:[#allocation5 + $0x2b0] sm:$0xff] }
 0x1b3   :  { %3849 = vmatprep.subr.bf16.mxu0 %v7853_v30  ;;  %v731_v30 = vlaneseq }
 0x1b4   :  { %3901 = vmatpush1.bf16.msra.mxu1 %v7988_v29  ;;  %v427_v29 = vld [vmem:[#allocation5 + $0x690] sm:$0xff] }
 0x1b5   :  { %3902 = vmatprep.subr.bf16.mxu1 %v7981_v33  ;;  %v10103_v33 = vpop.f32.mrf.mxu1  ;;  %v10105_v39 = vshrl.u32 %v731_v30, 7  ;;  %v8060_v53 = vcombine.low %v427_v29, %v431_v32 }
 0x1b6   :  { %3850 = vmatpush1.bf16.msra.mxu0 %v7852_v59  ;;  %v8068_v59 = vcombine.low %v435_v18, %v439_v45  ;;  %v535_v45 = vld [vmem:[#allocation5 + $0x9f0] sm:$0xff] }
 0x1b7   :  { %3851 = vmatprep.subr.bf16.mxu0 %v7973_v36  ;;  %v291_v36 = vld [vmem:[#allocation5 + $0x250] sm:$0xff] }
 0x1b8   :  { %3903 = vmatpush1.bf16.msra.mxu1 %v7980_v60  ;;  %v7933_v60 = vcombine.high %v299_v24, %v303_v27  ;;  %v7924_v7 = vcombine.low %v291_v36, %v295_v37 }
 0x1b9   :  { %3904 = vmatprep.subr.bf16.mxu1 %v8101_v40  ;;  %v8061_v40 = vcombine.high %v427_v29, %v431_v32 }
 0x1ba   :  { %3852 = vmatpush2.bf16.msra.mxu0 %v7972_v47  ;;  %v10107_v47 = vpop.f32.mrf.mxu0 }
 0x1bb   :  { %3853 = vmatprep.subr.bf16.mxu0 %v7965_v50  ;;  %v7932_v50 = vcombine.low %v299_v24, %v303_v27 }
 0x1bc   :  { %3905 = vmatpush2.bf16.msra.mxu1 %v8100_v49  ;;  %v10109_v49 = vpop.f32.mrf.mxu1  ;;  %v10111_v52 = vpop.f32.mrf.mxu0 }
 0x1bd   :  { %3906 = vmatprep.subr.bf16.mxu1 %v8093_v56  ;;  %v7925_v56 = vcombine.high %v291_v36, %v295_v37  ;;  %v651_v36 = vld [vmem:[#allocation5 + $0xd90] sm:$0xff] }
 0x1be   :  { %3854 = vmatpush2.bf16.msra.mxu0 %v7964_v0  ;;  %v287_v0 = vld [vmem:[#allocation5 + $0x230] sm:$0xff]  ;;  %v10116_v3 = vpop.f32.mrf.mxu1 }
 0x1bf   :  { %3855 = vmatprep.subr.bf16.mxu0 %v7957_v2  ;;  %v10114_v2 = vsub.s32 0, %v10105_v39  ;;  %v7916_v24 = vcombine.low %v283_v57, %v287_v0  ;;  %v655_v37 = vld [vmem:[#allocation5 + $0xdb0] sm:$0xff] }
 0x1c0   :  { %3907 = vmatpush2.bf16.msra.mxu1 %v8092_v1  ;;  %v411_v1 = vld [vmem:[#allocation5 + $0x610] sm:$0xff]  ;;  %v10126_v17 = vpop.f32.mrf.mxu1 }
 0x1c1   :  { %3908 = vmatprep.subr.bf16.mxu1 %v8085_v6  ;;  %v10119_v6 = vsub.s32 1, %v10105_v39  ;;  %v10124_v15 = vrot.slane %v729_v51, %v10114_v2  ;;  %v8045_v18 = vcombine.high %v411_v1, %v415_v5  ;;  %v8044_v29 = vcombine.low %v411_v1, %v415_v5  ;;  %v10150_v1 = vld [vmem:[#allocation5 + $0xd50] sm:$0xff] }
 0x1c2   :  { %3856 = vmatpush2.bf16.msra.mxu0 %v7956_v12  ;;  %v10121_v12 = vpop.f32.mrf.mxu0  ;;  %v10135_v32 = vpop.f32.mrf.mxu1 }
 0x1c3   :  { %3857 = vmatprep.subr.bf16.mxu0 %v7949_v14  ;;  %v7917_v14 = vcombine.high %v283_v57, %v287_v0  ;;  %v8285_v0 = vcombine.high %v651_v36, %v655_v37 }
 0x1c4   :  { %3909 = vmatpush2.bf16.msra.mxu1 %v8084_v13  ;;  %v8052_v13 = vcombine.low %v419_v38, %v423_v41  ;;  %v10131_v27 = vpop.f32.mrf.mxu0  ;;  %v10146_v57 = vpop.f32.mrf.mxu1 }
 0x1c5   :  { %3910 = vmatprep.subr.bf16.mxu1 %v8077_v44  ;;  %v531_v44 = vld [vmem:[#allocation5 + $0x9d0] sm:$0xff] }
 0x1c6   :  { %3858 = vmatpush2.bf16.msra.mxu0 %v7948_v20  ;;  %v659_v20 = vld [vmem:[#allocation5 + $0xdd0] sm:$0xff]  ;;  %v8165_v30 = vcombine.high %v531_v44, %v535_v45  ;;  %v10139_v41 = vpop.f32.mrf.mxu0 }
 0x1c7   :  { %3859 = vmatprep.subr.bf16.mxu0 %v7941_v23  ;;  %v10129_v23 = vrot.slane %v729_v51, %v10119_v6 }
 0x1c8   :  { %3911 = vmatpush2.bf16.msra.mxu1 %v8076_v22  ;;  %v663_v22 = vld [vmem:[#allocation5 + $0xdf0] sm:$0xff] }
 0x1c9   :  { %3912 = vmatprep.subr.bf16.mxu1 %v8069_v31  ;;  %v3446_v31 = vadd.f32 %v10093_v10, %v10124_v15  ;;  %v3448_v38 = vadd.f32 %v10097_v46, %v10129_v23  ;;  %v10141_v10 = vld [vmem:[#allocation5 + $0x950] sm:$0xff] }
 0x1ca   :  { %3860 = vmatpush2.bf16.msra.mxu0 %v7940_v34  ;;  %v8293_v34 = vcombine.high %v659_v20, %v663_v22  ;;  %v10148_v46 = vld [vmem:[#allocation5 + $0x970] sm:$0xff] }
 0x1cb   :  { %3861 = vmatprep.subr.bf16.mxu0 %v7933_v60  ;;  %v527_v60 = vld [vmem:[#allocation5 + $0x9b0] sm:$0xff] }
 0x1cc   :  { %3913 = vmatpush2.bf16.msra.mxu1 %v8068_v59  ;;  %v523_v59 = vld [vmem:[#allocation5 + $0x990] sm:$0xff] }
 0x1cd   :  { %3914 = vmatprep.subr.bf16.mxu1 %v8061_v40  ;;  %v8164_v40 = vcombine.low %v531_v44, %v535_v45  ;;  %v8157_v51 = vcombine.high %v523_v59, %v527_v60  ;;  %v3456_v44 = vadd.f32 %v10111_v52, %v10124_v15  ;;  %v10170_v52 = vld [vmem:[#allocation5 + $0xd10] sm:$0xff] }
 0x1ce   :  { %3862 = vmatpush2.bf16.msra.mxu0 %v7932_v50  ;;  %v8292_v50 = vcombine.low %v659_v20, %v663_v22  ;;  %v8149_v20 = vcombine.high %v10141_v10, %v10148_v46  ;;  %v10165_v22 = vld [vmem:[#allocation5 + $0x910] sm:$0xff] }
 0x1cf   :  { %3863 = vmatprep.subr.bf16.mxu0 %v7925_v56  ;;  %v3450_v56 = vadd.f32 %v10101_v54, %v10124_v15  ;;  %v3452_v54 = vadd.f32 %v10107_v47, %v10129_v23  ;;  %v10167_v47 = vld [vmem:[#allocation5 + $0x930] sm:$0xff] }
 0x1d0   :  { %3915 = vmatpush2.bf16.msra.mxu1 %v8060_v53  ;;  %v3499_v53 = vadd.f32 %v10095_v11, %v3446_v31  ;;  %v3501_v11 = vadd.f32 %v10099_v19, %v3448_v38 }
 0x1d1   :  { %3916 = vmatprep.subr.bf16.mxu1 %v8053_v4  ;;  %v10152_v4 = vld [vmem:[#allocation5 + $0xd70] sm:$0xff] }
 0x1d2   :  { %3864 = vmatpush2.bf16.msra.mxu0 %v7924_v7  ;;  %v8156_v7 = vcombine.low %v523_v59, %v527_v60  ;;  %v8277_v19 = vcombine.high %v10150_v1, %v10152_v4  ;;  %v3458_v59 = vadd.f32 %v10121_v12, %v10129_v23  ;;  %v3509_v12 = vadd.f32 %v10116_v3, %v3456_v44  ;;  %v10197_v3 = vld [vmem:[#allocation5 + $0xcd0] sm:$0xff] }
 0x1d3   :  { %3865 = vmatprep.subr.bf16.mxu0 %v7917_v14 }
 0x1d4   :  { %3917 = vmatpush2.bf16.msra.mxu1 %v8052_v13  ;;  %v8284_v13 = vcombine.low %v651_v36, %v655_v37  ;;  %v8148_v36 = vcombine.low %v10141_v10, %v10148_v46  ;;  %v3505_v37 = vadd.f32 %v10109_v49, %v3452_v54  ;;  %v3460_v10 = vadd.f32 %v10131_v27, %v10124_v15  ;;  %v10192_v49 = vld [vmem:[#allocation5 + $0x8d0] sm:$0xff] }
 0x1d5   :  { %3918 = vmatprep.subr.bf16.mxu1 %v8045_v18  ;;  %v10199_v15 = vld [vmem:[#allocation5 + $0xcf0] sm:$0xff]  ;;  %v3511_v27 = vadd.f32 %v10126_v17, %v3458_v59  ;;  %v8140_v54 = vcombine.low %v10165_v22, %v10167_v47 }
 0x1d6   :  { %3866 = vmatpush2.bf16.msra.mxu0 %v7916_v24  ;;  %v3503_v24 = vadd.f32 %v10103_v33, %v3450_v56  ;;  %v8276_v33 = vcombine.low %v10150_v1, %v10152_v4  ;;  %v3513_v17 = vadd.f32 %v10135_v32, %v3460_v10  ;;  %v619_v32 = vld [vmem:[#allocation5 + $0xc90] sm:$0xff] }
 0x1d7   :  { %3941 = vmatprep.subr.bf16.mxu0 %v8165_v30  ;;  %v623_v59 = vld [vmem:[#allocation5 + $0xcb0] sm:$0xff] }
 0x1d8   :  { %3919 = vmatpush2.bf16.msra.mxu1 %v8044_v29 }
 0x1d9   :  { %3994 = vmatprep.subr.bf16.mxu1 %v8293_v34  ;;  %v3551_v5 = vpop.f32.mrf.mxu0  ;;  %3868 = vmatmul.mubr.bf16.vlgmr.msra.gmra.mxu0 %v10015_v21  ;;  %v10172_v34 = vld [vmem:[#allocation5 + $0xd30] sm:$0xff] }
 0x1da   :  { %v3552_v14 = vadd.f32 %v3551_v5, %v3499_v53  ;;  %3942 = vmatpush1.bf16.msra.mxu0 %v8164_v40  ;;  %3877 = vmatprep.mubr.bf16.mxu0 %v10021_v55  ;;  %v8269_v56 = vcombine.high %v10170_v52, %v10172_v34 }
 0x1db   :  { %v3604_v18 = vpop.f32.mrf.mxu1  ;;  %3921 = vmatmul.mubr.bf16.vlgmr.msra.gmra.mxu1 %v10019_v25  ;;  %v3553_v45 = vpop.f32.mrf.mxu0  ;;  %3943 = vmatprep.subr.bf16.mxu0 %v8157_v51  ;;  %v8141_v51 = vcombine.high %v10165_v22, %v10167_v47  ;;  %v8261_v22 = vcombine.high %v10197_v3, %v10199_v15  ;;  %v491_v47 = vld [vmem:[#allocation5 + $0x890] sm:$0xff] }
 0x1dc   :  { %3995 = vmatpush1.bf16.msra.mxu1 %v8292_v50  ;;  %v3605_v29 = vadd.f32 %v3604_v18, %v3552_v14  ;;  %v3554_v30 = vadd.f32 %v3553_v45, %v3501_v11  ;;  %3930 = vmatprep.mubr.bf16.mxu1 %v10024_v35  ;;  %v8268_v14 = vcombine.low %v10170_v52, %v10172_v34  ;;  %v495_v34 = vld [vmem:[#allocation5 + $0x8b0] sm:$0xff] }
 0x1dd   :  { %v3606_v31 = vpop.f32.mrf.mxu1  ;;  %3996 = vmatprep.subr.bf16.mxu1 %v8285_v0  ;;  %v3555_v60 = vpop.f32.mrf.mxu0  ;;  %v8125_v10 = vcombine.high %v491_v47, %v495_v34 }
 0x1de   :  { %v10183_v38 = vadd.f32 %v3606_v31, %v3554_v30  ;;  %v3556_v40 = vadd.f32 %v3555_v60, %v3503_v24  ;;  %3944 = vmatpush1.bf16.msra.mxu0 %v8156_v7  ;;  %v4259_v0 = vmax.f32 %v3605_v29, 0.0  ;;  %v10195_v7 = vld [vmem:[#allocation5 + $0x8f0] sm:$0xff] }
 0x1df   :  { %v3608_v50 = vpop.f32.mrf.mxu1  ;;  %v3557_v53 = vpop.f32.mrf.mxu0  ;;  %3945 = vmatprep.subr.bf16.mxu0 %v8149_v20 }
 0x1e0   :  { %3997 = vmatpush1.bf16.msra.mxu1 %v8284_v13  ;;  %v4260_v46 = vmax.f32 %v10183_v38, 0.0  ;;  %v3609_v1 = vadd.f32 %v3608_v50, %v3556_v40  ;;  %v3558_v4 = vadd.f32 %v3557_v53, %v3505_v37  ;;  %v3462_v13 = vadd.f32 %v10139_v41, %v10129_v23 }
 0x1e1   :  { %v3610_v5 = vpop.f32.mrf.mxu1  ;;  %3998 = vmatprep.subr.bf16.mxu1 %v8277_v19  ;;  %v3561_v11 = vpop.f32.mrf.mxu0  ;;  %3878 = vmatmul.mubr.bf16.gmra.mxu0 %v10030_v43  ;;  %v8133_v41 = vcombine.high %v10192_v49, %v10195_v7  ;;  %v8253_v53 = vcombine.high %v619_v32, %v623_v59 }
 0x1e2   :  { %v8769_v18 = vpack.c.bf16 %v4260_v46, %v4259_v0  ;;  %v4267_v44 = vmax.f32 %v3609_v1, 0.0  ;;  %v3611_v45 = vadd.f32 %v3610_v5, %v3558_v4  ;;  %v3562_v20 = vadd.f32 %v3561_v11, %v3509_v12  ;;  %3946 = vmatpush1.bf16.msra.mxu0 %v8148_v36  ;;  %3973 = vmatprep.mubr.bf16.mxu0 %v10043_v61 }
 0x1e3   :  { %v3614_v19 = vpop.f32.mrf.mxu1  ;;  %3931 = vmatmul.mubr.bf16.gmra.mxu1 %v10039_v48  ;;  %v3563_v23 = vpop.f32.mrf.mxu0  ;;  %3947 = vmatprep.subr.bf16.mxu0 %v8141_v51  ;;  %v8132_v36 = vcombine.low %v10192_v49, %v10195_v7  ;;  %v3515_v37 = vadd.f32 %v10146_v57, %v3462_v13  ;;  %v483_v57 = vld [vmem:[#allocation5 + $0x850] sm:$0xff] }
 0x1e4   :  { %3999 = vmatpush1.bf16.msra.mxu1 %v8276_v33  ;;  %6648 = vst [vmem:[#allocation23] sm:$0xff] %v8769_v18  ;;  %v10215_v24 = vpack.c.bf16 %v4267_v44, %v4259_v0  ;;  %v4268_v29 = vmax.f32 %v3611_v45, 0.0  ;;  %v3564_v30 = vadd.f32 %v3563_v23, %v3511_v27  ;;  %v3615_v31 = vadd.f32 %v3614_v19, %v3562_v20  ;;  %v487_v7 = vld [vmem:[#allocation5 + $0x870] sm:$0xff] }
 0x1e5   :  { %v3616_v52 = vpop.f32.mrf.mxu1  ;;  %4000 = vmatprep.subr.bf16.mxu1 %v8269_v56  ;;  %v3565_v60 = vpop.f32.mrf.mxu0  ;;  %v8260_v33 = vcombine.low %v10197_v3, %v10199_v15  ;;  %4026 = vmatprep.mubr.bf16.mxu1 %v10048_v62  ;;  %v611_v3 = vld [vmem:[#allocation5 + $0xc50] sm:$0xff] }
 0x1e6   :  { %v8773_v38 = vpack.c.bf16 %v4268_v29, %v4267_v44  ;;  %v3566_v40 = vadd.f32 %v3565_v60, %v3513_v17  ;;  %v3617_v50 = vadd.f32 %v3616_v52, %v3564_v30  ;;  %3948 = vmatpush1.bf16.msra.mxu0 %v8140_v54  ;;  %v10224_v56 = vpack.c.bf16 %v4268_v29, %v4260_v46  ;;  %v615_v15 = vld [vmem:[#allocation5 + $0xc70] sm:$0xff] }
 0x1e7   :  { %v3618_v51 = vpop.f32.mrf.mxu1  ;;  %v3567_v12 = vpop.f32.mrf.mxu0  ;;  %3949 = vmatprep.subr.bf16.mxu0 %v8133_v41  ;;  %v4275_v49 = vmax.f32 %v3615_v31, 0.0  ;;  %v8124_v54 = vcombine.low %v491_v47, %v495_v34  ;;  %v8252_v46 = vcombine.low %v619_v32, %v623_v59  ;;  %v8245_v45 = vcombine.high %v611_v3, %v615_v15  ;;  %v475_v20 = vld [vmem:[#allocation5 + $0x810] sm:$0xff] }
 0x1e8   :  { %4001 = vmatpush1.bf16.msra.mxu1 %v8268_v14  ;;  %6652 = vst [vmem:[#allocation23 + $0x30] sm:$0xff] %v8773_v38  ;;  %v4276_v0 = vmax.f32 %v3617_v50, 0.0  ;;  %v3568_v1 = vadd.f32 %v3567_v12, %v3515_v37  ;;  %v3619_v4 = vadd.f32 %v3618_v51, %v3566_v40  ;;  %v8117_v14 = vcombine.high %v483_v57, %v487_v7  ;;  %v479_v19 = vld [vmem:[#allocation5 + $0x830] sm:$0xff] }
 0x1e9   :  { %v3620_v5 = vpop.f32.mrf.mxu1  ;;  %4002 = vmatprep.subr.bf16.mxu1 %v8261_v22  ;;  %v603_v17 = vld [vmem:[#allocation5 + $0xc10] sm:$0xff]  ;;  %v8116_v22 = vcombine.low %v483_v57, %v487_v7  ;;  %v8244_v47 = vcombine.low %v611_v3, %v615_v15  ;;  %v8109_v30 = vcombine.high %v475_v20, %v479_v19  ;;  %v8108_v60 = vcombine.low %v475_v20, %v479_v19 }
 0x1ea   :  { %v8777_v27 = vpack.c.bf16 %v4276_v0, %v4275_v49  ;;  %v4283_v13 = vmax.f32 %v3619_v4, 0.0  ;;  %v3621_v11 = vadd.f32 %v3620_v5, %v3568_v1  ;;  %3950 = vmatpush1.bf16.msra.mxu0 %v8132_v36  ;;  %v607_v23 = vld [vmem:[#allocation5 + $0xc30] sm:$0xff] }
 0x1eb   :  { %3951 = vmatprep.subr.bf16.mxu0 %v8125_v10  ;;  %v8237_v31 = vcombine.high %v603_v17, %v607_v23  ;;  %v595_v52 = vld [vmem:[#allocation5 + $0xbd0] sm:$0xff]  ;;  %v8236_v36 = vcombine.low %v603_v17, %v607_v23 }
 0x1ec   :  { %4003 = vmatpush1.bf16.msra.mxu1 %v8260_v33  ;;  %6656 = vst [vmem:[#allocation23 + $0x60] sm:$0xff] %v8777_v27  ;;  %v10226_v18 = vpack.c.bf16 %v4283_v13, %v4275_v49  ;;  %v4284_v44 = vmax.f32 %v3621_v11, 0.0  ;;  %v599_v34 = vld [vmem:[#allocation5 + $0xbf0] sm:$0xff] }
 0x1ed   :  { %4004 = vmatprep.subr.bf16.mxu1 %v8253_v53  ;;  %v723_v32 = vld [vmem:[#allocation5 + $0xfd0] sm:$0xff]  ;;  %v8229_v33 = vcombine.high %v595_v52, %v599_v34  ;;  %v8228_v12 = vcombine.low %v595_v52, %v599_v34 }
 0x1ee   :  { %v8781_v41 = vpack.c.bf16 %v4284_v44, %v4283_v13  ;;  %3952 = vmatpush1.bf16.msra.mxu0 %v8124_v54  ;;  %v10228_v29 = vpack.c.bf16 %v4284_v44, %v4276_v0  ;;  %v727_v59 = vld [vmem:[#allocation5 + $0xff0] sm:$0xff] }
 0x1ef   :  { %3953 = vmatprep.subr.bf16.mxu0 %v8117_v14  ;;  %v8357_v37 = vcombine.high %v723_v32, %v727_v59  ;;  %v587_v38 = vld [vmem:[#allocation5 + $0xb90] sm:$0xff]  ;;  %v8356_v10 = vcombine.low %v723_v32, %v727_v59 }
 0x1f0   :  { %4005 = vmatpush1.bf16.msra.mxu1 %v8252_v46  ;;  %6660 = vst [vmem:[#allocation23 + $0x90] sm:$0xff] %v8781_v41  ;;  %v591_v40 = vld [vmem:[#allocation5 + $0xbb0] sm:$0xff] }
 0x1f1   :  { %4006 = vmatprep.subr.bf16.mxu1 %v8245_v45  ;;  %v715_v50 = vld [vmem:[#allocation5 + $0xf90] sm:$0xff]  ;;  %v8221_v53 = vcombine.high %v587_v38, %v591_v40  ;;  %v8220_v57 = vcombine.low %v587_v38, %v591_v40 }
 0x1f2   :  { %3954 = vmatpush1.bf16.msra.mxu0 %v8116_v22  ;;  %v719_v51 = vld [vmem:[#allocation5 + $0xfb0] sm:$0xff] }
 0x1f3   :  { %3955 = vmatprep.subr.bf16.mxu0 %v8109_v30  ;;  %v8349_v49 = vcombine.high %v715_v50, %v719_v51  ;;  %v579_v0 = vld [vmem:[#allocation5 + $0xb50] sm:$0xff]  ;;  %v8348_v7 = vcombine.low %v715_v50, %v719_v51 }
 0x1f4   :  { %4007 = vmatpush1.bf16.msra.mxu1 %v8244_v47  ;;  %v583_v1 = vld [vmem:[#allocation5 + $0xb70] sm:$0xff] }
 0x1f5   :  { %4008 = vmatprep.subr.bf16.mxu1 %v8237_v31  ;;  %v707_v4 = vld [vmem:[#allocation5 + $0xf50] sm:$0xff]  ;;  %v8213_v3 = vcombine.high %v579_v0, %v583_v1  ;;  %v8212_v46 = vcombine.low %v579_v0, %v583_v1 }
 0x1f6   :  { %3956 = vmatpush1.bf16.msra.mxu0 %v8108_v60  ;;  %v711_v5 = vld [vmem:[#allocation5 + $0xf70] sm:$0xff] }
 0x1f7   :  { %3957 = vmatprep.subr.bf16.mxu0 %v8229_v33  ;;  %v8341_v15 = vcombine.high %v707_v4, %v711_v5  ;;  %v571_v27 = vld [vmem:[#allocation5 + $0xb10] sm:$0xff]  ;;  %v8340_v14 = vcombine.low %v707_v4, %v711_v5 }
 0x1f8   :  { %4009 = vmatpush1.bf16.msra.mxu1 %v8236_v36  ;;  %v575_v13 = vld [vmem:[#allocation5 + $0xb30] sm:$0xff] }
 0x1f9   :  { %4010 = vmatprep.subr.bf16.mxu1 %v8357_v37  ;;  %v699_v11 = vld [vmem:[#allocation5 + $0xf10] sm:$0xff]  ;;  %v8205_v44 = vcombine.high %v571_v27, %v575_v13  ;;  %v8204_v41 = vcombine.low %v571_v27, %v575_v13  ;;  %v280_v27 = vld [vmem:[#allocation5 + $0x1f8] sm:$0xff] }
 0x1fa   :  { %3958 = vmatpush2.bf16.msra.mxu0 %v8228_v12  ;;  %v703_v54 = vld [vmem:[#allocation5 + $0xf30] sm:$0xff]  ;;  %v404_v13 = vld [vmem:[#allocation5 + $0x5d8] sm:$0xff] }
 0x1fb   :  { %3959 = vmatprep.subr.bf16.mxu0 %v8221_v53  ;;  %v8333_v45 = vcombine.high %v699_v11, %v703_v54  ;;  %v563_v20 = vld [vmem:[#allocation5 + $0xad0] sm:$0xff]  ;;  %v8332_v22 = vcombine.low %v699_v11, %v703_v54  ;;  %v408_v11 = vld [vmem:[#allocation5 + $0x5f8] sm:$0xff] }
 0x1fc   :  { %4011 = vmatpush2.bf16.msra.mxu1 %v8356_v10  ;;  %v567_v19 = vld [vmem:[#allocation5 + $0xaf0] sm:$0xff] }
 0x1fd   :  { %4012 = vmatprep.subr.bf16.mxu1 %v8349_v49  ;;  %v691_v17 = vld [vmem:[#allocation5 + $0xed0] sm:$0xff]  ;;  %v8197_v47 = vcombine.high %v563_v20, %v567_v19  ;;  %v8196_v59 = vcombine.low %v563_v20, %v567_v19  ;;  %v272_v20 = vld [vmem:[#allocation5 + $0x1b8] sm:$0xff] }
 0x1fe   :  { %3960 = vmatpush2.bf16.msra.mxu0 %v8220_v57  ;;  %v695_v23 = vld [vmem:[#allocation5 + $0xef0] sm:$0xff]  ;;  %v396_v19 = vld [vmem:[#allocation5 + $0x598] sm:$0xff] }
 0x1ff   :  { %3961 = vmatprep.subr.bf16.mxu0 %v8213_v3  ;;  %v8325_v30 = vcombine.high %v691_v17, %v695_v23  ;;  %v555_v31 = vld [vmem:[#allocation5 + $0xa90] sm:$0xff]  ;;  %v8324_v60 = vcombine.low %v691_v17, %v695_v23  ;;  %v400_v17 = vld [vmem:[#allocation5 + $0x5b8] sm:$0xff] }
 0x200   :  { %4013 = vmatpush2.bf16.msra.mxu1 %v8348_v7  ;;  %v559_v52 = vld [vmem:[#allocation5 + $0xab0] sm:$0xff] }
 0x201   :  { %4014 = vmatprep.subr.bf16.mxu1 %v8341_v15  ;;  %v683_v34 = vld [vmem:[#allocation5 + $0xe90] sm:$0xff]  ;;  %v8189_v36 = vcombine.high %v555_v31, %v559_v52  ;;  %v8188_v51 = vcombine.low %v555_v31, %v559_v52  ;;  %v276_v15 = vld [vmem:[#allocation5 + $0x1d8] sm:$0xff] }
 0x202   :  { %3962 = vmatpush2.bf16.msra.mxu0 %v8212_v46  ;;  %v687_v32 = vld [vmem:[#allocation5 + $0xeb0] sm:$0xff]  ;;  %v7910_v23 = vcombine.low %v276_v15, %v280_v27  ;;  %v264_v31 = vld [vmem:[#allocation5 + $0x178] sm:$0xff] }
 0x203   :  { %3963 = vmatprep.subr.bf16.mxu0 %v8205_v44  ;;  %v8317_v33 = vcombine.high %v683_v34, %v687_v32  ;;  %v547_v37 = vld [vmem:[#allocation5 + $0xa50] sm:$0xff]  ;;  %v8316_v12 = vcombine.low %v683_v34, %v687_v32  ;;  %v8039_v44 = vcombine.high %v404_v13, %v408_v11  ;;  %v388_v52 = vld [vmem:[#allocation5 + $0x558] sm:$0xff] }
 0x204   :  { %4015 = vmatpush2.bf16.msra.mxu1 %v8340_v14  ;;  %v551_v38 = vld [vmem:[#allocation5 + $0xa70] sm:$0xff]  ;;  %v7911_v14 = vcombine.high %v276_v15, %v280_v27  ;;  %v392_v34 = vld [vmem:[#allocation5 + $0x578] sm:$0xff] }
 0x205   :  { %4016 = vmatprep.subr.bf16.mxu1 %v8333_v45  ;;  %v675_v40 = vld [vmem:[#allocation5 + $0xe50] sm:$0xff]  ;;  %v8181_v10 = vcombine.high %v547_v37, %v551_v38  ;;  %v8180_v5 = vcombine.low %v547_v37, %v551_v38  ;;  %v268_v45 = vld [vmem:[#allocation5 + $0x198] sm:$0xff] }
 0x206   :  { %3964 = vmatpush2.bf16.msra.mxu0 %v8204_v41  ;;  %v679_v50 = vld [vmem:[#allocation5 + $0xe70] sm:$0xff]  ;;  %v8038_v41 = vcombine.low %v404_v13, %v408_v11  ;;  %v7902_v32 = vcombine.low %v268_v45, %v272_v20  ;;  %v256_v37 = vld [vmem:[#allocation5 + $0x138] sm:$0xff] }
 0x207   :  { %3965 = vmatprep.subr.bf16.mxu0 %v8197_v47  ;;  %v8309_v53 = vcombine.high %v675_v40, %v679_v50  ;;  %v539_v49 = vld [vmem:[#allocation5 + $0xa10] sm:$0xff]  ;;  %v8308_v57 = vcombine.low %v675_v40, %v679_v50  ;;  %v8031_v47 = vcombine.high %v396_v19, %v400_v17  ;;  %v380_v38 = vld [vmem:[#allocation5 + $0x518] sm:$0xff] }
 0x208   :  { %4017 = vmatpush2.bf16.msra.mxu1 %v8332_v22  ;;  %v543_v0 = vld [vmem:[#allocation5 + $0xa30] sm:$0xff]  ;;  %v7903_v22 = vcombine.high %v268_v45, %v272_v20  ;;  %v384_v40 = vld [vmem:[#allocation5 + $0x538] sm:$0xff] }
 0x209   :  { %4018 = vmatprep.subr.bf16.mxu1 %v8325_v30  ;;  %v667_v1 = vld [vmem:[#allocation5 + $0xe10] sm:$0xff]  ;;  %v8173_v7 = vcombine.high %v539_v49, %v543_v0  ;;  %v8172_v54 = vcombine.low %v539_v49, %v543_v0  ;;  %v260_v30 = vld [vmem:[#allocation5 + $0x158] sm:$0xff] }
 0x20a   :  { %3966 = vmatpush2.bf16.msra.mxu0 %v8196_v59  ;;  %v671_v4 = vld [vmem:[#allocation5 + $0xe30] sm:$0xff]  ;;  %v8030_v59 = vcombine.low %v396_v19, %v400_v17  ;;  %v7894_v50 = vcombine.low %v260_v30, %v264_v31  ;;  %v248_v49 = vld [vmem:[#allocation5 + $0xf8] sm:$0xff] }
 0x20b   :  { %3967 = vmatprep.subr.bf16.mxu0 %v8189_v36  ;;  %v8301_v3 = vcombine.high %v667_v1, %v671_v4  ;;  %v8300_v46 = vcombine.low %v667_v1, %v671_v4  ;;  %v8023_v36 = vcombine.high %v388_v52, %v392_v34  ;;  %v372_v0 = vld [vmem:[#allocation5 + $0x4d8] sm:$0xff] }
 0x20c   :  { %4019 = vmatpush2.bf16.msra.mxu1 %v8324_v60  ;;  %v7895_v60 = vcombine.high %v260_v30, %v264_v31  ;;  %v376_v1 = vld [vmem:[#allocation5 + $0x4f8] sm:$0xff] }
 0x20d   :  { %4020 = vmatprep.subr.bf16.mxu1 %v8317_v33  ;;  %v252_v33 = vld [vmem:[#allocation5 + $0x118] sm:$0xff] }
 0x20e   :  { %3968 = vmatpush2.bf16.msra.mxu0 %v8188_v51  ;;  %v8022_v51 = vcombine.low %v388_v52, %v392_v34  ;;  %v7886_v4 = vcombine.low %v252_v33, %v256_v37  ;;  %v240_v15 = vld [vmem:[#allocation5 + $0xb8] sm:$0xff] }
 0x20f   :  { %3969 = vmatprep.subr.bf16.mxu0 %v8181_v10  ;;  %v8015_v10 = vcombine.high %v380_v38, %v384_v40  ;;  %v364_v27 = vld [vmem:[#allocation5 + $0x498] sm:$0xff] }
 0x210   :  { %4021 = vmatpush2.bf16.msra.mxu1 %v8316_v12  ;;  %v7887_v12 = vcombine.high %v252_v33, %v256_v37  ;;  %v368_v13 = vld [vmem:[#allocation5 + $0x4b8] sm:$0xff] }
 0x211   :  { %4022 = vmatprep.subr.bf16.mxu1 %v8309_v53  ;;  %v244_v53 = vld [vmem:[#allocation5 + $0xd8] sm:$0xff] }
 0x212   :  { %3970 = vmatpush2.bf16.msra.mxu0 %v8180_v5  ;;  %v8014_v5 = vcombine.low %v380_v38, %v384_v40  ;;  %v7878_v11 = vcombine.low %v244_v53, %v248_v49  ;;  %v232_v45 = vld [vmem:[#allocation5 + $0x78] sm:$0xff] }
 0x213   :  { %3971 = vmatprep.subr.bf16.mxu0 %v8173_v7  ;;  %v8007_v7 = vcombine.high %v372_v0, %v376_v1  ;;  %v356_v20 = vld [vmem:[#allocation5 + $0x458] sm:$0xff] }
 0x214   :  { %4023 = vmatpush2.bf16.msra.mxu1 %v8308_v57  ;;  %v7879_v57 = vcombine.high %v244_v53, %v248_v49  ;;  %v360_v19 = vld [vmem:[#allocation5 + $0x478] sm:$0xff] }
 0x215   :  { %4024 = vmatprep.subr.bf16.mxu1 %v8301_v3  ;;  %v236_v3 = vld [vmem:[#allocation5 + $0x98] sm:$0xff]  ;;  %v7990_v52 = vcombine.low %v356_v20, %v360_v19 }
 0x216   :  { %3972 = vmatpush2.bf16.msra.mxu0 %v8172_v54  ;;  %v8006_v54 = vcombine.low %v372_v0, %v376_v1  ;;  %v7870_v17 = vcombine.low %v236_v3, %v240_v15  ;;  %v352_v30 = vld [vmem:[#allocation5 + $0x438] sm:$0xff] }
 0x217   :  { %4047 = vmatprep.subr.bf16.mxu0 %v7911_v14  ;;  %v7999_v14 = vcombine.high %v364_v27, %v368_v13  ;;  %v472_v33 = vld [vmem:[#allocation5 + $0x7f8] sm:$0xff] }
 0x218   :  { %4025 = vmatpush2.bf16.msra.mxu1 %v8300_v46  ;;  %v7871_v46 = vcombine.high %v236_v3, %v240_v15  ;;  %v464_v53 = vld [vmem:[#allocation5 + $0x7b8] sm:$0xff] }
 0x219   :  { %4100 = vmatprep.subr.bf16.mxu1 %v8039_v44  ;;  %3974 = vmatmul.mubr.bf16.vlgmr.msra.gmra.mxu0 %v10055_v8  ;;  %v228_v44 = vld [vmem:[#allocation5 + $0x58] sm:$0xff] }
 0x21a   :  { %4048 = vmatpush1.bf16.msra.mxu0 %v7910_v23  ;;  %3983 = vmatprep.mubr.bf16.mxu0 %v10061_v16  ;;  %v7863_v23 = vcombine.high %v228_v44, %v232_v45  ;;  %v7862_v31 = vcombine.low %v228_v44, %v232_v45  ;;  %v456_v3 = vld [vmem:[#allocation5 + $0x778] sm:$0xff] }
 0x21b   :  { %4027 = vmatmul.mubr.bf16.vlgmr.msra.gmra.mxu1 %v10059_v9  ;;  %4049 = vmatprep.subr.bf16.mxu0 %v7903_v22  ;;  %v224_v22 = vld [vmem:[#allocation5 + $0x38] sm:$0xff] }
 0x21c   :  { %4101 = vmatpush1.bf16.msra.mxu1 %v8038_v41  ;;  %4036 = vmatprep.mubr.bf16.mxu1 %v10064_v42  ;;  %v220_v41 = vld [vmem:[#allocation5 + $0x18] sm:$0xff] }
 0x21d   :  { %4102 = vmatprep.subr.bf16.mxu1 %v8031_v47  ;;  %v348_v47 = vld [vmem:[#allocation5 + $0x418] sm:$0xff]  ;;  %v7855_v34 = vcombine.high %v220_v41, %v224_v22  ;;  %v7854_v37 = vcombine.low %v220_v41, %v224_v22 }
 0x21e   :  { %4050 = vmatpush1.bf16.msra.mxu0 %v7902_v32  ;;  %v7983_v32 = vcombine.high %v348_v47, %v352_v30  ;;  %v7982_v38 = vcombine.low %v348_v47, %v352_v30  ;;  %v444_v44 = vld [vmem:[#allocation5 + $0x718] sm:$0xff] }
 0x21f   :  { %4051 = vmatprep.subr.bf16.mxu0 %v7895_v60  ;;  %v344_v60 = vld [vmem:[#allocation5 + $0x3f8] sm:$0xff] }
 0x220   :  { %4103 = vmatpush1.bf16.msra.mxu1 %v8030_v59  ;;  %v340_v59 = vld [vmem:[#allocation5 + $0x3d8] sm:$0xff] }
 0x221   :  { %4104 = vmatprep.subr.bf16.mxu1 %v8023_v36  ;;  %3984 = vmatmul.mubr.bf16.gmra.mxu0 %v10068_v26  ;;  %v468_v36 = vld [vmem:[#allocation5 + $0x7d8] sm:$0xff]  ;;  %v7975_v40 = vcombine.high %v340_v59, %v344_v60  ;;  %v7974_v49 = vcombine.low %v340_v59, %v344_v60 }
 0x222   :  { %4052 = vmatpush1.bf16.msra.mxu0 %v7894_v50  ;;  %4079 = vmatprep.mubr.bf16.mxu0 %v10001_v58  ;;  %v7998_v58 = vcombine.low %v364_v27, %v368_v13  ;;  %v8103_v50 = vcombine.high %v468_v36, %v472_v33  ;;  %v8102_v0 = vcombine.low %v468_v36, %v472_v33  ;;  %v448_v45 = vld [vmem:[#allocation5 + $0x738] sm:$0xff] }
 0x223   :  { %4037 = vmatmul.mubr.bf16.gmra.mxu1 %v10071_v28  ;;  %4053 = vmatprep.subr.bf16.mxu0 %v7887_v12  ;;  %v336_v12 = vld [vmem:[#allocation5 + $0x3b8] sm:$0xff] }
 0x224   :  { %4105 = vmatpush1.bf16.msra.mxu1 %v8022_v51  ;;  %4132 = vmatprep.mubr.bf16.mxu1 %v10009_v63  ;;  %v7991_v63 = vcombine.high %v356_v20, %v360_v19  ;;  %v332_v51 = vld [vmem:[#allocation5 + $0x398] sm:$0xff]  ;;  %v10240_v20 = vpop.f32.mrf.mxu1 }
 0x225   :  { %4106 = vmatprep.subr.bf16.mxu1 %v8015_v10  ;;  %v460_v10 = vld [vmem:[#allocation5 + $0x798] sm:$0xff]  ;;  %v7967_v1 = vcombine.high %v332_v51, %v336_v12  ;;  %v7966_v15 = vcombine.low %v332_v51, %v336_v12 }
 0x226   :  { %4054 = vmatpush1.bf16.msra.mxu0 %v7886_v4  ;;  %v8095_v4 = vcombine.high %v460_v10, %v464_v53  ;;  %v8094_v27 = vcombine.low %v460_v10, %v464_v53  ;;  %v312_v41 = vld [vmem:[#allocation5 + $0x2f8] sm:$0xff] }
 0x227   :  { %4055 = vmatprep.subr.bf16.mxu0 %v7879_v57  ;;  %v328_v57 = vld [vmem:[#allocation5 + $0x378] sm:$0xff] }
 0x228   :  { %4107 = vmatpush1.bf16.msra.mxu1 %v8014_v5  ;;  %v324_v5 = vld [vmem:[#allocation5 + $0x358] sm:$0xff] }
 0x229   :  { %4108 = vmatprep.subr.bf16.mxu1 %v8007_v7  ;;  %v452_v7 = vld [vmem:[#allocation5 + $0x758] sm:$0xff]  ;;  %v7959_v13 = vcombine.high %v324_v5, %v328_v57  ;;  %v7958_v19 = vcombine.low %v324_v5, %v328_v57 }
 0x22a   :  { %4056 = vmatpush1.bf16.msra.mxu0 %v7878_v11  ;;  %v8087_v11 = vcombine.high %v452_v7, %v456_v3  ;;  %v436_v47 = vld [vmem:[#allocation5 + $0x6d8] sm:$0xff] }
 0x22b   :  { %4057 = vmatprep.subr.bf16.mxu0 %v7871_v46  ;;  %v320_v46 = vld [vmem:[#allocation5 + $0x338] sm:$0xff] }
 0x22c   :  { %4109 = vmatpush1.bf16.msra.mxu1 %v8006_v54  ;;  %v316_v54 = vld [vmem:[#allocation5 + $0x318] sm:$0xff] }
 0x22d   :  { %4110 = vmatprep.subr.bf16.mxu1 %v7999_v14  ;;  %v10238_v14 = vpop.f32.mrf.mxu0  ;;  %v440_v30 = vld [vmem:[#allocation5 + $0x6f8] sm:$0xff] }
 0x22e   :  { %4058 = vmatpush1.bf16.msra.mxu0 %v7870_v17  ;;  %v8086_v17 = vcombine.low %v452_v7, %v456_v3  ;;  %v8071_v59 = vcombine.high %v436_v47, %v440_v30  ;;  %v300_v60 = vld [vmem:[#allocation5 + $0x298] sm:$0xff]  ;;  %v8070_v51 = vcombine.low %v436_v47, %v440_v30 }
 0x22f   :  { %4059 = vmatprep.subr.bf16.mxu0 %v7863_v23  ;;  %v8079_v23 = vcombine.high %v444_v44, %v448_v45  ;;  %v10242_v22 = vpop.f32.mrf.mxu0  ;;  %v304_v36 = vld [vmem:[#allocation5 + $0x2b8] sm:$0xff] }
 0x230   :  { %4111 = vmatpush1.bf16.msra.mxu1 %v7998_v58  ;;  %v7951_v58 = vcombine.high %v316_v54, %v320_v46  ;;  %v7935_v12 = vcombine.high %v300_v60, %v304_v36  ;;  %v292_v53 = vld [vmem:[#allocation5 + $0x258] sm:$0xff]  ;;  %v7934_v57 = vcombine.low %v300_v60, %v304_v36 }
 0x231   :  { %4112 = vmatprep.subr.bf16.mxu1 %v7991_v63  ;;  %v308_v63 = vld [vmem:[#allocation5 + $0x2d8] sm:$0xff]  ;;  %v10246_v33 = vpop.f32.mrf.mxu0 }
 0x232   :  { %4060 = vmatpush1.bf16.msra.mxu0 %v7862_v31  ;;  %v10244_v31 = vpop.f32.mrf.mxu1  ;;  %v664_v60 = vld [vmem:[#allocation5 + $0xdf8] sm:$0xff] }
 0x233   :  { %4061 = vmatprep.subr.bf16.mxu0 %v7855_v34  ;;  %v8078_v34 = vcombine.low %v444_v44, %v448_v45  ;;  %v412_v44 = vld [vmem:[#allocation5 + $0x618] sm:$0xff] }
 0x234   :  { %4113 = vmatpush1.bf16.msra.mxu1 %v7990_v52  ;;  %v7950_v52 = vcombine.low %v316_v54, %v320_v46  ;;  %v284_v54 = vld [vmem:[#allocation5 + $0x218] sm:$0xff] }
 0x235   :  { %4114 = vmatprep.subr.bf16.mxu1 %v7983_v32  ;;  %v7943_v32 = vcombine.high %v308_v63, %v312_v41  ;;  %v288_v46 = vld [vmem:[#allocation5 + $0x238] sm:$0xff] }
 0x236   :  { %4062 = vmatpush1.bf16.msra.mxu0 %v7854_v37  ;;  %v428_v37 = vld [vmem:[#allocation5 + $0x698] sm:$0xff] }
 0x237   :  { %4063 = vmatprep.subr.bf16.mxu0 %v7975_v40  ;;  %v10248_v40 = vpop.f32.mrf.mxu1  ;;  %v416_v45 = vld [vmem:[#allocation5 + $0x638] sm:$0xff] }
 0x238   :  { %4115 = vmatpush1.bf16.msra.mxu1 %v7982_v38  ;;  %v432_v38 = vld [vmem:[#allocation5 + $0x6b8] sm:$0xff] }
 0x239   :  { %4116 = vmatprep.subr.bf16.mxu1 %v8103_v50  ;;  %v7942_v50 = vcombine.low %v308_v63, %v312_v41  ;;  %v8063_v10 = vcombine.high %v428_v37, %v432_v38  ;;  %v10252_v5 = vpop.f32.mrf.mxu1  ;;  %v8062_v3 = vcombine.low %v428_v37, %v432_v38  ;;  %v7919_v63 = vcombine.high %v284_v54, %v288_v46  ;;  %v10262_v41 = vld [vmem:[#allocation7] sm:$0xff] }
 0x23a   :  { %4064 = vmatpush2.bf16.msra.mxu0 %v7974_v49  ;;  %v296_v49 = vld [vmem:[#allocation5 + $0x278] sm:$0xff]  ;;  %v7918_v37 = vcombine.low %v284_v54, %v288_v46 }
 0x23b   :  { %4065 = vmatprep.subr.bf16.mxu0 %v7967_v1  ;;  %v420_v1 = vld [vmem:[#allocation5 + $0x658] sm:$0xff] }
 0x23c   :  { %4117 = vmatpush2.bf16.msra.mxu1 %v8102_v0  ;;  %v10250_v0 = vpop.f32.mrf.mxu0 }
 0x23d   :  { %4118 = vmatprep.subr.bf16.mxu1 %v8095_v4  ;;  %v424_v4 = vld [vmem:[#allocation5 + $0x678] sm:$0xff] }
 0x23e   :  { %4066 = vmatpush2.bf16.msra.mxu0 %v7966_v15  ;;  %v10254_v7 = vpop.f32.mrf.mxu0  ;;  %v7927_v15 = vcombine.high %v292_v53, %v296_v49 }
 0x23f   :  { %4067 = vmatprep.subr.bf16.mxu0 %v7959_v13  ;;  %v10257_v13 = vpop.f32.mrf.mxu1 }
 0x240   :  { %4119 = vmatpush2.bf16.msra.mxu1 %v8094_v27  ;;  %v741_v27 = vsub.s32 2, %v10105_v39 }
 0x241   :  { %4120 = vmatprep.subr.bf16.mxu1 %v8087_v11  ;;  %v8055_v11 = vcombine.high %v420_v1, %v424_v4  ;;  %v10267_v30 = vpop.f32.mrf.mxu1 }
 0x242   :  { %4068 = vmatpush2.bf16.msra.mxu0 %v7958_v19  ;;  %v745_v19 = vsub.s32 3, %v10105_v39  ;;  %v10265_v47 = vrot.slane %v10262_v41, %v741_v27 }
 0x243   :  { %4069 = vmatprep.subr.bf16.mxu0 %v7951_v58  ;;  %v10260_v58 = vpop.f32.mrf.mxu0 }
 0x244   :  { %4121 = vmatpush2.bf16.msra.mxu1 %v8086_v17  ;;  %v7926_v17 = vcombine.low %v292_v53, %v296_v49  ;;  %v10270_v36 = vrot.slane %v10262_v41, %v745_v19  ;;  %v524_v49 = vld [vmem:[#allocation5 + $0x998] sm:$0xff] }
 0x245   :  { %4122 = vmatprep.subr.bf16.mxu1 %v8079_v23  ;;  %v8054_v23 = vcombine.low %v420_v1, %v424_v4  ;;  %v10272_v38 = vpop.f32.mrf.mxu0  ;;  %v528_v1 = vld [vmem:[#allocation5 + $0x9b8] sm:$0xff] }
 0x246   :  { %4070 = vmatpush2.bf16.msra.mxu0 %v7950_v52  ;;  %v8047_v52 = vcombine.high %v412_v44, %v416_v45  ;;  %v652_v4 = vld [vmem:[#allocation5 + $0xd98] sm:$0xff]  ;;  %v8159_v54 = vcombine.high %v524_v49, %v528_v1 }
 0x247   :  { %4071 = vmatprep.subr.bf16.mxu0 %v7943_v32  ;;  %v536_v32 = vld [vmem:[#allocation5 + $0x9f8] sm:$0xff]  ;;  %v10280_v27 = vpop.f32.mrf.mxu0 }
 0x248   :  { %4123 = vmatpush2.bf16.msra.mxu1 %v8078_v34  ;;  %v532_v34 = vld [vmem:[#allocation5 + $0x9d8] sm:$0xff] }
 0x249   :  { %4124 = vmatprep.subr.bf16.mxu1 %v8071_v59  ;;  %v660_v59 = vld [vmem:[#allocation5 + $0xdd8] sm:$0xff] }
 0x24a   :  { %4072 = vmatpush2.bf16.msra.mxu0 %v7942_v50  ;;  %v8046_v50 = vcombine.low %v412_v44, %v416_v45  ;;  %v8295_v53 = vcombine.high %v660_v59, %v664_v60  ;;  %v3662_v44 = vadd.f32 %v10246_v33, %v10265_v47  ;;  %v3664_v33 = vadd.f32 %v10250_v0, %v10270_v36  ;;  %v10308_v0 = vld [vmem:[#allocation5 + $0x938] sm:$0xff] }
 0x24b   :  { %4073 = vmatprep.subr.bf16.mxu0 %v7935_v12  ;;  %v3658_v12 = vadd.f32 %v10238_v14, %v10265_v47  ;;  %v10282_v14 = vld [vmem:[#allocation5 + $0x958] sm:$0xff] }
 0x24c   :  { %4125 = vmatpush2.bf16.msra.mxu1 %v8070_v51  ;;  %v8167_v51 = vcombine.high %v532_v34, %v536_v32 }
 0x24d   :  { %4126 = vmatprep.subr.bf16.mxu1 %v8063_v10  ;;  %v10276_v10 = vpop.f32.mrf.mxu1  ;;  %v3711_v46 = vadd.f32 %v10240_v20, %v3658_v12 }
 0x24e   :  { %4074 = vmatpush2.bf16.msra.mxu0 %v7934_v57  ;;  %v656_v57 = vld [vmem:[#allocation5 + $0xdb8] sm:$0xff] }
 0x24f   :  { %4075 = vmatprep.subr.bf16.mxu0 %v7927_v15  ;;  %v8166_v15 = vcombine.low %v532_v34, %v536_v32  ;;  %v10287_v45 = vpop.f32.mrf.mxu1  ;;  %v8287_v19 = vcombine.high %v652_v4, %v656_v57  ;;  %v8286_v34 = vcombine.low %v652_v4, %v656_v57 }
 0x250   :  { %4127 = vmatpush2.bf16.msra.mxu1 %v8062_v3  ;;  %v3660_v3 = vadd.f32 %v10242_v22, %v10270_v36  ;;  %v10289_v22 = vld [vmem:[#allocation5 + $0x978] sm:$0xff] }
 0x251   :  { %4128 = vmatprep.subr.bf16.mxu1 %v8055_v11  ;;  %v8294_v11 = vcombine.low %v660_v59, %v664_v60  ;;  %v3668_v60 = vadd.f32 %v10254_v7, %v10265_v47  ;;  %v10311_v7 = vld [vmem:[#allocation5 + $0xd18] sm:$0xff]  ;;  %v8150_v57 = vcombine.low %v10282_v14, %v10289_v22 }
 0x252   :  { %4076 = vmatpush2.bf16.msra.mxu0 %v7926_v17  ;;  %v10291_v17 = vld [vmem:[#allocation5 + $0xd58] sm:$0xff]  ;;  %v3713_v20 = vadd.f32 %v10244_v31, %v3660_v3  ;;  %v3717_v3 = vadd.f32 %v10252_v5, %v3664_v33 }
 0x253   :  { %4077 = vmatprep.subr.bf16.mxu0 %v7919_v63  ;;  %v10333_v5 = vld [vmem:[#allocation5 + $0x8d8] sm:$0xff] }
 0x254   :  { %4129 = vmatpush2.bf16.msra.mxu1 %v8054_v23  ;;  %v10293_v23 = vld [vmem:[#allocation5 + $0xd78] sm:$0xff] }
 0x255   :  { %4130 = vmatprep.subr.bf16.mxu1 %v8047_v52  ;;  %v8158_v52 = vcombine.low %v524_v49, %v528_v1  ;;  %v8279_v31 = vcombine.high %v10291_v17, %v10293_v23  ;;  %v10313_v49 = vld [vmem:[#allocation5 + $0xd38] sm:$0xff]  ;;  %v3670_v1 = vadd.f32 %v10260_v58, %v10270_v36  ;;  %v3721_v58 = vadd.f32 %v10257_v13, %v3668_v60 }
 0x256   :  { %4078 = vmatpush2.bf16.msra.mxu0 %v7918_v37  ;;  %v10336_v13 = vld [vmem:[#allocation5 + $0xcd8] sm:$0xff] }
 0x257   :  { %4153 = vmatprep.subr.bf16.mxu0 %v8167_v51  ;;  %v3715_v51 = vadd.f32 %v10248_v40, %v3662_v44  ;;  %v8278_v40 = vcombine.low %v10291_v17, %v10293_v23 }
 0x258   :  { %4131 = vmatpush2.bf16.msra.mxu1 %v8046_v50  ;;  %v10306_v50 = vld [vmem:[#allocation5 + $0x918] sm:$0xff] }
 0x259   :  { %4206 = vmatprep.subr.bf16.mxu1 %v8295_v53  ;;  %v3763_v63 = vpop.f32.mrf.mxu0  ;;  %4080 = vmatmul.mubr.bf16.vlgmr.msra.gmra.mxu0 %v10015_v21  ;;  %v8151_v21 = vcombine.high %v10282_v14, %v10289_v22  ;;  %v3672_v14 = vadd.f32 %v10272_v38, %v10265_v47  ;;  %v3723_v47 = vadd.f32 %v10267_v30, %v3670_v1 }
 0x25a   :  { %v3764_v32 = vadd.f32 %v3763_v63, %v3711_v46  ;;  %4154 = vmatpush1.bf16.msra.mxu0 %v8166_v15  ;;  %4089 = vmatprep.mubr.bf16.mxu0 %v10021_v55  ;;  %v8143_v55 = vcombine.high %v10306_v50, %v10308_v0  ;;  %v504_v63 = vld [vmem:[#allocation5 + $0x8f8] sm:$0xff]  ;;  %v3674_v38 = vadd.f32 %v10280_v27, %v10270_v36 }
 0x25b   :  { %v3816_v59 = vpop.f32.mrf.mxu1  ;;  %4133 = vmatmul.mubr.bf16.vlgmr.msra.gmra.mxu1 %v10019_v25  ;;  %v3765_v37 = vpop.f32.mrf.mxu0  ;;  %4155 = vmatprep.subr.bf16.mxu0 %v8159_v54  ;;  %v8270_v36 = vcombine.low %v10311_v7, %v10313_v49  ;;  %v8135_v27 = vcombine.high %v10333_v5, %v504_v63 }
 0x25c   :  { %4207 = vmatpush1.bf16.msra.mxu1 %v8294_v11  ;;  %v3817_v25 = vadd.f32 %v3816_v59, %v3764_v32  ;;  %v3766_v12 = vadd.f32 %v3765_v37, %v3713_v20  ;;  %4142 = vmatprep.mubr.bf16.mxu1 %v10024_v35  ;;  %v8271_v35 = vcombine.high %v10311_v7, %v10313_v49  ;;  %v620_v7 = vld [vmem:[#allocation5 + $0xc98] sm:$0xff] }
 0x25d   :  { %v3818_v53 = vpop.f32.mrf.mxu1  ;;  %4208 = vmatprep.subr.bf16.mxu1 %v8287_v19  ;;  %v3767_v4 = vpop.f32.mrf.mxu0  ;;  %v8142_v20 = vcombine.low %v10306_v50, %v10308_v0  ;;  %v624_v49 = vld [vmem:[#allocation5 + $0xcb8] sm:$0xff] }
 0x25e   :  { %v10324_v15 = vadd.f32 %v3818_v53, %v3766_v12  ;;  %v3768_v11 = vadd.f32 %v3767_v4, %v3715_v51  ;;  %4156 = vmatpush1.bf16.msra.mxu0 %v8158_v52  ;;  %v4261_v44 = vmax.f32 %v3817_v25, 0.0  ;;  %v10338_v52 = vld [vmem:[#allocation5 + $0xcf8] sm:$0xff] }
 0x25f   :  { %v3820_v54 = vpop.f32.mrf.mxu1  ;;  %v3769_v46 = vpop.f32.mrf.mxu0  ;;  %4157 = vmatprep.subr.bf16.mxu0 %v8151_v21  ;;  %v3725_v21 = vadd.f32 %v10276_v10, %v3672_v14  ;;  %v492_v51 = vld [vmem:[#allocation5 + $0x898] sm:$0xff]  ;;  %v3727_v10 = vadd.f32 %v10287_v45, %v3674_v38 }
 0x260   :  { %4209 = vmatpush1.bf16.msra.mxu1 %v8286_v34  ;;  %v4262_v19 = vmax.f32 %v10324_v15, 0.0  ;;  %v3821_v22 = vadd.f32 %v3820_v54, %v3768_v11  ;;  %v3770_v17 = vadd.f32 %v3769_v46, %v3717_v3  ;;  %v496_v25 = vld [vmem:[#allocation5 + $0x8b8] sm:$0xff] }
 0x261   :  { %v3822_v23 = vpop.f32.mrf.mxu1  ;;  %4210 = vmatprep.subr.bf16.mxu1 %v8279_v31  ;;  %v3773_v34 = vpop.f32.mrf.mxu0  ;;  %4090 = vmatmul.mubr.bf16.gmra.mxu0 %v10030_v43  ;;  %v8263_v43 = vcombine.high %v10336_v13, %v10338_v52  ;;  %v8127_v54 = vcombine.high %v492_v51, %v496_v25  ;;  %v484_v14 = vld [vmem:[#allocation5 + $0x858] sm:$0xff] }
 0x262   :  { %v8770_v33 = vpack.c.bf16 %v4262_v19, %v4261_v44  ;;  %v4269_v32 = vmax.f32 %v3821_v22, 0.0  ;;  %v10348_v59 = vadd.f32 %v3822_v23, %v3770_v17  ;;  %v3774_v60 = vadd.f32 %v3773_v34, %v3721_v58  ;;  %4158 = vmatpush1.bf16.msra.mxu0 %v8150_v57  ;;  %4185 = vmatprep.mubr.bf16.mxu0 %v10043_v61  ;;  %v488_v46 = vld [vmem:[#allocation5 + $0x878] sm:$0xff] }
 0x263   :  { %v3826_v37 = vpop.f32.mrf.mxu1  ;;  %4143 = vmatmul.mubr.bf16.gmra.mxu1 %v10039_v48  ;;  %v3775_v30 = vpop.f32.mrf.mxu0  ;;  %4159 = vmatprep.subr.bf16.mxu0 %v8143_v55  ;;  %v8262_v61 = vcombine.low %v10336_v13, %v10338_v52  ;;  %v8255_v58 = vcombine.high %v620_v7, %v624_v49  ;;  %v612_v22 = vld [vmem:[#allocation5 + $0xc58] sm:$0xff]  ;;  %v8254_v13 = vcombine.low %v620_v7, %v624_v49 }
 0x264   :  { %4211 = vmatpush1.bf16.msra.mxu1 %v8278_v40  ;;  %6649 = vst [vmem:[#allocation23 + $0x8] sm:$0xff] %v8770_v33  ;;  %v10357_v31 = vpack.c.bf16 %v4269_v32, %v4261_v44  ;;  %v4270_v50 = vmax.f32 %v10348_v59, 0.0  ;;  %v3776_v0 = vadd.f32 %v3775_v30, %v3723_v47  ;;  %v3827_v12 = vadd.f32 %v3826_v37, %v3774_v60  ;;  %v476_v33 = vld [vmem:[#allocation5 + $0x818] sm:$0xff]  ;;  %v9015_v59 = vld [vmem:[#allocation8 + $0x24] ss:$8 sps:$4 sm:$0xff]  }
 0x265   :  { %v3828_v48 = vpop.f32.mrf.mxu1  ;;  %4212 = vmatprep.subr.bf16.mxu1 %v8271_v35  ;;  %v3777_v53 = vpop.f32.mrf.mxu0  ;;  %4238 = vmatprep.mubr.bf16.mxu1 %v10048_v62  ;;  %v8134_v40 = vcombine.low %v10333_v5, %v504_v63  ;;  %v616_v5 = vld [vmem:[#allocation5 + $0xc78] sm:$0xff]  ;;  %v8126_v63 = vcombine.low %v492_v51, %v496_v25  ;;  %v8119_v52 = vcombine.high %v484_v14, %v488_v46 }
 0x266   :  { %v8774_v1 = vpack.c.bf16 %v4270_v50, %v4269_v32  ;;  %v3778_v4 = vadd.f32 %v3777_v53, %v3725_v21  ;;  %4160 = vmatpush1.bf16.msra.mxu0 %v8142_v20  ;;  %v3829_v3 = vadd.f32 %v3828_v48, %v3776_v0  ;;  %v4277_v35 = vmax.f32 %v3827_v12, 0.0  ;;  %v480_v32 = vld [vmem:[#allocation5 + $0x838] sm:$0xff] }
 0x267   :  { %v3830_v57 = vpop.f32.mrf.mxu1  ;;  %v3779_v11 = vpop.f32.mrf.mxu0  ;;  %4161 = vmatprep.subr.bf16.mxu0 %v8135_v27  ;;  %v8247_v20 = vcombine.high %v612_v22, %v616_v5  ;;  %v604_v60 = vld [vmem:[#allocation5 + $0xc18] sm:$0xff]  ;;  %v8118_v27 = vcombine.low %v484_v14, %v488_v46  ;;  %v8111_v21 = vcombine.high %v476_v33, %v480_v32  ;;  %v8110_v53 = vcombine.low %v476_v33, %v480_v32 }
 0x268   :  { %4213 = vmatpush1.bf16.msra.mxu1 %v8270_v36  ;;  %6653 = vst [vmem:[#allocation23 + $0x38] sm:$0xff] %v8774_v1  ;;  %v3780_v62 = vadd.f32 %v3779_v11, %v3727_v10  ;;  %v3831_v55 = vadd.f32 %v3830_v57, %v3778_v4  ;;  %v4278_v44 = vmax.f32 %v3829_v3, 0.0  ;;  %v608_v37 = vld [vmem:[#allocation5 + $0xc38] sm:$0xff] }
 0x269   :  { %v3832_v45 = vpop.f32.mrf.mxu1  ;;  %4214 = vmatprep.subr.bf16.mxu1 %v8263_v43  ;;  %v8246_v43 = vcombine.low %v612_v22, %v616_v5  ;;  %v8239_v0 = vcombine.high %v604_v60, %v608_v37  ;;  %v596_v48 = vld [vmem:[#allocation5 + $0xbd8] sm:$0xff]  ;;  %v8238_v7 = vcombine.low %v604_v60, %v608_v37 }
 0x26a   :  { %v4285_v17 = vmax.f32 %v3831_v55, 0.0  ;;  %v3833_v23 = vadd.f32 %v3832_v45, %v3780_v62  ;;  %4162 = vmatpush1.bf16.msra.mxu0 %v8134_v40  ;;  %v8778_v47 = vpack.c.bf16 %v4278_v44, %v4277_v35  ;;  %v600_v51 = vld [vmem:[#allocation5 + $0xbf8] sm:$0xff] }
 0x26b   :  { %4163 = vmatprep.subr.bf16.mxu0 %v8127_v54  ;;  %v724_v25 = vld [vmem:[#allocation5 + $0xfd8] sm:$0xff]  ;;  %v8231_v49 = vcombine.high %v596_v48, %v600_v51  ;;  %v8230_v3 = vcombine.low %v596_v48, %v600_v51 }
 0x26c   :  { %4215 = vmatpush1.bf16.msra.mxu1 %v8262_v61  ;;  %v10368_v38 = vpack.c.bf16 %v4285_v17, %v4277_v35  ;;  %v4286_v34 = vmax.f32 %v3833_v23, 0.0  ;;  %6657 = vst [vmem:[#allocation23 + $0x68] sm:$0xff] %v8778_v47  ;;  %v728_v12 = vld [vmem:[#allocation5 + $0xff8] sm:$0xff] }
 0x26d   :  { %4216 = vmatprep.subr.bf16.mxu1 %v8255_v58  ;;  %v8359_v10 = vcombine.high %v724_v25, %v728_v12  ;;  %v588_v1 = vld [vmem:[#allocation5 + $0xb98] sm:$0xff]  ;;  %v8358_v11 = vcombine.low %v724_v25, %v728_v12 }
 0x26e   :  { %v10370_v30 = vpack.c.bf16 %v4286_v34, %v4278_v44  ;;  %v8782_v36 = vpack.c.bf16 %v4286_v34, %v4285_v17  ;;  %4164 = vmatpush1.bf16.msra.mxu0 %v8126_v63  ;;  %v592_v4 = vld [vmem:[#allocation5 + $0xbb8] sm:$0xff] }
 0x26f   :  { %4165 = vmatprep.subr.bf16.mxu0 %v8119_v52  ;;  %v716_v57 = vld [vmem:[#allocation5 + $0xf98] sm:$0xff]  ;;  %v8223_v61 = vcombine.high %v588_v1, %v592_v4  ;;  %v8222_v14 = vcombine.low %v588_v1, %v592_v4 }
 0x270   :  { %4217 = vmatpush1.bf16.msra.mxu1 %v8254_v13  ;;  %6661 = vst [vmem:[#allocation23 + $0x98] sm:$0xff] %v8782_v36  ;;  %v720_v40 = vld [vmem:[#allocation5 + $0xfb8] sm:$0xff] }
 0x271   :  { %4218 = vmatprep.subr.bf16.mxu1 %v8247_v20  ;;  %v8351_v54 = vcombine.high %v716_v57, %v720_v40  ;;  %v580_v62 = vld [vmem:[#allocation5 + $0xb58] sm:$0xff]  ;;  %v8350_v46 = vcombine.low %v716_v57, %v720_v40 }
 0x272   :  { %4166 = vmatpush1.bf16.msra.mxu0 %v8118_v27  ;;  %v584_v55 = vld [vmem:[#allocation5 + $0xb78] sm:$0xff] }
 0x273   :  { %4167 = vmatprep.subr.bf16.mxu0 %v8111_v21  ;;  %v708_v45 = vld [vmem:[#allocation5 + $0xf58] sm:$0xff]  ;;  %v8215_v35 = vcombine.high %v580_v62, %v584_v55  ;;  %v8214_v63 = vcombine.low %v580_v62, %v584_v55 }
 0x274   :  { %4219 = vmatpush1.bf16.msra.mxu1 %v8246_v43  ;;  %v712_v58 = vld [vmem:[#allocation5 + $0xf78] sm:$0xff] }
 0x275   :  { %4220 = vmatprep.subr.bf16.mxu1 %v8239_v0  ;;  %v8343_v44 = vcombine.high %v708_v45, %v712_v58  ;;  %v572_v22 = vld [vmem:[#allocation5 + $0xb18] sm:$0xff]  ;;  %v8342_v47 = vcombine.low %v708_v45, %v712_v58 }
 0x276   :  { %4168 = vmatpush1.bf16.msra.mxu0 %v8110_v53  ;;  %v576_v5 = vld [vmem:[#allocation5 + $0xb38] sm:$0xff] }
 0x277   :  { %4169 = vmatprep.subr.bf16.mxu0 %v8231_v49  ;;  %v700_v17 = vld [vmem:[#allocation5 + $0xf18] sm:$0xff]  ;;  %v8207_v13 = vcombine.high %v572_v22, %v576_v5  ;;  %v8206_v60 = vcombine.low %v572_v22, %v576_v5 }
 0x278   :  { %4221 = vmatpush1.bf16.msra.mxu1 %v8238_v7  ;;  %v704_v23 = vld [vmem:[#allocation5 + $0xf38] sm:$0xff] }
 0x279   :  { %4222 = vmatprep.subr.bf16.mxu1 %v8359_v10  ;;  %v8335_v52 = vcombine.high %v700_v17, %v704_v23  ;;  %v564_v34 = vld [vmem:[#allocation5 + $0xad8] sm:$0xff]  ;;  %v8334_v37 = vcombine.low %v700_v17, %v704_v23  ;;  %v8991_v23 = vld [vmem:[#allocation8 + $0x64] ss:$8 sps:$4 sm:$0xff]  }
 0x27a   :  { %4170 = vmatpush2.bf16.msra.mxu0 %v8230_v3  ;;  %v568_v20 = vld [vmem:[#allocation5 + $0xaf8] sm:$0xff] }
 0x27b   :  { %4171 = vmatprep.subr.bf16.mxu0 %v8223_v61  ;;  %v692_v33 = vld [vmem:[#allocation5 + $0xed8] sm:$0xff]  ;;  %v8199_v36 = vcombine.high %v564_v34, %v568_v20  ;;  %v8198_v51 = vcombine.low %v564_v34, %v568_v20 }
 0x27c   :  { %4223 = vmatpush2.bf16.msra.mxu1 %v8358_v11  ;;  %v696_v32 = vld [vmem:[#allocation5 + $0xef8] sm:$0xff] }
 0x27d   :  { %4224 = vmatprep.subr.bf16.mxu1 %v8351_v54  ;;  %v8327_v27 = vcombine.high %v692_v33, %v696_v32  ;;  %v556_v43 = vld [vmem:[#allocation5 + $0xa98] sm:$0xff]  ;;  %v8326_v25 = vcombine.low %v692_v33, %v696_v32  ;;  %v10381_v32 = vpack.c.bf16 %v4270_v50, %v4262_v19  ;;  %v9013_v50 = vld [vmem:[#allocation8 + $0x20] ss:$8 sps:$4 sm:$0xff]  }
 0x27e   :  { %4172 = vmatpush2.bf16.msra.mxu0 %v8222_v14  ;;  %v560_v21 = vld [vmem:[#allocation5 + $0xab8] sm:$0xff] }
 0x27f   :  { %4173 = vmatprep.subr.bf16.mxu0 %v8215_v35  ;;  %v684_v0 = vld [vmem:[#allocation5 + $0xe98] sm:$0xff]  ;;  %v8191_v12 = vcombine.high %v556_v43, %v560_v21  ;;  %v8190_v4 = vcombine.low %v556_v43, %v560_v21 }
 0x280   :  { %4225 = vmatpush2.bf16.msra.mxu1 %v8350_v46  ;;  %v688_v48 = vld [vmem:[#allocation5 + $0xeb8] sm:$0xff] }
 0x281   :  { %4226 = vmatprep.subr.bf16.mxu1 %v8343_v44  ;;  %v8319_v53 = vcombine.high %v684_v0, %v688_v48  ;;  %v548_v7 = vld [vmem:[#allocation5 + $0xa58] sm:$0xff]  ;;  %v8318_v57 = vcombine.low %v684_v0, %v688_v48  ;;  %v9027_v0 = vld [vmem:[#allocation8 + $0x4] ss:$8 sps:$4 sm:$0xff]  }
 0x282   :  { %4174 = vmatpush2.bf16.msra.mxu0 %v8214_v63  ;;  %v552_v49 = vld [vmem:[#allocation5 + $0xa78] sm:$0xff]  ;;  %v8994_v63 = vld [vmem:[#allocation8 + $0x164] ss:$8 sps:$4 sm:$0xff]  }
 0x283   :  { %4175 = vmatprep.subr.bf16.mxu0 %v8207_v13  ;;  %v676_v10 = vld [vmem:[#allocation5 + $0xe58] sm:$0xff]  ;;  %v8183_v40 = vcombine.high %v548_v7, %v552_v49  ;;  %v8182_v55 = vcombine.low %v548_v7, %v552_v49  ;;  %v8992_v13 = vld [vmem:[#allocation8 + $0x160] ss:$8 sps:$4 sm:$0xff]   ;;  %v9030_v48 = vld [vmem:[#allocation8 + $0x104] ss:$8 sps:$4 sm:$0xff]  }
 0x284   :  { %4227 = vmatpush2.bf16.msra.mxu1 %v8342_v47  ;;  %v680_v1 = vld [vmem:[#allocation5 + $0xe78] sm:$0xff]  ;;  %v8989_v47 = vld [vmem:[#allocation8 + $0x60] ss:$8 sps:$4 sm:$0xff]  }
 0x285   :  { %4228 = vmatprep.subr.bf16.mxu1 %v8335_v52  ;;  %v8311_v3 = vcombine.high %v676_v10, %v680_v1  ;;  %v540_v11 = vld [vmem:[#allocation5 + $0xa18] sm:$0xff]  ;;  %v8310_v45 = vcombine.low %v676_v10, %v680_v1  ;;  %v9039_v10 = vld [vmem:[#allocation8 + $0xe4] ss:$8 sps:$4 sm:$0xff]  }
 0x286   :  { %4176 = vmatpush2.bf16.msra.mxu0 %v8206_v60  ;;  %v544_v61 = vld [vmem:[#allocation5 + $0xa38] sm:$0xff]  ;;  %v9042_v1 = vld [vmem:[#allocation8 + $0x1e4] ss:$8 sps:$4 sm:$0xff]  }
 0x287   :  { %4177 = vmatprep.subr.bf16.mxu0 %v8199_v36  ;;  %v668_v54 = vld [vmem:[#allocation5 + $0xe18] sm:$0xff]  ;;  %v8175_v58 = vcombine.high %v540_v11, %v544_v61  ;;  %v8174_v46 = vcombine.low %v540_v11, %v544_v61 }
 0x288   :  { %4229 = vmatpush2.bf16.msra.mxu1 %v8334_v37  ;;  %v672_v62 = vld [vmem:[#allocation5 + $0xe38] sm:$0xff]  ;;  %v9016_v37 = vld [vmem:[#allocation8 + $0x120] ss:$8 sps:$4 sm:$0xff]  }
 0x289   :  { %4230 = vmatprep.subr.bf16.mxu1 %v8327_v27  ;;  %v8303_v14 = vcombine.high %v668_v54, %v672_v62  ;;  %v8302_v35 = vcombine.low %v668_v54, %v672_v62  ;;  %v8985_v44 = vld [vmem:[#allocation8 + $0x74] ss:$8 sps:$4 sm:$0xff]   ;;  %v8983_v5 = vld [vmem:[#allocation8 + $0x70] ss:$8 sps:$4 sm:$0xff]  }
 0x28a   :  { %4178 = vmatpush2.bf16.msra.mxu0 %v8198_v51  ;;  %v8988_v22 = vld [vmem:[#allocation8 + $0x174] ss:$8 sps:$4 sm:$0xff]   ;;  %v8986_v17 = vld [vmem:[#allocation8 + $0x170] ss:$8 sps:$4 sm:$0xff]   ;;  %v9025_v51 = vld [vmem:[#allocation8] ss:$8 sps:$4 sm:$0xff]  }
 0x28b   :  { %4179 = vmatprep.subr.bf16.mxu0 %v8191_v12  ;;  %v8997_v52 = vld [vmem:[#allocation8 + $0x54] ss:$8 sps:$4 sm:$0xff]   ;;  %v8995_v20 = vld [vmem:[#allocation8 + $0x50] ss:$8 sps:$4 sm:$0xff]  }
 0x28c   :  { %4231 = vmatpush2.bf16.msra.mxu1 %v8326_v25  ;;  %v9000_v34 = vld [vmem:[#allocation8 + $0x154] ss:$8 sps:$4 sm:$0xff]   ;;  %v8998_v33 = vld [vmem:[#allocation8 + $0x150] ss:$8 sps:$4 sm:$0xff]   ;;  %v9028_v25 = vld [vmem:[#allocation8 + $0x100] ss:$8 sps:$4 sm:$0xff]  }
 0x28d   :  { %4232 = vmatprep.subr.bf16.mxu1 %v8319_v53  ;;  %v9009_v60 = vld [vmem:[#allocation8 + $0x34] ss:$8 sps:$4 sm:$0xff]   ;;  %v9007_v15 = vld [vmem:[#allocation8 + $0x30] ss:$8 sps:$4 sm:$0xff]  }
 0x28e   :  { %4180 = vmatpush2.bf16.msra.mxu0 %v8190_v4  ;;  %v9010_v19 = vld [vmem:[#allocation8 + $0x130] ss:$8 sps:$4 sm:$0xff]   ;;  %v9021_v36 = vld [vmem:[#allocation8 + $0x14] ss:$8 sps:$4 sm:$0xff]   ;;  %v9037_v4 = vld [vmem:[#allocation8 + $0xe0] ss:$8 sps:$4 sm:$0xff]  }
 0x28f   :  { %4181 = vmatprep.subr.bf16.mxu0 %v8183_v40  ;;  %v9024_v27 = vld [vmem:[#allocation8 + $0x114] ss:$8 sps:$4 sm:$0xff]   ;;  %v9019_v43 = vld [vmem:[#allocation8 + $0x10] ss:$8 sps:$4 sm:$0xff]  }
 0x290   :  { %4233 = vmatpush2.bf16.msra.mxu1 %v8318_v57  ;;  %v9022_v21 = vld [vmem:[#allocation8 + $0x110] ss:$8 sps:$4 sm:$0xff]   ;;  %v9033_v12 = vld [vmem:[#allocation8 + $0xf4] ss:$8 sps:$4 sm:$0xff]   ;;  %v9040_v57 = vld [vmem:[#allocation8 + $0x1e0] ss:$8 sps:$4 sm:$0xff]  }
 0x291   :  { %4234 = vmatprep.subr.bf16.mxu1 %v8311_v3  ;;  %v9036_v53 = vld [vmem:[#allocation8 + $0x1f4] ss:$8 sps:$4 sm:$0xff]   ;;  %v9031_v7 = vld [vmem:[#allocation8 + $0xf0] ss:$8 sps:$4 sm:$0xff]  }
 0x292   :  { %4182 = vmatpush2.bf16.msra.mxu0 %v8182_v55  ;;  %v9034_v49 = vld [vmem:[#allocation8 + $0x1f0] ss:$8 sps:$4 sm:$0xff]   ;;  %v9045_v40 = vld [vmem:[#allocation8 + $0xd4] ss:$8 sps:$4 sm:$0xff]   ;;  %v9051_v55 = vld [vmem:[#allocation8 + $0xc4] ss:$8 sps:$4 sm:$0xff]  }
 0x293   :  { %4183 = vmatprep.subr.bf16.mxu0 %v8175_v58  ;;  %v9048_v3 = vld [vmem:[#allocation8 + $0x1d4] ss:$8 sps:$4 sm:$0xff]   ;;  %v9043_v54 = vld [vmem:[#allocation8 + $0xd0] ss:$8 sps:$4 sm:$0xff]  }
 0x294   :  { %4235 = vmatpush2.bf16.msra.mxu1 %v8310_v45  ;;  %v9046_v62 = vld [vmem:[#allocation8 + $0x1d0] ss:$8 sps:$4 sm:$0xff]   ;;  %v9054_v45 = vld [vmem:[#allocation8 + $0x1c4] ss:$8 sps:$4 sm:$0xff]  }
 0x295   :  { %4236 = vmatprep.subr.bf16.mxu1 %v8303_v14 }
 0x296   :  { %4184 = vmatpush2.bf16.msra.mxu0 %v8174_v46  ;;  %v9049_v46 = vld [vmem:[#allocation8 + $0xc0] ss:$8 sps:$4 sm:$0xff]  }
 0x297   :  { %5087 = vmatprep.subr.bf16.mxu0 %v8985_v44  ;;  %v9057_v44 = vld [vmem:[#allocation8 + $0xb4] ss:$8 sps:$4 sm:$0xff]  }
 0x298   :  { %4237 = vmatpush2.bf16.msra.mxu1 %v8302_v35  ;;  %v9052_v35 = vld [vmem:[#allocation8 + $0x1c0] ss:$8 sps:$4 sm:$0xff]  }
 0x299   :  { %5140 = vmatprep.subr.bf16.mxu1 %v8988_v22  ;;  %4186 = vmatmul.mubr.bf16.vlgmr.msra.gmra.mxu0 %v10055_v8  ;;  %v9003_v8 = vld [vmem:[#allocation8 + $0x44] ss:$8 sps:$4 sm:$0xff]   ;;  %v10386_v11 = vpop.f32.mrf.mxu0  ;;  %v9060_v22 = vld [vmem:[#allocation8 + $0x1b4] ss:$8 sps:$4 sm:$0xff]  }
 0x29a   :  { %5088 = vmatpush1.bf16.msra.mxu0 %v8983_v5  ;;  %4195 = vmatprep.mubr.bf16.mxu0 %v10061_v16  ;;  %v9001_v16 = vld [vmem:[#allocation8 + $0x40] ss:$8 sps:$4 sm:$0xff]  }
 0x29b   :  { %4239 = vmatmul.mubr.bf16.vlgmr.msra.gmra.mxu1 %v10059_v9  ;;  %5089 = vmatprep.subr.bf16.mxu0 %v8991_v23  ;;  %v9006_v9 = vld [vmem:[#allocation8 + $0x144] ss:$8 sps:$4 sm:$0xff]   ;;  %v10388_v61 = vpop.f32.mrf.mxu1  ;;  %v3871_v58 = vpop.f32.mrf.mxu0  ;;  %v9055_v23 = vld [vmem:[#allocation8 + $0xb0] ss:$8 sps:$4 sm:$0xff]  }
 0x29c   :  { %5141 = vmatpush1.bf16.msra.mxu1 %v8986_v17  ;;  %4248 = vmatprep.mubr.bf16.mxu1 %v10064_v42  ;;  %v9004_v42 = vld [vmem:[#allocation8 + $0x140] ss:$8 sps:$4 sm:$0xff]  }
 0x29d   :  { %5142 = vmatprep.subr.bf16.mxu1 %v8994_v63  ;;  %v10390_v14 = vpop.f32.mrf.mxu1  ;;  %v3873_v5 = vpop.f32.mrf.mxu0  ;;  %v9058_v63 = vld [vmem:[#allocation8 + $0x1b0] ss:$8 sps:$4 sm:$0xff]  }
 0x29e   :  { %5090 = vmatpush1.bf16.msra.mxu0 %v8989_v47  ;;  %v9063_v47 = vld [vmem:[#allocation8 + $0xa4] ss:$8 sps:$4 sm:$0xff]  }
 0x29f   :  { %5091 = vmatprep.subr.bf16.mxu0 %v8997_v52  ;;  %v10392_v17 = vpop.f32.mrf.mxu1  ;;  %v3875_v52 = vpop.f32.mrf.mxu0 }
 0x2a0   :  { %5143 = vmatpush1.bf16.msra.mxu1 %v8992_v13  ;;  %v9066_v13 = vld [vmem:[#allocation8 + $0x1a4] ss:$8 sps:$4 sm:$0xff]  }
 0x2a1   :  { %5144 = vmatprep.subr.bf16.mxu1 %v9000_v34  ;;  %4196 = vmatmul.mubr.bf16.gmra.mxu0 %v10068_v26  ;;  %v9012_v26 = vld [vmem:[#allocation8 + $0x134] ss:$8 sps:$4 sm:$0xff]   ;;  %v10394_v34 = vpop.f32.mrf.mxu1 }
 0x2a2   :  { %5092 = vmatpush1.bf16.msra.mxu0 %v8995_v20  ;;  %5119 = vmatprep.mubr.bf16.mxu0 %v10224_v56  ;;  %v9061_v20 = vld [vmem:[#allocation8 + $0xa0] ss:$8 sps:$4 sm:$0xff]  }
 0x2a3   :  { %4249 = vmatmul.mubr.bf16.gmra.mxu1 %v10071_v28  ;;  %5093 = vmatprep.subr.bf16.mxu0 %v9003_v8  ;;  %v9018_v28 = vld [vmem:[#allocation8 + $0x124] ss:$8 sps:$4 sm:$0xff]   ;;  %v9064_v8 = vld [vmem:[#allocation8 + $0x1a0] ss:$8 sps:$4 sm:$0xff]  }
 0x2a4   :  { %5145 = vmatpush1.bf16.msra.mxu1 %v8998_v33  ;;  %5172 = vmatprep.mubr.bf16.mxu1 %v10381_v32  ;;  %v3879_v33 = vpop.f32.mrf.mxu0 }
 0x2a5   :  { %5146 = vmatprep.subr.bf16.mxu1 %v9006_v9  ;;  %v9069_v9 = vld [vmem:[#allocation8 + $0x94] ss:$8 sps:$4 sm:$0xff]  }
 0x2a6   :  { %5094 = vmatpush1.bf16.msra.mxu0 %v9001_v16  ;;  %v749_v16 = vsub.s32 4, %v10105_v39 }
 0x2a7   :  { %5095 = vmatprep.subr.bf16.mxu0 %v9009_v60  ;;  %v9072_v60 = vld [vmem:[#allocation8 + $0x194] ss:$8 sps:$4 sm:$0xff]  }
 0x2a8   :  { %5147 = vmatpush1.bf16.msra.mxu1 %v9004_v42  ;;  %v10397_v42 = vpop.f32.mrf.mxu1 }
 0x2a9   :  { %5148 = vmatprep.subr.bf16.mxu1 %v9012_v26  ;;  %v753_v26 = vsub.s32 5, %v10105_v39 }
 0x2aa   :  { %5096 = vmatpush1.bf16.msra.mxu0 %v9007_v15  ;;  %v9067_v15 = vld [vmem:[#allocation8 + $0x90] ss:$8 sps:$4 sm:$0xff]  }
 0x2ab   :  { %5097 = vmatprep.subr.bf16.mxu0 %v9015_v59  ;;  %v9070_v59 = vld [vmem:[#allocation8 + $0x190] ss:$8 sps:$4 sm:$0xff]  }
 0x2ac   :  { %5149 = vmatpush1.bf16.msra.mxu1 %v9010_v19  ;;  %v3881_v19 = vpop.f32.mrf.mxu0 }
 0x2ad   :  { %5150 = vmatprep.subr.bf16.mxu1 %v9018_v28  ;;  %v9075_v28 = vld [vmem:[#allocation8 + $0x84] ss:$8 sps:$4 sm:$0xff]  }
 0x2ae   :  { %5098 = vmatpush1.bf16.msra.mxu0 %v9013_v50  ;;  %v750_v50 = vrot.slane %v10262_v41, %v749_v16  ;;  %v9085_v16 = vld [vmem:[#allocation8 + $0x250] ss:$8 sps:$4 sm:$0xff]  }
 0x2af   :  { %5099 = vmatprep.subr.bf16.mxu0 %v9021_v36  ;;  %v9078_v36 = vld [vmem:[#allocation8 + $0x184] ss:$8 sps:$4 sm:$0xff]  }
 0x2b0   :  { %5151 = vmatpush1.bf16.msra.mxu1 %v9016_v37  ;;  %v10401_v37 = vpop.f32.mrf.mxu1 }
 0x2b1   :  { %5152 = vmatprep.subr.bf16.mxu1 %v9024_v27  ;;  %v10404_v27 = vrot.slane %v10262_v41, %v753_v26  ;;  %v9079_v41 = vld [vmem:[#allocation8 + $0x270] ss:$8 sps:$4 sm:$0xff]  }
 0x2b2   :  { %5100 = vmatpush1.bf16.msra.mxu0 %v9019_v43  ;;  %v9073_v43 = vld [vmem:[#allocation8 + $0x80] ss:$8 sps:$4 sm:$0xff]  }
 0x2b3   :  { %5101 = vmatprep.subr.bf16.mxu0 %v9027_v0  ;;  %v9076_v0 = vld [vmem:[#allocation8 + $0x180] ss:$8 sps:$4 sm:$0xff]  }
 0x2b4   :  { %5153 = vmatpush1.bf16.msra.mxu1 %v9022_v21  ;;  %v3883_v21 = vpop.f32.mrf.mxu0 }
 0x2b5   :  { %5154 = vmatprep.subr.bf16.mxu1 %v9030_v48  ;;  %v9081_v48 = vld [vmem:[#allocation8 + $0x274] ss:$8 sps:$4 sm:$0xff]  }
 0x2b6   :  { %5102 = vmatpush1.bf16.msra.mxu0 %v9025_v51  ;;  %v3870_v51 = vadd.f32 %v10386_v11, %v750_v50 }
 0x2b7   :  { %5103 = vmatprep.subr.bf16.mxu0 %v9033_v12  ;;  %v9129_v12 = vld [vmem:[#allocation8 + $0x374] ss:$8 sps:$4 sm:$0xff]  }
 0x2b8   :  { %5155 = vmatpush1.bf16.msra.mxu1 %v9028_v25  ;;  %v10407_v25 = vpop.f32.mrf.mxu1 }
 0x2b9   :  { %5156 = vmatprep.subr.bf16.mxu1 %v9036_v53  ;;  %v3872_v53 = vadd.f32 %v3871_v58, %v10404_v27  ;;  %v9082_v58 = vld [vmem:[#allocation8 + $0x260] ss:$8 sps:$4 sm:$0xff]  }
 0x2ba   :  { %5104 = vmatpush2.bf16.msra.mxu0 %v9031_v7  ;;  %v3885_v7 = vpop.f32.mrf.mxu0 }
 0x2bb   :  { %5105 = vmatprep.subr.bf16.mxu0 %v9039_v10  ;;  %v3874_v10 = vadd.f32 %v3873_v5, %v750_v50  ;;  %v3925_v11 = vadd.f32 %v10390_v14, %v3872_v53  ;;  %v9130_v5 = vld [vmem:[#allocation8 + $0x360] ss:$8 sps:$4 sm:$0xff]  }
 0x2bc   :  { %5157 = vmatpush2.bf16.msra.mxu1 %v9034_v49  ;;  %v3923_v49 = vadd.f32 %v10388_v61, %v3870_v51  ;;  %v3880_v61 = vadd.f32 %v3879_v33, %v750_v50  ;;  %v9088_v53 = vld [vmem:[#allocation8 + $0x240] ss:$8 sps:$4 sm:$0xff]  }
 0x2bd   :  { %5158 = vmatprep.subr.bf16.mxu1 %v9042_v1  ;;  %v10411_v1 = vpop.f32.mrf.mxu1 }
 0x2be   :  { %5106 = vmatpush2.bf16.msra.mxu0 %v9037_v4  ;;  %v9084_v4 = vld [vmem:[#allocation8 + $0x264] ss:$8 sps:$4 sm:$0xff]  }
 0x2bf   :  { %5107 = vmatprep.subr.bf16.mxu0 %v9045_v40 }
 0x2c0   :  { %5159 = vmatpush2.bf16.msra.mxu1 %v9040_v57  ;;  %v9127_v57 = vld [vmem:[#allocation8 + $0x370] ss:$8 sps:$4 sm:$0xff]  }
 0x2c1   :  { %5160 = vmatprep.subr.bf16.mxu1 %v9048_v3  ;;  %v9132_v3 = vld [vmem:[#allocation8 + $0x364] ss:$8 sps:$4 sm:$0xff]  }
 0x2c2   :  { %5108 = vmatpush2.bf16.msra.mxu0 %v9043_v54  ;;  %v3876_v54 = vadd.f32 %v3875_v52, %v10404_v27 }
 0x2c3   :  { %5109 = vmatprep.subr.bf16.mxu0 %v9051_v55 }
 0x2c4   :  { %5161 = vmatpush2.bf16.msra.mxu1 %v9046_v62 }
 0x2c5   :  { %5162 = vmatprep.subr.bf16.mxu1 %v9054_v45 }
 0x2c6   :  { %5110 = vmatpush2.bf16.msra.mxu0 %v9049_v46  ;;  %v3927_v46 = vadd.f32 %v10392_v17, %v3874_v10  ;;  %v3933_v17 = vadd.f32 %v10397_v42, %v3880_v61  ;;  %v9138_v42 = vld [vmem:[#allocation8 + $0x344] ss:$8 sps:$4 sm:$0xff]  }
 0x2c7   :  { %5111 = vmatprep.subr.bf16.mxu0 %v9057_v44 }
 0x2c8   :  { %5163 = vmatpush2.bf16.msra.mxu1 %v9052_v35 }
 0x2c9   :  { %5164 = vmatprep.subr.bf16.mxu1 %v9060_v22  ;;  %v9087_v22 = vld [vmem:[#allocation8 + $0x254] ss:$8 sps:$4 sm:$0xff]  }
 0x2ca   :  { %5112 = vmatpush2.bf16.msra.mxu0 %v9055_v23  ;;  %v3882_v23 = vadd.f32 %v3881_v19, %v10404_v27 }
 0x2cb   :  { %5113 = vmatprep.subr.bf16.mxu0 %v9063_v47  ;;  %v9135_v47 = vld [vmem:[#allocation8 + $0x354] ss:$8 sps:$4 sm:$0xff]  }
 0x2cc   :  { %5165 = vmatpush2.bf16.msra.mxu1 %v9058_v63 }
 0x2cd   :  { %5166 = vmatprep.subr.bf16.mxu1 %v9066_v13  ;;  %v3929_v13 = vadd.f32 %v10394_v34, %v3876_v54  ;;  %v9133_v34 = vld [vmem:[#allocation8 + $0x350] ss:$8 sps:$4 sm:$0xff]  }
 0x2ce   :  { %5114 = vmatpush2.bf16.msra.mxu0 %v9061_v20 }
 0x2cf   :  { %5115 = vmatprep.subr.bf16.mxu0 %v9069_v9 }
 0x2d0   :  { %5167 = vmatpush2.bf16.msra.mxu1 %v9064_v8  ;;  %v3884_v8 = vadd.f32 %v3883_v21, %v750_v50  ;;  %v3886_v50 = vadd.f32 %v3885_v7, %v10404_v27  ;;  %v9093_v27 = vld [vmem:[#allocation8 + $0x234] ss:$8 sps:$4 sm:$0xff]  }
 0x2d1   :  { %5168 = vmatprep.subr.bf16.mxu1 %v9072_v60 }
 0x2d2   :  { %5116 = vmatpush2.bf16.msra.mxu0 %v9067_v15 }
 0x2d3   :  { %5117 = vmatprep.subr.bf16.mxu0 %v9075_v28  ;;  %v9090_v28 = vld [vmem:[#allocation8 + $0x244] ss:$8 sps:$4 sm:$0xff]  }
 0x2d4   :  { %5169 = vmatpush2.bf16.msra.mxu1 %v9070_v59 }
 0x2d5   :  { %5170 = vmatprep.subr.bf16.mxu1 %v9078_v36  ;;  %v3935_v36 = vadd.f32 %v10401_v37, %v3882_v23  ;;  %v3937_v37 = vadd.f32 %v10407_v25, %v3884_v8  ;;  %v9139_v23 = vld [vmem:[#allocation8 + $0x330] ss:$8 sps:$4 sm:$0xff]   ;;  %v9142_v8 = vld [vmem:[#allocation8 + $0x320] ss:$8 sps:$4 sm:$0xff]  }
 0x2d6   :  { %5118 = vmatpush2.bf16.msra.mxu0 %v9073_v43 }
 0x2d7   :  { %5193 = vmatprep.subr.bf16.mxu0 %v9081_v48 }
 0x2d8   :  { %5171 = vmatpush2.bf16.msra.mxu1 %v9076_v0 }
 0x2d9   :  { %5246 = vmatprep.subr.bf16.mxu1 %v9129_v12  ;;  %v3975_v40 = vpop.f32.mrf.mxu0  ;;  %5120 = vmatmul.mubr.bf16.vlgmr.msra.gmra.mxu0 %v10215_v24 }
 0x2da   :  { %v3976_v62 = vadd.f32 %v3975_v40, %v3923_v49  ;;  %5129 = vmatprep.mubr.bf16.mxu0 %v10228_v29  ;;  %5194 = vmatpush1.bf16.msra.mxu0 %v9079_v41  ;;  %v9136_v40 = vld [vmem:[#allocation8 + $0x340] ss:$8 sps:$4 sm:$0xff]  }
 0x2db   :  { %v4028_v55 = vpop.f32.mrf.mxu1  ;;  %5173 = vmatmul.mubr.bf16.vlgmr.msra.gmra.mxu1 %v10357_v31  ;;  %v3977_v45 = vpop.f32.mrf.mxu0  ;;  %5195 = vmatprep.subr.bf16.mxu0 %v9084_v4 }
 0x2dc   :  { %5182 = vmatprep.mubr.bf16.mxu1 %v10370_v30  ;;  %v10420_v35 = vadd.f32 %v4028_v55, %v3976_v62  ;;  %v3978_v44 = vadd.f32 %v3977_v45, %v3925_v11  ;;  %5247 = vmatpush1.bf16.msra.mxu1 %v9127_v57  ;;  %v9141_v55 = vld [vmem:[#allocation8 + $0x334] ss:$8 sps:$4 sm:$0xff]  }
 0x2dd   :  { %v4030_v14 = vpop.f32.mrf.mxu1  ;;  %v3979_v63 = vpop.f32.mrf.mxu0  ;;  %5248 = vmatprep.subr.bf16.mxu1 %v9132_v3  ;;  %v3939_v3 = vadd.f32 %v10411_v1, %v3886_v50  ;;  %v9103_v50 = vld [vmem:[#allocation8 + $0x2f0] ss:$8 sps:$4 sm:$0xff]  }
 0x2de   :  { %v4031_v52 = vadd.f32 %v4030_v14, %v3978_v44  ;;  %v3980_v20 = vadd.f32 %v3979_v63, %v3927_v46  ;;  %5196 = vmatpush1.bf16.msra.mxu0 %v9082_v58  ;;  %v4263_v60 = vmax.f32 %v10420_v35, 0.0  ;;  %v9091_v58 = vld [vmem:[#allocation8 + $0x230] ss:$8 sps:$4 sm:$0xff]   ;;  %v9096_v14 = vld [vmem:[#allocation8 + $0x224] ss:$8 sps:$4 sm:$0xff]  }
 0x2df   :  { %v4032_v33 = vpop.f32.mrf.mxu1  ;;  %v3981_v9 = vpop.f32.mrf.mxu0  ;;  %5197 = vmatprep.subr.bf16.mxu0 %v9087_v22 }
 0x2e0   :  { %v4264_v26 = vmax.f32 %v4031_v52, 0.0  ;;  %v10426_v15 = vadd.f32 %v4032_v33, %v3980_v20  ;;  %v3982_v19 = vadd.f32 %v3981_v9, %v3929_v13  ;;  %5249 = vmatpush1.bf16.msra.mxu1 %v9130_v5  ;;  %v9094_v52 = vld [vmem:[#allocation8 + $0x220] ss:$8 sps:$4 sm:$0xff]  }
 0x2e1   :  { %v4034_v59 = vpop.f32.mrf.mxu1  ;;  %v3985_v43 = vpop.f32.mrf.mxu0  ;;  %5130 = vmatmul.mubr.bf16.gmra.mxu0 %v10226_v18  ;;  %5250 = vmatprep.subr.bf16.mxu1 %v9135_v47  ;;  %v9144_v47 = vld [vmem:[#allocation8 + $0x324] ss:$8 sps:$4 sm:$0xff]  }
 0x2e2   :  { %v8771_v21 = vpack.c.bf16 %v4264_v26, %v4263_v60  ;;  %v4035_v0 = vadd.f32 %v4034_v59, %v3982_v19  ;;  %v3986_v48 = vadd.f32 %v3985_v43, %v3933_v17  ;;  %5198 = vmatpush1.bf16.msra.mxu0 %v9085_v16  ;;  %v4271_v41 = vmax.f32 %v10426_v15, 0.0  ;;  %v9099_v17 = vld [vmem:[#allocation8 + $0x214] ss:$8 sps:$4 sm:$0xff]   ;;  %v9102_v19 = vld [vmem:[#allocation8 + $0x204] ss:$8 sps:$4 sm:$0xff]  }
 0x2e3   :  { %5183 = vmatmul.mubr.bf16.gmra.mxu1 %v10368_v38  ;;  %v4038_v51 = vpop.f32.mrf.mxu1  ;;  %v3987_v12 = vpop.f32.mrf.mxu0  ;;  %5199 = vmatprep.subr.bf16.mxu0 %v9090_v28  ;;  %v9147_v16 = vld [vmem:[#allocation8 + $0x314] ss:$8 sps:$4 sm:$0xff]   ;;  %v9145_v59 = vld [vmem:[#allocation8 + $0x310] ss:$8 sps:$4 sm:$0xff]   ;;  %v9150_v28 = vld [vmem:[#allocation8 + $0x304] ss:$8 sps:$4 sm:$0xff]  }
 0x2e4   :  { %6650 = vst [vmem:[#allocation23 + $0x10] sm:$0xff] %v8771_v21  ;;  %v4272_v49 = vmax.f32 %v4035_v0, 0.0  ;;  %v3988_v10 = vadd.f32 %v3987_v12, %v3935_v36  ;;  %5251 = vmatpush1.bf16.msra.mxu1 %v9133_v34  ;;  %v10436_v7 = vadd.f32 %v4038_v51, %v3986_v48  ;;  %v9100_v34 = vld [vmem:[#allocation8 + $0x200] ss:$8 sps:$4 sm:$0xff]   ;;  %v9105_v36 = vld [vmem:[#allocation8 + $0x2f4] ss:$8 sps:$4 sm:$0xff]  }
 0x2e5   :  { %v4040_v4 = vpop.f32.mrf.mxu1  ;;  %v3989_v57 = vpop.f32.mrf.mxu0  ;;  %5252 = vmatprep.subr.bf16.mxu1 %v9138_v42  ;;  %v9148_v43 = vld [vmem:[#allocation8 + $0x300] ss:$8 sps:$4 sm:$0xff]   ;;  %v9153_v42 = vld [vmem:[#allocation8 + $0x3f4] ss:$8 sps:$4 sm:$0xff]   ;;  %v9108_v21 = vld [vmem:[#allocation8 + $0x2e4] ss:$8 sps:$4 sm:$0xff]  }
 0x2e6   :  { %v10439_v11 = vpack.c.bf16 %v4272_v49, %v4264_v26  ;;  %v8775_v25 = vpack.c.bf16 %v4272_v49, %v4271_v41  ;;  %v3990_v54 = vadd.f32 %v3989_v57, %v3937_v37  ;;  %v10443_v61 = vadd.f32 %v4040_v4, %v3988_v10  ;;  %5200 = vmatpush1.bf16.msra.mxu0 %v9088_v53  ;;  %v9097_v26 = vld [vmem:[#allocation8 + $0x210] ss:$8 sps:$4 sm:$0xff]   ;;  %v9156_v48 = vld [vmem:[#allocation8 + $0x3e4] ss:$8 sps:$4 sm:$0xff]   ;;  %v9106_v51 = vld [vmem:[#allocation8 + $0x2e0] ss:$8 sps:$4 sm:$0xff]  }
 0x2e7   :  { %v4042_v62 = vpop.f32.mrf.mxu1  ;;  %v3991_v45 = vpop.f32.mrf.mxu0  ;;  %5201 = vmatprep.subr.bf16.mxu0 %v9093_v27  ;;  %v4279_v22 = vmax.f32 %v10436_v7, 0.0  ;;  %v9151_v0 = vld [vmem:[#allocation8 + $0x3f0] ss:$8 sps:$4 sm:$0xff]   ;;  %v9111_v12 = vld [vmem:[#allocation8 + $0x2d4] ss:$8 sps:$4 sm:$0xff]   ;;  %v761_v7 = vsub.s32 7, %v10105_v39 }
 0x2e8   :  { %6654 = vst [vmem:[#allocation23 + $0x40] sm:$0xff] %v8775_v25  ;;  %v3992_v46 = vadd.f32 %v3991_v45, %v3939_v3  ;;  %v10445_v44 = vadd.f32 %v4042_v62, %v3990_v54  ;;  %5225 = vmatprep.mubr.bf16.mxu0 %v10439_v11  ;;  %v4280_v5 = vmax.f32 %v10443_v61, 0.0  ;;  %5253 = vmatpush1.bf16.msra.mxu1 %v9136_v40  ;;  %v9154_v53 = vld [vmem:[#allocation8 + $0x3e0] ss:$8 sps:$4 sm:$0xff]   ;;  %v9159_v37 = vld [vmem:[#allocation8 + $0x3d4] ss:$8 sps:$4 sm:$0xff]  }
 0x2e9   :  { %v4044_v1 = vpop.f32.mrf.mxu1  ;;  %5254 = vmatprep.subr.bf16.mxu1 %v9141_v55  ;;  %v9109_v49 = vld [vmem:[#allocation8 + $0x2d0] ss:$8 sps:$4 sm:$0xff]   ;;  %v9114_v10 = vld [vmem:[#allocation8 + $0x2c4] ss:$8 sps:$4 sm:$0xff]   ;;  %v9112_v57 = vld [vmem:[#allocation8 + $0x2c0] ss:$8 sps:$4 sm:$0xff]  }
 0x2ea   :  { %v10450_v63 = vadd.f32 %v4044_v1, %v3992_v46  ;;  %v8779_v13 = vpack.c.bf16 %v4280_v5, %v4279_v22  ;;  %5202 = vmatpush1.bf16.msra.mxu0 %v9091_v58  ;;  %v4287_v20 = vmax.f32 %v10445_v44, 0.0  ;;  %v9157_v4 = vld [vmem:[#allocation8 + $0x3d0] ss:$8 sps:$4 sm:$0xff]   ;;  %v9162_v27 = vld [vmem:[#allocation8 + $0x3c4] ss:$8 sps:$4 sm:$0xff]  }
 0x2eb   :  { %5203 = vmatprep.subr.bf16.mxu0 %v9096_v14  ;;  %v9117_v40 = vld [vmem:[#allocation8 + $0x2b4] ss:$8 sps:$4 sm:$0xff]   ;;  %v9160_v3 = vld [vmem:[#allocation8 + $0x3c0] ss:$8 sps:$4 sm:$0xff]   ;;  %v9115_v54 = vld [vmem:[#allocation8 + $0x2b0] ss:$8 sps:$4 sm:$0xff]  }
 0x2ec   :  { %v4288_v33 = vmax.f32 %v10450_v63, 0.0  ;;  %6658 = vst [vmem:[#allocation23 + $0x70] sm:$0xff] %v8779_v13  ;;  %5255 = vmatpush1.bf16.msra.mxu1 %v9139_v23  ;;  %v9165_v25 = vld [vmem:[#allocation8 + $0x3b4] ss:$8 sps:$4 sm:$0xff]   ;;  %v9120_v62 = vld [vmem:[#allocation8 + $0x2a4] ss:$8 sps:$4 sm:$0xff]   ;;  %v10480_v35 = vpack.c.bf16 %v4287_v20, %v4279_v22 }
 0x2ed   :  { %5256 = vmatprep.subr.bf16.mxu1 %v9144_v47  ;;  %v9163_v55 = vld [vmem:[#allocation8 + $0x3b0] ss:$8 sps:$4 sm:$0xff]   ;;  %v9168_v45 = vld [vmem:[#allocation8 + $0x3a4] ss:$8 sps:$4 sm:$0xff]   ;;  %v9118_v58 = vld [vmem:[#allocation8 + $0x2a0] ss:$8 sps:$4 sm:$0xff]  }
 0x2ee   :  { %v8783_v9 = vpack.c.bf16 %v4288_v33, %v4287_v20  ;;  %5204 = vmatpush1.bf16.msra.mxu0 %v9094_v52  ;;  %v9123_v46 = vld [vmem:[#allocation8 + $0x294] ss:$8 sps:$4 sm:$0xff]   ;;  %v9166_v1 = vld [vmem:[#allocation8 + $0x3a0] ss:$8 sps:$4 sm:$0xff]   ;;  %v9121_v23 = vld [vmem:[#allocation8 + $0x290] ss:$8 sps:$4 sm:$0xff]  }
 0x2ef   :  { %5205 = vmatprep.subr.bf16.mxu0 %v9099_v17  ;;  %v9171_v14 = vld [vmem:[#allocation8 + $0x394] ss:$8 sps:$4 sm:$0xff]   ;;  %v9126_v47 = vld [vmem:[#allocation8 + $0x284] ss:$8 sps:$4 sm:$0xff]   ;;  %v9169_v13 = vld [vmem:[#allocation8 + $0x390] ss:$8 sps:$4 sm:$0xff]  }
 0x2f0   :  { %6662 = vst [vmem:[#allocation23 + $0xa0] sm:$0xff] %v8783_v9  ;;  %5257 = vmatpush1.bf16.msra.mxu1 %v9142_v8  ;;  %v9174_v52 = vld [vmem:[#allocation8 + $0x384] ss:$8 sps:$4 sm:$0xff]   ;;  %v9124_v17 = vld [vmem:[#allocation8 + $0x280] ss:$8 sps:$4 sm:$0xff]   ;;  %v9544_v44 = vld [vmem:[#allocation7] sm:$0xff] }
 0x2f1   :  { %5258 = vmatprep.subr.bf16.mxu1 %v9147_v16  ;;  %v9172_v8 = vld [vmem:[#allocation8 + $0x380] ss:$8 sps:$4 sm:$0xff]   ;;  %v10466_v16 = vpack.c.bf16 %v4271_v41, %v4263_v60 }
 0x2f2   :  { %5206 = vmatpush1.bf16.msra.mxu0 %v9097_v26  ;;  %v9177_v9 = vld [vmem:[#allocation11 + $0x74] ss:$8 sps:$4 sm:$0xff]   ;;  %v10472_v26 = vpack.c.bf16 %v4288_v33, %v4280_v5 }
 0x2f3   :  { %5207 = vmatprep.subr.bf16.mxu0 %v9102_v19 }
 0x2f4   :  { %5259 = vmatpush1.bf16.msra.mxu1 %v9145_v59 }
 0x2f5   :  { %5260 = vmatprep.subr.bf16.mxu1 %v9150_v28  ;;  %v757_v28 = vsub.s32 6, %v10105_v39 }
 0x2f6   :  { %5208 = vmatpush1.bf16.msra.mxu0 %v9100_v34 }
 0x2f7   :  { %5209 = vmatprep.subr.bf16.mxu0 %v9105_v36  ;;  %v758_v22 = vrot.slane %v9544_v44, %v757_v28 }
 0x2f8   :  { %5261 = vmatpush1.bf16.msra.mxu1 %v9148_v43  ;;  %v762_v43 = vrot.slane %v9544_v44, %v761_v7 }
 0x2f9   :  { %5262 = vmatprep.subr.bf16.mxu1 %v9153_v42 }
 0x2fa   :  { %5210 = vmatpush2.bf16.msra.mxu0 %v9103_v50 }
 0x2fb   :  { %5211 = vmatprep.subr.bf16.mxu0 %v9108_v21 }
 0x2fc   :  { %5263 = vmatpush2.bf16.msra.mxu1 %v9151_v0 }
 0x2fd   :  { %5264 = vmatprep.subr.bf16.mxu1 %v9156_v48 }
 0x2fe   :  { %5212 = vmatpush2.bf16.msra.mxu0 %v9106_v51 }
 0x2ff   :  { %5213 = vmatprep.subr.bf16.mxu0 %v9111_v12 }
 0x300   :  { %5265 = vmatpush2.bf16.msra.mxu1 %v9154_v53 }
 0x301   :  { %5266 = vmatprep.subr.bf16.mxu1 %v9159_v37 }
 0x302   :  { %5214 = vmatpush2.bf16.msra.mxu0 %v9109_v49 }
 0x303   :  { %5215 = vmatprep.subr.bf16.mxu0 %v9114_v10 }
 0x304   :  { %5267 = vmatpush2.bf16.msra.mxu1 %v9157_v4 }
 0x305   :  { %5268 = vmatprep.subr.bf16.mxu1 %v9162_v27 }
 0x306   :  { %5216 = vmatpush2.bf16.msra.mxu0 %v9112_v57 }
 0x307   :  { %5217 = vmatprep.subr.bf16.mxu0 %v9117_v40 }
 0x308   :  { %5269 = vmatpush2.bf16.msra.mxu1 %v9160_v3 }
 0x309   :  { %5270 = vmatprep.subr.bf16.mxu1 %v9165_v25 }
 0x30a   :  { %5218 = vmatpush2.bf16.msra.mxu0 %v9115_v54 }
 0x30b   :  { %5219 = vmatprep.subr.bf16.mxu0 %v9120_v62 }
 0x30c   :  { %5271 = vmatpush2.bf16.msra.mxu1 %v9163_v55 }
 0x30d   :  { %5272 = vmatprep.subr.bf16.mxu1 %v9168_v45 }
 0x30e   :  { %5220 = vmatpush2.bf16.msra.mxu0 %v9118_v58 }
 0x30f   :  { %5221 = vmatprep.subr.bf16.mxu0 %v9123_v46 }
 0x310   :  { %5273 = vmatpush2.bf16.msra.mxu1 %v9166_v1 }
 0x311   :  { %5274 = vmatprep.subr.bf16.mxu1 %v9171_v14 }
 0x312   :  { %5222 = vmatpush2.bf16.msra.mxu0 %v9121_v23 }
 0x313   :  { %5223 = vmatprep.subr.bf16.mxu0 %v9126_v47 }
 0x314   :  { %5275 = vmatpush2.bf16.msra.mxu1 %v9169_v13 }
 0x315   :  { %5276 = vmatprep.subr.bf16.mxu1 %v9174_v52 }
 0x316   :  { %5224 = vmatpush2.bf16.msra.mxu0 %v9124_v17 }
 0x318   :  { %5277 = vmatpush2.bf16.msra.mxu1 %v9172_v8 }
 0x319   :  { %5226 = vmatmul.mubr.bf16.vlgmr.msra.gmra.mxu0 %v10466_v16  ;;  %6324 = vmatprep.subr.bf16.mxu1 %v9177_v9  ;;  %v4081_v60 = vpop.f32.mrf.mxu0 }
 0x31a   :  { %5235 = vmatprep.mubr.bf16.mxu0 %v10472_v26  ;;  %v4082_v50 = vadd.f32 %v4081_v60, %v758_v22 }
 0x31b   :  { %v4134_v15 = vpop.f32.mrf.mxu1  ;;  %v4083_v41 = vpop.f32.mrf.mxu0 }
 0x31c   :  { %v4084_v0 = vadd.f32 %v4083_v41, %v762_v43  ;;  %v4135_v51 = vadd.f32 %v4134_v15, %v4082_v50 }
 0x31d   :  { %v4136_v61 = vpop.f32.mrf.mxu1  ;;  %v4085_v5 = vpop.f32.mrf.mxu0 }
 0x31e   :  { %v4086_v12 = vadd.f32 %v4085_v5, %v758_v22  ;;  %v4137_v49 = vadd.f32 %v4136_v61, %v4084_v0 }
 0x31f   :  { %v4138_v63 = vpop.f32.mrf.mxu1  ;;  %v4087_v33 = vpop.f32.mrf.mxu0 }
 0x320   :  { %v4088_v10 = vadd.f32 %v4087_v33, %v762_v43  ;;  %v4139_v40 = vadd.f32 %v4138_v63, %v4086_v12 }
 0x321   :  { %5236 = vmatmul.mubr.bf16.gmra.mxu0 %v10480_v35  ;;  %v4140_v19 = vpop.f32.mrf.mxu1  ;;  %v4091_v59 = vpop.f32.mrf.mxu0 }
 0x322   :  { %v4092_v57 = vadd.f32 %v4091_v59, %v758_v22  ;;  %v4141_v45 = vadd.f32 %v4140_v19, %v4088_v10 }
 0x323   :  { %v4144_v34 = vpop.f32.mrf.mxu1  ;;  %v4093_v36 = vpop.f32.mrf.mxu0 }
 0x324   :  { %v4094_v62 = vadd.f32 %v4093_v36, %v762_v43  ;;  %v4145_v14 = vadd.f32 %v4144_v34, %v4092_v57 }
 0x325   :  { %v4146_v20 = vpop.f32.mrf.mxu1  ;;  %v4095_v42 = vpop.f32.mrf.mxu0 }
 0x326   :  { %v4096_v23 = vadd.f32 %v4095_v42, %v758_v22  ;;  %v4147_v60 = vadd.f32 %v4146_v20, %v4094_v62 }
 0x327   :  { %v4148_v21 = vpop.f32.mrf.mxu1  ;;  %v4097_v48 = vpop.f32.mrf.mxu0 }
 0x328   :  { %v4098_v41 = vadd.f32 %v4097_v48, %v762_v43  ;;  %v4149_v28 = vadd.f32 %v4148_v21, %v4096_v23  ;;  %v9175_v43 = vld [vmem:[#allocation11 + $0x70] ss:$8 sps:$4 sm:$0xff]   ;;  %v9184_v23 = vld [vmem:[#allocation11 + $0x40] ss:$8 sps:$4 sm:$0xff]  }
 0x329   :  { %v4150_v53 = vpop.f32.mrf.mxu1 }
 0x32a   :  { %v4151_v42 = vadd.f32 %v4150_v53, %v4098_v41  ;;  %v9190_v41 = vld [vmem:[#allocation11 + $0x20] ss:$8 sps:$4 sm:$0xff]  }
 0x359   :  { %v4187_v37 = vpop.f32.mrf.mxu0 }
 0x35a   :  { %v4188_v4 = vadd.f32 %v4187_v37, %v4135_v51 }
 0x35b   :  { %v4240_v27 = vpop.f32.mrf.mxu1  ;;  %v4189_v39 = vpop.f32.mrf.mxu0 }
 0x35c   :  { %v4241_v3 = vadd.f32 %v4240_v27, %v4188_v4  ;;  %v4190_v25 = vadd.f32 %v4189_v39, %v4137_v49  ;;  %v9180_v49 = vld [vmem:[#allocation11 + $0x64] ss:$8 sps:$4 sm:$0xff]   ;;  %v9178_v39 = vld [vmem:[#allocation11 + $0x60] ss:$8 sps:$4 sm:$0xff]  }
 0x35d   :  { %v4242_v54 = vpop.f32.mrf.mxu1  ;;  %v4191_v55 = vpop.f32.mrf.mxu0 }
 0x35e   :  { %v4243_v58 = vadd.f32 %v4242_v54, %v4190_v25  ;;  %v4192_v46 = vadd.f32 %v4191_v55, %v4139_v40  ;;  %v4265_v13 = vmax.f32 %v4241_v3, 0.0  ;;  %v9183_v25 = vld [vmem:[#allocation11 + $0x54] ss:$8 sps:$4 sm:$0xff]  }
 0x35f   :  { %v4244_v1 = vpop.f32.mrf.mxu1  ;;  %v4193_v47 = vpop.f32.mrf.mxu0 }
 0x360   :  { %v4266_v52 = vmax.f32 %v4243_v58, 0.0  ;;  %v4245_v17 = vadd.f32 %v4244_v1, %v4192_v46  ;;  %v4194_v8 = vadd.f32 %v4193_v47, %v4141_v45  ;;  %v9181_v45 = vld [vmem:[#allocation11 + $0x50] ss:$8 sps:$4 sm:$0xff]   ;;  %v9186_v46 = vld [vmem:[#allocation11 + $0x44] ss:$8 sps:$4 sm:$0xff]  }
 0x361   :  { %v4246_v9 = vpop.f32.mrf.mxu1  ;;  %v4197_v15 = vpop.f32.mrf.mxu0  ;;  %v9271_v1 = vld [vmem:[#allocation13 + $0x70] ss:$8 sps:$4 sm:$0xff]   ;;  %v9276_v47 = vld [vmem:[#allocation13 + $0x64] ss:$8 sps:$4 sm:$0xff]  }
 0x362   :  { %v8772_v61 = vpack.c.bf16 %v4266_v52, %v4265_v13  ;;  %v4247_v5 = vadd.f32 %v4246_v9, %v4194_v8  ;;  %v4198_v63 = vadd.f32 %v4197_v15, %v4145_v14  ;;  %v4273_v59 = vmax.f32 %v4245_v17, 0.0  ;;  %v9273_v14 = vld [vmem:[#allocation13 + $0x74] ss:$8 sps:$4 sm:$0xff]   ;;  %v9187_v8 = vld [vmem:[#allocation11 + $0x30] ss:$8 sps:$4 sm:$0xff]  }
 0x363   :  { %v4250_v33 = vpop.f32.mrf.mxu1  ;;  %v4199_v19 = vpop.f32.mrf.mxu0  ;;  %5631 = vmatprep.subr.bf16.mxu0 %v9273_v14  ;;  %v9279_v17 = vld [vmem:[#allocation13 + $0x54] ss:$8 sps:$4 sm:$0xff]   ;;  %v9192_v9 = vld [vmem:[#allocation11 + $0x24] ss:$8 sps:$4 sm:$0xff]  }
 0x364   :  { %6651 = vst [vmem:[#allocation23 + $0x18] sm:$0xff] %v8772_v61  ;;  %v4274_v7 = vmax.f32 %v4247_v5, 0.0  ;;  %v4200_v34 = vadd.f32 %v4199_v19, %v4147_v60  ;;  %v4251_v44 = vadd.f32 %v4250_v33, %v4198_v63  ;;  %v10487_v48 = vpack.c.bf16 %v4273_v59, %v4265_v13  ;;  %v9189_v13 = vld [vmem:[#allocation11 + $0x34] ss:$8 sps:$4 sm:$0xff]   ;;  %5632 = vmatpush1.bf16.msra.mxu0 %v9271_v1  ;;  %v9277_v60 = vld [vmem:[#allocation13 + $0x50] ss:$8 sps:$4 sm:$0xff]  }
 0x365   :  { %v4252_v36 = vpop.f32.mrf.mxu1  ;;  %v4201_v22 = vpop.f32.mrf.mxu0  ;;  %5633 = vmatprep.subr.bf16.mxu0 %v9276_v47  ;;  %v9282_v15 = vld [vmem:[#allocation13 + $0x44] ss:$8 sps:$4 sm:$0xff]   ;;  %v9195_v61 = vld [vmem:[#allocation11 + $0x14] ss:$8 sps:$4 sm:$0xff]   ;;  %v9280_v5 = vld [vmem:[#allocation13 + $0x40] ss:$8 sps:$4 sm:$0xff]  }
 0x366   :  { %v10485_v50 = vpack.c.bf16 %v4274_v7, %v4266_v52  ;;  %v8776_v0 = vpack.c.bf16 %v4274_v7, %v4273_v59  ;;  %v4202_v20 = vadd.f32 %v4201_v22, %v4149_v28  ;;  %v4253_v12 = vadd.f32 %v4252_v36, %v4200_v34  ;;  %v9274_v52 = vld [vmem:[#allocation13 + $0x60] ss:$8 sps:$4 sm:$0xff]   ;;  %v9285_v63 = vld [vmem:[#allocation13 + $0x34] ss:$8 sps:$4 sm:$0xff]   ;;  %v9193_v33 = vld [vmem:[#allocation11 + $0x10] ss:$8 sps:$4 sm:$0xff]  }
 0x367   :  { %v4254_v51 = vpop.f32.mrf.mxu1  ;;  %v4203_v37 = vpop.f32.mrf.mxu0  ;;  %v4281_v27 = vmax.f32 %v4251_v44, 0.0  ;;  %v9198_v59 = vld [vmem:[#allocation11 + $0x4] ss:$8 sps:$4 sm:$0xff]   ;;  %v9283_v19 = vld [vmem:[#allocation13 + $0x30] ss:$8 sps:$4 sm:$0xff]  }
 0x368   :  { %6655 = vst [vmem:[#allocation23 + $0x48] sm:$0xff] %v8776_v0  ;;  %v4204_v21 = vadd.f32 %v4203_v37, %v4151_v42  ;;  %v4255_v10 = vadd.f32 %v4254_v51, %v4202_v20  ;;  %5278 = vmatprep.mubr.bf16.mxu1 %v10485_v50  ;;  %v4282_v57 = vmax.f32 %v4253_v12, 0.0  ;;  %5634 = vmatpush1.bf16.msra.mxu0 %v9274_v52  ;;  %v9288_v28 = vld [vmem:[#allocation13 + $0x24] ss:$8 sps:$4 sm:$0xff]   ;;  %v9196_v7 = vld [vmem:[#allocation11] ss:$8 sps:$4 sm:$0xff]  }
 0x369   :  { %v4256_v4 = vpop.f32.mrf.mxu1  ;;  %5279 = vmatmul.mubr.bf16.vlgmr.msra.gmra.mxu1 %v10487_v48  ;;  %5635 = vmatprep.subr.bf16.mxu0 %v9279_v17  ;;  %v9201_v34 = vld [vmem:[#allocation11 + $0xf4] ss:$8 sps:$4 sm:$0xff]   ;;  %v9286_v36 = vld [vmem:[#allocation13 + $0x20] ss:$8 sps:$4 sm:$0xff]   ;;  %v9199_v22 = vld [vmem:[#allocation11 + $0xf0] ss:$8 sps:$4 sm:$0xff]  }
 0x36a   :  { %v4257_v53 = vadd.f32 %v4256_v4, %v4204_v21  ;;  %6325 = vmatpush1.bf16.msra.mxu1 %v9175_v43  ;;  %v8780_v40 = vpack.c.bf16 %v4282_v57, %v4281_v27  ;;  %v4289_v3 = vmax.f32 %v4255_v10, 0.0  ;;  %v9291_v44 = vld [vmem:[#allocation13 + $0x14] ss:$8 sps:$4 sm:$0xff]   ;;  %v9204_v42 = vld [vmem:[#allocation11 + $0xe4] ss:$8 sps:$4 sm:$0xff]  }
 0x36b   :  { %6326 = vmatprep.subr.bf16.mxu1 %v9180_v49  ;;  %v9289_v0 = vld [vmem:[#allocation13 + $0x10] ss:$8 sps:$4 sm:$0xff]   ;;  %v9294_v20 = vld [vmem:[#allocation13 + $0x4] ss:$8 sps:$4 sm:$0xff]   ;;  %v9202_v51 = vld [vmem:[#allocation11 + $0xe0] ss:$8 sps:$4 sm:$0xff]  }
 0x36c   :  { %v4290_v54 = vmax.f32 %v4257_v53, 0.0  ;;  %6659 = vst [vmem:[#allocation23 + $0x78] sm:$0xff] %v8780_v40  ;;  %v10493_v58 = vpack.c.bf16 %v4289_v3, %v4281_v27  ;;  %5636 = vmatpush1.bf16.msra.mxu0 %v9277_v60  ;;  %v9207_v43 = vld [vmem:[#allocation11 + $0xd4] ss:$8 sps:$4 sm:$0xff]   ;;  %v9292_v12 = vld [vmem:[#allocation13] ss:$8 sps:$4 sm:$0xff]  }
 0x36d   :  { %5637 = vmatprep.subr.bf16.mxu0 %v9282_v15  ;;  %v9297_v37 = vld [vmem:[#allocation13 + $0xf4] ss:$8 sps:$4 sm:$0xff]   ;;  %v9205_v49 = vld [vmem:[#allocation11 + $0xd0] ss:$8 sps:$4 sm:$0xff]   ;;  %v9210_v21 = vld [vmem:[#allocation11 + $0xc4] ss:$8 sps:$4 sm:$0xff]  }
 0x36e   :  { %v10491_v62 = vpack.c.bf16 %v4290_v54, %v4282_v57  ;;  %v8784_v55 = vpack.c.bf16 %v4290_v54, %v4289_v3  ;;  %6327 = vmatpush1.bf16.msra.mxu1 %v9178_v39  ;;  %v9295_v10 = vld [vmem:[#allocation13 + $0xf0] ss:$8 sps:$4 sm:$0xff]   ;;  %v9302_v4 = vld [vmem:[#allocation13 + $0xe4] ss:$8 sps:$4 sm:$0xff]   ;;  %v9208_v27 = vld [vmem:[#allocation11 + $0xc0] ss:$8 sps:$4 sm:$0xff]  }
 0x36f   :  { %6328 = vmatprep.subr.bf16.mxu1 %v9183_v25  ;;  %v9213_v57 = vld [vmem:[#allocation11 + $0xb4] ss:$8 sps:$4 sm:$0xff]   ;;  %v9300_v53 = vld [vmem:[#allocation13 + $0xe0] ss:$8 sps:$4 sm:$0xff]   ;;  %v9211_v39 = vld [vmem:[#allocation11 + $0xb0] ss:$8 sps:$4 sm:$0xff]  }
 0x370   :  { %6663 = vst [vmem:[#allocation23 + $0xa8] sm:$0xff] %v8784_v55  ;;  %5288 = vmatprep.mubr.bf16.mxu1 %v10491_v62  ;;  %5638 = vmatpush1.bf16.msra.mxu0 %v9280_v5  ;;  %v9216_v40 = vld [vmem:[#allocation11 + $0xa4] ss:$8 sps:$4 sm:$0xff]   ;;  %v9214_v3 = vld [vmem:[#allocation11 + $0xa0] ss:$8 sps:$4 sm:$0xff]  }
 0x371   :  { %5289 = vmatmul.mubr.bf16.gmra.mxu1 %v10493_v58  ;;  %5639 = vmatprep.subr.bf16.mxu0 %v9285_v63  ;;  %v9219_v25 = vld [vmem:[#allocation11 + $0x94] ss:$8 sps:$4 sm:$0xff]   ;;  %v9217_v54 = vld [vmem:[#allocation11 + $0x90] ss:$8 sps:$4 sm:$0xff]   ;;  %v9222_v55 = vld [vmem:[#allocation11 + $0x84] ss:$8 sps:$4 sm:$0xff]  }
 0x372   :  { %6329 = vmatpush1.bf16.msra.mxu1 %v9181_v45  ;;  %6356 = vmatprep.mubr.bf16.mxu1 %v10224_v56  ;;  %v9220_v45 = vld [vmem:[#allocation11 + $0x80] ss:$8 sps:$4 sm:$0xff]   ;;  %v9223_v1 = vld [vmem:[#allocation11 + $0x270] ss:$8 sps:$4 sm:$0xff]   ;;  %v9228_v14 = vld [vmem:[#allocation11 + $0x264] ss:$8 sps:$4 sm:$0xff]  }
 0x373   :  { %6330 = vmatprep.subr.bf16.mxu1 %v9186_v46  ;;  %v9225_v46 = vld [vmem:[#allocation11 + $0x274] ss:$8 sps:$4 sm:$0xff]   ;;  %v9305_v52 = vld [vmem:[#allocation13 + $0xd0] ss:$8 sps:$4 sm:$0xff]   ;;  %v9310_v60 = vld [vmem:[#allocation13 + $0xc0] ss:$8 sps:$4 sm:$0xff]  }
 0x374   :  { %5640 = vmatpush1.bf16.msra.mxu0 %v9283_v19  ;;  %v9307_v47 = vld [vmem:[#allocation13 + $0xd4] ss:$8 sps:$4 sm:$0xff]   ;;  %v9229_v17 = vld [vmem:[#allocation11 + $0x250] ss:$8 sps:$4 sm:$0xff]   ;;  %v9232_v15 = vld [vmem:[#allocation11 + $0x240] ss:$8 sps:$4 sm:$0xff]  }
 0x375   :  { %5641 = vmatprep.subr.bf16.mxu0 %v9288_v28  ;;  %v9315_v5 = vld [vmem:[#allocation13 + $0xb0] ss:$8 sps:$4 sm:$0xff]   ;;  %v9320_v19 = vld [vmem:[#allocation13 + $0xa0] ss:$8 sps:$4 sm:$0xff]  }
 0x376   :  { %6331 = vmatpush1.bf16.msra.mxu1 %v9184_v23  ;;  %v9226_v23 = vld [vmem:[#allocation11 + $0x260] ss:$8 sps:$4 sm:$0xff]   ;;  %v9235_v63 = vld [vmem:[#allocation11 + $0x230] ss:$8 sps:$4 sm:$0xff]  }
 0x377   :  { %6332 = vmatprep.subr.bf16.mxu1 %v9189_v13  ;;  %v9231_v13 = vld [vmem:[#allocation11 + $0x254] ss:$8 sps:$4 sm:$0xff]   ;;  %v9238_v28 = vld [vmem:[#allocation11 + $0x220] ss:$8 sps:$4 sm:$0xff]  }
 0x378   :  { %5642 = vmatpush1.bf16.msra.mxu0 %v9286_v36  ;;  %v9325_v36 = vld [vmem:[#allocation13 + $0x90] ss:$8 sps:$4 sm:$0xff]  }
 0x379   :  { %5643 = vmatprep.subr.bf16.mxu0 %v9291_v44  ;;  %v9241_v44 = vld [vmem:[#allocation11 + $0x210] ss:$8 sps:$4 sm:$0xff]  }
 0x37a   :  { %6333 = vmatpush1.bf16.msra.mxu1 %v9187_v8  ;;  %v9312_v8 = vld [vmem:[#allocation13 + $0xc4] ss:$8 sps:$4 sm:$0xff]  }
 0x37b   :  { %6334 = vmatprep.subr.bf16.mxu1 %v9192_v9  ;;  %v9234_v9 = vld [vmem:[#allocation11 + $0x244] ss:$8 sps:$4 sm:$0xff]  }
 0x37c   :  { %5644 = vmatpush1.bf16.msra.mxu0 %v9289_v0  ;;  %v9330_v0 = vld [vmem:[#allocation13 + $0x80] ss:$8 sps:$4 sm:$0xff]  }
 0x37d   :  { %5645 = vmatprep.subr.bf16.mxu0 %v9294_v20  ;;  %v9244_v20 = vld [vmem:[#allocation11 + $0x200] ss:$8 sps:$4 sm:$0xff]  }
 0x37e   :  { %6335 = vmatpush1.bf16.msra.mxu1 %v9190_v41  ;;  %v9317_v41 = vld [vmem:[#allocation13 + $0xb4] ss:$8 sps:$4 sm:$0xff]  }
 0x37f   :  { %6336 = vmatprep.subr.bf16.mxu1 %v9195_v61  ;;  %v9237_v61 = vld [vmem:[#allocation11 + $0x234] ss:$8 sps:$4 sm:$0xff]  }
 0x380   :  { %5646 = vmatpush1.bf16.msra.mxu0 %v9292_v12  ;;  %v9247_v12 = vld [vmem:[#allocation11 + $0x2f0] ss:$8 sps:$4 sm:$0xff]  }
 0x381   :  { %5647 = vmatprep.subr.bf16.mxu0 %v9297_v37  ;;  %v9252_v37 = vld [vmem:[#allocation11 + $0x2e4] ss:$8 sps:$4 sm:$0xff]  }
 0x382   :  { %6337 = vmatpush1.bf16.msra.mxu1 %v9193_v33  ;;  %v9322_v33 = vld [vmem:[#allocation13 + $0xa4] ss:$8 sps:$4 sm:$0xff]  }
 0x383   :  { %6338 = vmatprep.subr.bf16.mxu1 %v9198_v59  ;;  %v9240_v59 = vld [vmem:[#allocation11 + $0x224] ss:$8 sps:$4 sm:$0xff]  }
 0x384   :  { %5648 = vmatpush2.bf16.msra.mxu0 %v9295_v10  ;;  %v9253_v10 = vld [vmem:[#allocation11 + $0x2d0] ss:$8 sps:$4 sm:$0xff]  }
 0x385   :  { %5649 = vmatprep.subr.bf16.mxu0 %v9302_v4  ;;  %v9258_v4 = vld [vmem:[#allocation11 + $0x2c4] ss:$8 sps:$4 sm:$0xff]  }
 0x386   :  { %6339 = vmatpush1.bf16.msra.mxu1 %v9196_v7  ;;  %v9327_v7 = vld [vmem:[#allocation13 + $0x94] ss:$8 sps:$4 sm:$0xff]  }
 0x387   :  { %6340 = vmatprep.subr.bf16.mxu1 %v9201_v34  ;;  %v9243_v34 = vld [vmem:[#allocation11 + $0x214] ss:$8 sps:$4 sm:$0xff]  }
 0x388   :  { %5650 = vmatpush2.bf16.msra.mxu0 %v9300_v53  ;;  %v9259_v53 = vld [vmem:[#allocation11 + $0x2b0] ss:$8 sps:$4 sm:$0xff]  }
 0x389   :  { %5651 = vmatprep.subr.bf16.mxu0 %v9307_v47  ;;  %v9309_v47 = vld [vmem:[#allocation17 + $0x28] sm:$0xff]  }
 0x38a   :  { %6341 = vmatpush2.bf16.msra.mxu1 %v9199_v22  ;;  %v9332_v22 = vld [vmem:[#allocation13 + $0x84] ss:$8 sps:$4 sm:$0xff]  }
 0x38b   :  { %6342 = vmatprep.subr.bf16.mxu1 %v9204_v42  ;;  %v9246_v42 = vld [vmem:[#allocation11 + $0x204] ss:$8 sps:$4 sm:$0xff]  }
 0x38c   :  { %5652 = vmatpush2.bf16.msra.mxu0 %v9305_v52  ;;  %v9314_v52 = vld [vmem:[#allocation17 + $0x20] sm:$0xff]  }
 0x38d   :  { %5653 = vmatprep.subr.bf16.mxu0 %v9312_v8  ;;  %v9319_v8 = vld [vmem:[#allocation17 + $0x18] sm:$0xff]  }
 0x38e   :  { %6343 = vmatpush2.bf16.msra.mxu1 %v9202_v51  ;;  %v9337_v51 = vld [vmem:[#allocation11 + $0x174] ss:$8 sps:$4 sm:$0xff]  }
 0x38f   :  { %6344 = vmatprep.subr.bf16.mxu1 %v9207_v43  ;;  %v9249_v43 = vld [vmem:[#allocation11 + $0x2f4] ss:$8 sps:$4 sm:$0xff]  }
 0x390   :  { %5654 = vmatpush2.bf16.msra.mxu0 %v9310_v60 }
 0x391   :  { %5655 = vmatprep.subr.bf16.mxu0 %v9317_v41  ;;  %v9328_v41 = vld [vmem:[#allocation17 + $0x48] sm:$0xff]  }
 0x392   :  { %6345 = vmatpush2.bf16.msra.mxu1 %v9205_v49  ;;  %v9250_v49 = vld [vmem:[#allocation11 + $0x2e0] ss:$8 sps:$4 sm:$0xff]  }
 0x393   :  { %6346 = vmatprep.subr.bf16.mxu1 %v9210_v21  ;;  %v9255_v21 = vld [vmem:[#allocation11 + $0x2d4] ss:$8 sps:$4 sm:$0xff]  }
 0x394   :  { %5656 = vmatpush2.bf16.msra.mxu0 %v9315_v5  ;;  %v9329_v5 = vld [vmem:[#allocation17 + $0x8] sm:$0xff]  }
 0x395   :  { %5657 = vmatprep.subr.bf16.mxu0 %v9322_v33 }
 0x396   :  { %6347 = vmatpush2.bf16.msra.mxu1 %v9208_v27  ;;  %v9256_v27 = vld [vmem:[#allocation11 + $0x2c0] ss:$8 sps:$4 sm:$0xff]  }
 0x397   :  { %6348 = vmatprep.subr.bf16.mxu1 %v9213_v57  ;;  %v9261_v57 = vld [vmem:[#allocation11 + $0x2b4] ss:$8 sps:$4 sm:$0xff]  }
 0x398   :  { %5658 = vmatpush2.bf16.msra.mxu0 %v9320_v19  ;;  %v9338_v19 = vld [vmem:[#allocation16 + $0x78] sm:$0xff]  }
 0x399   :  { %5659 = vmatprep.subr.bf16.mxu0 %v9327_v7  ;;  %v5121_v60 = vpop.f32.mrf.mxu0 }
 0x39a   :  { %6349 = vmatpush2.bf16.msra.mxu1 %v9211_v39  ;;  %v9264_v39 = vld [vmem:[#allocation11 + $0x2a4] ss:$8 sps:$4 sm:$0xff]  }
 0x39b   :  { %6350 = vmatprep.subr.bf16.mxu1 %v9216_v40  ;;  %v9262_v40 = vld [vmem:[#allocation11 + $0x2a0] ss:$8 sps:$4 sm:$0xff]  }
 0x39c   :  { %5660 = vmatpush2.bf16.msra.mxu0 %v9325_v36 }
 0x39d   :  { %5661 = vmatprep.subr.bf16.mxu0 %v9332_v22 }
 0x39e   :  { %6351 = vmatpush2.bf16.msra.mxu1 %v9214_v3  ;;  %v9267_v3 = vld [vmem:[#allocation11 + $0x294] ss:$8 sps:$4 sm:$0xff]  }
 0x39f   :  { %6352 = vmatprep.subr.bf16.mxu1 %v9219_v25  ;;  %v9265_v25 = vld [vmem:[#allocation11 + $0x290] ss:$8 sps:$4 sm:$0xff]  }
 0x3a0   :  { %5662 = vmatpush2.bf16.msra.mxu0 %v9330_v0 }
 0x3a1   :  { %6377 = vmatprep.subr.bf16.mxu0 %v9337_v51 }
 0x3a2   :  { %6353 = vmatpush2.bf16.msra.mxu1 %v9217_v54  ;;  %v9270_v54 = vld [vmem:[#allocation11 + $0x284] ss:$8 sps:$4 sm:$0xff]  }
 0x3a3   :  { %6354 = vmatprep.subr.bf16.mxu1 %v9222_v55  ;;  %v9268_v55 = vld [vmem:[#allocation11 + $0x280] ss:$8 sps:$4 sm:$0xff]  }
 0x3a6   :  { %6355 = vmatpush2.bf16.msra.mxu1 %v9220_v45  ;;  %v9298_v45 = vld [vmem:[#allocation17 + $0x78] sm:$0xff]  }
 0x3a7   :  { %6430 = vmatprep.subr.bf16.mxu1 %v9225_v46  ;;  %v9299_v46 = vld [vmem:[#allocation17 + $0x38] sm:$0xff]  }
 0x3a9   :  { %6357 = vmatmul.mubr.bf16.vlgmr.msra.gmra.mxu1 %v10215_v24 }
 0x3aa   :  { %6366 = vmatprep.mubr.bf16.mxu1 %v10228_v29  ;;  %6431 = vmatpush1.bf16.msra.mxu1 %v9223_v1  ;;  %v9303_v1 = vld [vmem:[#allocation17 + $0x70] sm:$0xff]  }
 0x3ab   :  { %6432 = vmatprep.subr.bf16.mxu1 %v9228_v14  ;;  %v9304_v14 = vld [vmem:[#allocation17 + $0x30] sm:$0xff]  }
 0x3ae   :  { %6433 = vmatpush1.bf16.msra.mxu1 %v9226_v23  ;;  %v9308_v23 = vld [vmem:[#allocation17 + $0x68] sm:$0xff]  }
 0x3af   :  { %6434 = vmatprep.subr.bf16.mxu1 %v9231_v13  ;;  %v9313_v13 = vld [vmem:[#allocation17 + $0x60] sm:$0xff]  }
 0x3b1   :  { %6367 = vmatmul.mubr.bf16.gmra.mxu1 %v10226_v18 }
 0x3b2   :  { %6435 = vmatpush1.bf16.msra.mxu1 %v9229_v17  ;;  %6462 = vmatprep.mubr.bf16.mxu1 %v10439_v11  ;;  %v9318_v17 = vld [vmem:[#allocation17 + $0x58] sm:$0xff]  }
 0x3b3   :  { %6436 = vmatprep.subr.bf16.mxu1 %v9234_v9  ;;  %v9323_v9 = vld [vmem:[#allocation17 + $0x50] sm:$0xff]  }
 0x3b6   :  { %6437 = vmatpush1.bf16.msra.mxu1 %v9232_v15  ;;  %v9324_v15 = vld [vmem:[#allocation17 + $0x10] sm:$0xff]  }
 0x3b7   :  { %6438 = vmatprep.subr.bf16.mxu1 %v9237_v61  ;;  %v5123_v61 = vpop.f32.mrf.mxu0 }
 0x3b9   :  { %v5125_v33 = vpop.f32.mrf.mxu0 }
 0x3ba   :  { %6439 = vmatpush1.bf16.msra.mxu1 %v9235_v63  ;;  %v9333_v63 = vld [vmem:[#allocation17 + $0x40] sm:$0xff]  }
 0x3bb   :  { %6440 = vmatprep.subr.bf16.mxu1 %v9240_v59  ;;  %v9334_v59 = vld [vmem:[#allocation17] sm:$0xff]  }
 0x3be   :  { %6441 = vmatpush1.bf16.msra.mxu1 %v9238_v28  ;;  %v5127_v28 = vpop.f32.mrf.mxu0 }
 0x3bf   :  { %6442 = vmatprep.subr.bf16.mxu1 %v9243_v34  ;;  %v5174_v34 = vpop.f32.mrf.mxu1 }
 0x3c0   :  { %v5131_v7 = vpop.f32.mrf.mxu0 }
 0x3c2   :  { %6443 = vmatpush1.bf16.msra.mxu1 %v9241_v44  ;;  %v5133_v36 = vpop.f32.mrf.mxu0  ;;  %v5176_v44 = vpop.f32.mrf.mxu1 }
 0x3c3   :  { %6444 = vmatprep.subr.bf16.mxu1 %v9246_v42 }
 0x3c4   :  { %v5135_v22 = vpop.f32.mrf.mxu0  ;;  %v5178_v42 = vpop.f32.mrf.mxu1 }
 0x3c6   :  { %6445 = vmatpush1.bf16.msra.mxu1 %v9244_v20  ;;  %v5137_v0 = vpop.f32.mrf.mxu0  ;;  %v5180_v20 = vpop.f32.mrf.mxu1 }
 0x3c7   :  { %6446 = vmatprep.subr.bf16.mxu1 %v9249_v43  ;;  %v4435_v43 = vld [vmem:[#allocation10] sm:$0x3] }
 0x3ca   :  { %6447 = vmatpush2.bf16.msra.mxu1 %v9247_v12  ;;  %v5184_v12 = vpop.f32.mrf.mxu1 }
 0x3cb   :  { %6448 = vmatprep.subr.bf16.mxu1 %v9252_v37 }
 0x3ce   :  { %6449 = vmatpush2.bf16.msra.mxu1 %v9250_v49  ;;  %v4440_v49 = vrot.slane %v4435_v43, %v10114_v2 }
 0x3cf   :  { %6450 = vmatprep.subr.bf16.mxu1 %v9255_v21  ;;  %v5186_v21 = vpop.f32.mrf.mxu1 }
 0x3d2   :  { %6451 = vmatpush2.bf16.msra.mxu1 %v9253_v10 }
 0x3d3   :  { %6452 = vmatprep.subr.bf16.mxu1 %v9258_v4  ;;  %v4444_v4 = vrot.slane %v4435_v43, %v10119_v6 }
 0x3d6   :  { %6453 = vmatpush2.bf16.msra.mxu1 %v9256_v27  ;;  %v5122_v27 = vadd.f32 %v5121_v60, %v4440_v49 }
 0x3d7   :  { %6454 = vmatprep.subr.bf16.mxu1 %v9261_v57  ;;  %v5188_v57 = vpop.f32.mrf.mxu1 }
 0x3d9   :  { %v5227_v51 = vpop.f32.mrf.mxu0 }
 0x3da   :  { %6455 = vmatpush2.bf16.msra.mxu1 %v9259_v53 }
 0x3db   :  { %6456 = vmatprep.subr.bf16.mxu1 %v9264_v39  ;;  %v5229_v37 = vpop.f32.mrf.mxu0  ;;  %v5124_v39 = vadd.f32 %v5123_v61, %v4444_v4 }
 0x3dd   :  { %v5231_v10 = vpop.f32.mrf.mxu0 }
 0x3de   :  { %6457 = vmatpush2.bf16.msra.mxu1 %v9262_v40  ;;  %v5175_v40 = vadd.f32 %v5174_v34, %v5122_v27 }
 0x3df   :  { %6458 = vmatprep.subr.bf16.mxu1 %v9267_v3  ;;  %v5233_v53 = vpop.f32.mrf.mxu0  ;;  %v5126_v3 = vadd.f32 %v5125_v33, %v4440_v49 }
 0x3e2   :  { %6459 = vmatpush2.bf16.msra.mxu1 %v9265_v25  ;;  %v5190_v25 = vpop.f32.mrf.mxu1 }
 0x3e3   :  { %6460 = vmatprep.subr.bf16.mxu1 %v9270_v54  ;;  %v5237_v54 = vpop.f32.mrf.mxu0 }
 0x3e6   :  { %6461 = vmatpush2.bf16.msra.mxu1 %v9268_v55  ;;  %v5177_v55 = vadd.f32 %v5176_v44, %v5124_v39 }
 0x3e7   :  { %8793 = vmatprep.subr.bf16.mxu1 %v9298_v45  ;;  %v5128_v45 = vadd.f32 %v5127_v28, %v4444_v4 }
 0x3e9   :  { %6463 = vmatmul.mubr.bf16.vlgmr.msra.gmra.mxu1 %v10466_v16 }
 0x3ea   :  { %6472 = vmatprep.mubr.bf16.mxu1 %v10472_v26  ;;  %8794 = vmatpush3.bf16.msra.mxu1 %v9299_v46  ;;  %v5228_v46 = vadd.f32 %v5227_v51, %v5175_v40 }
 0x3eb   :  { %8795 = vmatprep.subr.bf16.mxu1 %v9303_v1  ;;  %v5132_v1 = vadd.f32 %v5131_v7, %v4440_v49  ;;  %v5138_v7 = vadd.f32 %v5137_v0, %v4444_v4 }
 0x3ee   :  { %8796 = vmatpush3.bf16.msra.mxu1 %v9304_v14 }
 0x3ef   :  { %8797 = vmatprep.subr.bf16.mxu1 %v9308_v23  ;;  %v5179_v23 = vadd.f32 %v5178_v42, %v5126_v3 }
 0x3f1   :  { %6473 = vmatmul.mubr.bf16.gmra.mxu1 %v10480_v35  ;;  %v5232_v60 = vadd.f32 %v5231_v10, %v5179_v23 }
 0x3f2   :  { %8798 = vmatpush3.bf16.msra.mxu1 %v9309_v47  ;;  %v5230_v47 = vadd.f32 %v5229_v37, %v5177_v55  ;;  %v5191_v37 = vadd.f32 %v5190_v25, %v5138_v7  ;;  %v9335_v25 = vld [vmem:[#allocation11 + $0x170] ss:$8 sps:$4 sm:$0xff]   ;;  %v9354_v7 = vld [vmem:[#allocation16 + $0x20] sm:$0xff]  }
 0x3f3   :  { %8799 = vmatprep.subr.bf16.mxu1 %v9313_v13 }
 0x3f6   :  { %8800 = vmatpush3.bf16.msra.mxu1 %v9314_v52  ;;  %v5239_v52 = vpop.f32.mrf.mxu0 }
 0x3f7   :  { %8801 = vmatprep.subr.bf16.mxu1 %v9318_v17 }
 0x3fa   :  { %8802 = vmatpush3.bf16.msra.mxu1 %v9319_v8  ;;  %v5181_v8 = vadd.f32 %v5180_v20, %v5128_v45  ;;  %v9339_v45 = vld [vmem:[#allocation16 + $0x38] sm:$0xff]  }
 0x3fb   :  { %8803 = vmatprep.subr.bf16.mxu1 %v9323_v9  ;;  %v5134_v9 = vadd.f32 %v5133_v36, %v4444_v4 }
 0x3fd   :  { %v5187_v28 = vadd.f32 %v5186_v21, %v5134_v9  ;;  %v9348_v9 = vld [vmem:[#allocation16 + $0x68] sm:$0xff]  }
 0x3fe   :  { %8804 = vmatpush3.bf16.msra.mxu1 %v9324_v15 }
 0x3ff   :  { %8805 = vmatprep.subr.bf16.mxu1 %v9328_v41  ;;  %v5185_v41 = vadd.f32 %v5184_v12, %v5132_v1  ;;  %v5240_v20 = vadd.f32 %v5239_v52, %v5187_v28  ;;  %v9342_v1 = vld [vmem:[#allocation11 + $0x164] ss:$8 sps:$4 sm:$0xff]   ;;  %v9340_v52 = vld [vmem:[#allocation11 + $0x160] ss:$8 sps:$4 sm:$0xff]  }
 0x400   :  { %v9350_v28 = vld [vmem:[#allocation11 + $0x140] ss:$8 sps:$4 sm:$0xff]  }
 0x401   :  { %v5238_v34 = vadd.f32 %v5237_v54, %v5185_v41 }
 0x402   :  { %8806 = vmatpush3.bf16.msra.mxu1 %v9329_v5  ;;  %v5136_v5 = vadd.f32 %v5135_v22, %v4440_v49 }
 0x403   :  { %8807 = vmatprep.subr.bf16.mxu1 %v9333_v63  ;;  %v5234_v63 = vadd.f32 %v5233_v53, %v5181_v8  ;;  %v9347_v8 = vld [vmem:[#allocation11 + $0x154] ss:$8 sps:$4 sm:$0xff]  }
 0x404   :  { %v5189_v51 = vadd.f32 %v5188_v57, %v5136_v5  ;;  %v9345_v5 = vld [vmem:[#allocation11 + $0x150] ss:$8 sps:$4 sm:$0xff]  }
 0x406   :  { %8808 = vmatpush3.bf16.msra.mxu1 %v9334_v59  ;;  %v5241_v59 = vpop.f32.mrf.mxu0 }
 0x407   :  { %8821 = vmatprep.subr.bf16.mxu1 %v9338_v19  ;;  %v5242_v10 = vadd.f32 %v5241_v59, %v5189_v51  ;;  %v9352_v59 = vld [vmem:[#allocation11 + $0x144] ss:$8 sps:$4 sm:$0xff]   ;;  %v9359_v51 = vld [vmem:[#allocation16 + $0x18] sm:$0xff]  }
 0x408   :  { %v5243_v43 = vpop.f32.mrf.mxu0 }
 0x409   :  { %v5244_v27 = vadd.f32 %v5243_v43, %v5191_v37  ;;  %v9360_v43 = vld [vmem:[#allocation11 + $0x120] ss:$8 sps:$4 sm:$0xff]   ;;  %v9367_v37 = vld [vmem:[#allocation11 + $0x114] ss:$8 sps:$4 sm:$0xff]  }
 0x429   :  { %v5280_v14 = vpop.f32.mrf.mxu1 }
 0x42a   :  { %v5281_v13 = vadd.f32 %v5280_v14, %v5228_v46  ;;  %v9343_v14 = vld [vmem:[#allocation16 + $0x70] sm:$0xff]  }
 0x42b   :  { %v5282_v17 = vpop.f32.mrf.mxu1 }
 0x42c   :  { %v5283_v15 = vadd.f32 %v5282_v17, %v5230_v47  ;;  %9511 = vtanh.f32 %v5281_v13  ;;  %v9344_v17 = vld [vmem:[#allocation16 + $0x30] sm:$0xff]  }
 0x42d   :  { %v5284_v61 = vpop.f32.mrf.mxu1 }
 0x42e   :  { %9513 = vtanh.f32 %v5283_v15  ;;  %v5285_v33 = vadd.f32 %v5284_v61, %v5232_v60 }
 0x42f   :  { %v5286_v19 = vpop.f32.mrf.mxu1 }
 0x430   :  { %v5287_v44 = vadd.f32 %v5286_v19, %v5234_v63  ;;  %9515 = vtanh.f32 %v5285_v33  ;;  %v9349_v63 = vld [vmem:[#allocation16 + $0x28] sm:$0xff]   ;;  %v9353_v19 = vld [vmem:[#allocation16 + $0x60] sm:$0xff]  }
 0x431   :  { %v5290_v42 = vpop.f32.mrf.mxu1 }
 0x432   :  { %9517 = vtanh.f32 %v5287_v44  ;;  %v5291_v36 = vadd.f32 %v5290_v42, %v5238_v34  ;;  %v9357_v34 = vld [vmem:[#allocation11 + $0x134] ss:$8 sps:$4 sm:$0xff]   ;;  %v9355_v42 = vld [vmem:[#allocation11 + $0x130] ss:$8 sps:$4 sm:$0xff]  }
 0x433   :  { %v5292_v12 = vpop.f32.mrf.mxu1  ;;  %v9358_v44 = vld [vmem:[#allocation16 + $0x58] sm:$0xff]  }
 0x434   :  { %v5293_v22 = vadd.f32 %v5292_v12, %v5240_v20  ;;  %9519 = vtanh.f32 %v5291_v36  ;;  %v9362_v20 = vld [vmem:[#allocation11 + $0x124] ss:$8 sps:$4 sm:$0xff]   ;;  %v9363_v36 = vld [vmem:[#allocation16 + $0x50] sm:$0xff]  }
 0x435   :  { %v5294_v49 = vpop.f32.mrf.mxu1  ;;  %v9364_v12 = vld [vmem:[#allocation16 + $0x10] sm:$0xff]  }
 0x436   :  { %9521 = vtanh.f32 %v5293_v22  ;;  %v5295_v53 = vadd.f32 %v5294_v49, %v5242_v10  ;;  %v9365_v10 = vld [vmem:[#allocation11 + $0x110] ss:$8 sps:$4 sm:$0xff]   ;;  %v9372_v49 = vld [vmem:[#allocation11 + $0x104] ss:$8 sps:$4 sm:$0xff]  }
 0x437   :  { %v5296_v21 = vpop.f32.mrf.mxu1  ;;  %v9369_v22 = vld [vmem:[#allocation16 + $0x8] sm:$0xff]  }
 0x438   :  { %v5297_v0 = vadd.f32 %v5296_v21, %v5244_v27  ;;  %9523 = vtanh.f32 %v5295_v53  ;;  %v9373_v27 = vld [vmem:[#allocation16 + $0x40] sm:$0xff]  }
 0x439   :  { %v9512_v4 = vpop.eup %9511  ;;  %v9370_v53 = vld [vmem:[#allocation11 + $0x100] ss:$8 sps:$4 sm:$0xff]  }
 0x43a   :  { %9525 = vtanh.f32 %v5297_v0  ;;  %v9374_v21 = vld [vmem:[#allocation16] sm:$0xff]   ;;  %v9377_v0 = vld [vmem:[#allocation11 + $0x1f4] ss:$8 sps:$4 sm:$0xff]  }
 0x43b   :  { %v9514_v39 = vpop.eup %9513 }
 0x43c   :  { %v8785_v57 = vpack.c.bf16 %v9514_v39, %v9512_v4 }
 0x43d   :  { %v9516_v40 = vpop.eup %9515 }
 0x43e   :  { %6684 = vst [vmem:[#allocation23 + $0x20] sm:$0xff] %v8785_v57  ;;  %v5307_v46 = vpack.c.bf16 %v9516_v40, %v9512_v4  ;;  %v9378_v4 = vld [vmem:[#allocation16 + $0x178] sm:$0xff]  }
 0x43f   :  { %v9518_v3 = vpop.eup %9517  ;;  %v9379_v57 = vld [vmem:[#allocation16 + $0x138] sm:$0xff]  }
 0x440   :  { %v8786_v54 = vpack.c.bf16 %v9518_v3, %v9516_v40  ;;  %v5308_v55 = vpack.c.bf16 %v9518_v3, %v9514_v39  ;;  %v9375_v39 = vld [vmem:[#allocation11 + $0x1f0] ss:$8 sps:$4 sm:$0xff]   ;;  %v9382_v40 = vld [vmem:[#allocation11 + $0x1e4] ss:$8 sps:$4 sm:$0xff]  }
 0x441   :  { %v9520_v23 = vpop.eup %9519  ;;  %v9383_v3 = vld [vmem:[#allocation16 + $0x170] sm:$0xff]  }
 0x442   :  { %6685 = vst [vmem:[#allocation23 + $0x50] sm:$0xff] %v8786_v54  ;;  %5663 = vmatprep.mubr.bf16.mxu0 %v5308_v55  ;;  %7000 = vmatprep.mubr.bf16.mxu1 %v5308_v55  ;;  %v9380_v54 = vld [vmem:[#allocation11 + $0x1e0] ss:$8 sps:$4 sm:$0xff]   ;;  %v9384_v55 = vld [vmem:[#allocation16 + $0x130] sm:$0xff]  }
 0x443   :  { %v9522_v47 = vpop.eup %9521  ;;  %5664 = vmatmul.mubr.bf16.vlgmr.msra.gmra.mxu0 %v5307_v46  ;;  %7001 = vmatmul.mubr.bf16.vlgmr.msra.gmra.mxu1 %v5307_v46  ;;  %v9385_v46 = vld [vmem:[#allocation11 + $0x1d0] ss:$8 sps:$4 sm:$0xff]  }
 0x444   :  { %v8787_v13 = vpack.c.bf16 %v9522_v47, %v9520_v23  ;;  %6378 = vmatpush1.bf16.msra.mxu0 %v9335_v25  ;;  %8822 = vmatpush3.bf16.msra.mxu1 %v9339_v45  ;;  %v9387_v25 = vld [vmem:[#allocation11 + $0x1d4] ss:$8 sps:$4 sm:$0xff]   ;;  %v9388_v45 = vld [vmem:[#allocation16 + $0x168] sm:$0xff]  }
 0x445   :  { %6379 = vmatprep.subr.bf16.mxu0 %v9342_v1  ;;  %8823 = vmatprep.subr.bf16.mxu1 %v9343_v14  ;;  %v9524_v60 = vpop.eup %9523  ;;  %v9389_v1 = vld [vmem:[#allocation16 + $0x128] sm:$0xff]  }
 0x446   :  { %6686 = vst [vmem:[#allocation23 + $0x80] sm:$0xff] %v8787_v13  ;;  %v5309_v33 = vpack.c.bf16 %v9524_v60, %v9520_v23  ;;  %v9392_v14 = vld [vmem:[#allocation11 + $0x1c4] ss:$8 sps:$4 sm:$0xff]   ;;  %v9398_v13 = vld [vmem:[#allocation16 + $0x158] sm:$0xff]  }
 0x447   :  { %v9526_v15 = vpop.eup %9525  ;;  %v9393_v23 = vld [vmem:[#allocation16 + $0x160] sm:$0xff]  }
 0x448   :  { %v8788_v41 = vpack.c.bf16 %v9526_v15, %v9524_v60  ;;  %6380 = vmatpush1.bf16.msra.mxu0 %v9340_v52  ;;  %8824 = vmatpush3.bf16.msra.mxu1 %v9344_v17  ;;  %v5310_v61 = vpack.c.bf16 %v9526_v15, %v9522_v47  ;;  %v9397_v47 = vld [vmem:[#allocation11 + $0x1b4] ss:$8 sps:$4 sm:$0xff]   ;;  %v9395_v52 = vld [vmem:[#allocation11 + $0x1b0] ss:$8 sps:$4 sm:$0xff]  }
 0x449   :  { %6381 = vmatprep.subr.bf16.mxu0 %v9347_v8  ;;  %8825 = vmatprep.subr.bf16.mxu1 %v9348_v9  ;;  %v9399_v17 = vld [vmem:[#allocation16 + $0x118] sm:$0xff]   ;;  %v9402_v8 = vld [vmem:[#allocation11 + $0x1a4] ss:$8 sps:$4 sm:$0xff]   ;;  %v9403_v9 = vld [vmem:[#allocation16 + $0x150] sm:$0xff]  }
 0x44a   :  { %6687 = vst [vmem:[#allocation23 + $0xb0] sm:$0xff] %v8788_v41  ;;  %5673 = vmatprep.mubr.bf16.mxu0 %v5310_v61  ;;  %7008 = vmatprep.mubr.bf16.mxu1 %v5310_v61  ;;  %v9407_v60 = vld [vmem:[#allocation11 + $0x194] ss:$8 sps:$4 sm:$0xff]   ;;  %v9408_v15 = vld [vmem:[#allocation16 + $0x148] sm:$0xff]  }
 0x44b   :  { %5674 = vmatmul.mubr.bf16.gmra.mxu0 %v5309_v33  ;;  %7009 = vmatmul.mubr.bf16.gmra.mxu1 %v5309_v33  ;;  %v9405_v41 = vld [vmem:[#allocation11 + $0x190] ss:$8 sps:$4 sm:$0xff]   ;;  %v9410_v33 = vld [vmem:[#allocation11 + $0x180] ss:$8 sps:$4 sm:$0xff]  }
 0x44c   :  { %6382 = vmatpush1.bf16.msra.mxu0 %v9345_v5  ;;  %8826 = vmatpush3.bf16.msra.mxu1 %v9349_v63  ;;  %v9409_v61 = vld [vmem:[#allocation16 + $0x108] sm:$0xff]   ;;  %v9413_v63 = vld [vmem:[#allocation16 + $0x140] sm:$0xff]  }
 0x44d   :  { %6409 = vmatprep.mubr.bf16.mxu0 %v10381_v32  ;;  %7433 = vmatprep.mubr.bf16.mxu1 %v10224_v56  ;;  %v9368_v56 = vld [vmem:[#allocation16 + $0x48] sm:$0xff]  }
 0x44e   :  { %6383 = vmatprep.subr.bf16.mxu0 %v9352_v59  ;;  %8827 = vmatprep.subr.bf16.mxu1 %v9353_v19  ;;  %v9412_v5 = vld [vmem:[#allocation11 + $0x184] ss:$8 sps:$4 sm:$0xff]   ;;  %v9417_v19 = vld [vmem:[#allocation11 + $0x374] ss:$8 sps:$4 sm:$0xff]  }
 0x44f   :  { %v9414_v59 = vld [vmem:[#allocation16 + $0x100] sm:$0xff]  }
 0x450   :  { %6384 = vmatpush1.bf16.msra.mxu0 %v9350_v28  ;;  %8828 = vmatpush3.bf16.msra.mxu1 %v9354_v7  ;;  %v9415_v28 = vld [vmem:[#allocation11 + $0x370] ss:$8 sps:$4 sm:$0xff]   ;;  %v9420_v7 = vld [vmem:[#allocation11 + $0x364] ss:$8 sps:$4 sm:$0xff]  }
 0x451   :  { %6385 = vmatprep.subr.bf16.mxu0 %v9357_v34  ;;  %8829 = vmatprep.subr.bf16.mxu1 %v9358_v44  ;;  %v9418_v34 = vld [vmem:[#allocation11 + $0x360] ss:$8 sps:$4 sm:$0xff]   ;;  %v9423_v44 = vld [vmem:[#allocation11 + $0x354] ss:$8 sps:$4 sm:$0xff]  }
 0x454   :  { %6386 = vmatpush1.bf16.msra.mxu0 %v9355_v42  ;;  %8830 = vmatpush3.bf16.msra.mxu1 %v9359_v51  ;;  %v9421_v42 = vld [vmem:[#allocation11 + $0x350] ss:$8 sps:$4 sm:$0xff]   ;;  %v9426_v51 = vld [vmem:[#allocation11 + $0x344] ss:$8 sps:$4 sm:$0xff]  }
 0x455   :  { %6387 = vmatprep.subr.bf16.mxu0 %v9362_v20  ;;  %8831 = vmatprep.subr.bf16.mxu1 %v9363_v36  ;;  %v9429_v20 = vld [vmem:[#allocation11 + $0x334] ss:$8 sps:$4 sm:$0xff]   ;;  %v9427_v36 = vld [vmem:[#allocation11 + $0x330] ss:$8 sps:$4 sm:$0xff]  }
 0x458   :  { %6388 = vmatpush1.bf16.msra.mxu0 %v9360_v43  ;;  %8832 = vmatpush3.bf16.msra.mxu1 %v9364_v12  ;;  %v9430_v43 = vld [vmem:[#allocation11 + $0x320] ss:$8 sps:$4 sm:$0xff]   ;;  %v9435_v12 = vld [vmem:[#allocation11 + $0x314] ss:$8 sps:$4 sm:$0xff]  }
 0x459   :  { %6389 = vmatprep.subr.bf16.mxu0 %v9367_v37  ;;  %8833 = vmatprep.subr.bf16.mxu1 %v9368_v56  ;;  %v9433_v37 = vld [vmem:[#allocation11 + $0x310] ss:$8 sps:$4 sm:$0xff]   ;;  %v9438_v56 = vld [vmem:[#allocation11 + $0x304] ss:$8 sps:$4 sm:$0xff]  }
 0x45c   :  { %6390 = vmatpush1.bf16.msra.mxu0 %v9365_v10  ;;  %8834 = vmatpush3.bf16.msra.mxu1 %v9369_v22  ;;  %v9441_v10 = vld [vmem:[#allocation11 + $0x3f4] ss:$8 sps:$4 sm:$0xff]   ;;  %v9439_v22 = vld [vmem:[#allocation11 + $0x3f0] ss:$8 sps:$4 sm:$0xff]  }
 0x45d   :  { %6391 = vmatprep.subr.bf16.mxu0 %v9372_v49  ;;  %8835 = vmatprep.subr.bf16.mxu1 %v9373_v27  ;;  %v9444_v49 = vld [vmem:[#allocation11 + $0x3e4] ss:$8 sps:$4 sm:$0xff]   ;;  %v9442_v27 = vld [vmem:[#allocation11 + $0x3e0] ss:$8 sps:$4 sm:$0xff]  }
 0x460   :  { %6392 = vmatpush1.bf16.msra.mxu0 %v9370_v53  ;;  %8836 = vmatpush3.bf16.msra.mxu1 %v9374_v21  ;;  %v9447_v53 = vld [vmem:[#allocation11 + $0x3d4] ss:$8 sps:$4 sm:$0xff]   ;;  %v9445_v21 = vld [vmem:[#allocation11 + $0x3d0] ss:$8 sps:$4 sm:$0xff]  }
 0x461   :  { %6393 = vmatprep.subr.bf16.mxu0 %v9377_v0  ;;  %8877 = vmatprep.subr.bf16.mxu1 %v9378_v4  ;;  %v9450_v0 = vld [vmem:[#allocation11 + $0x3c4] ss:$8 sps:$4 sm:$0xff]   ;;  %v9448_v4 = vld [vmem:[#allocation11 + $0x3c0] ss:$8 sps:$4 sm:$0xff]  }
 0x463   :  { %7434 = vmatmul.mubr.bf16.vlgmr.msra.gmra.mxu1 %v10215_v24  ;;  %v9390_v24 = vld [vmem:[#allocation11 + $0x1c0] ss:$8 sps:$4 sm:$0xff]  }
 0x464   :  { %6394 = vmatpush2.bf16.msra.mxu0 %v9375_v39  ;;  %7441 = vmatprep.mubr.bf16.mxu1 %v10228_v29  ;;  %v9394_v29 = vld [vmem:[#allocation16 + $0x120] sm:$0xff]   ;;  %v9453_v39 = vld [vmem:[#allocation11 + $0x3b4] ss:$8 sps:$4 sm:$0xff]  }
 0x465   :  { %8878 = vmatpush3.bf16.msra.mxu1 %v9379_v57  ;;  %6395 = vmatprep.subr.bf16.mxu0 %v9382_v40  ;;  %v9451_v57 = vld [vmem:[#allocation11 + $0x3b0] ss:$8 sps:$4 sm:$0xff]   ;;  %v9456_v40 = vld [vmem:[#allocation11 + $0x3a4] ss:$8 sps:$4 sm:$0xff]  }
 0x466   :  { %8879 = vmatprep.subr.bf16.mxu1 %v9383_v3  ;;  %v9454_v3 = vld [vmem:[#allocation11 + $0x3a0] ss:$8 sps:$4 sm:$0xff]  }
 0x468   :  { %6396 = vmatpush2.bf16.msra.mxu0 %v9380_v54  ;;  %v9459_v54 = vld [vmem:[#allocation11 + $0x394] ss:$8 sps:$4 sm:$0xff]  }
 0x469   :  { %8880 = vmatpush3.bf16.msra.mxu1 %v9384_v55  ;;  %6397 = vmatprep.subr.bf16.mxu0 %v9387_v25  ;;  %v9457_v55 = vld [vmem:[#allocation11 + $0x390] ss:$8 sps:$4 sm:$0xff]   ;;  %v9462_v25 = vld [vmem:[#allocation11 + $0x384] ss:$8 sps:$4 sm:$0xff]  }
 0x46a   :  { %8881 = vmatprep.subr.bf16.mxu1 %v9388_v45  ;;  %v9460_v45 = vld [vmem:[#allocation11 + $0x380] ss:$8 sps:$4 sm:$0xff]  }
 0x46b   :  { %7442 = vmatmul.mubr.bf16.gmra.mxu1 %v10226_v18  ;;  %v9400_v18 = vld [vmem:[#allocation11 + $0x1a0] ss:$8 sps:$4 sm:$0xff]  }
 0x46c   :  { %6398 = vmatpush2.bf16.msra.mxu0 %v9385_v46  ;;  %7531 = vmatprep.mubr.bf16.mxu1 %v10439_v11  ;;  %v9404_v11 = vld [vmem:[#allocation16 + $0x110] sm:$0xff]   ;;  %v9463_v46 = vld [vmem:[#allocation16 + $0xf8] sm:$0xff]  }
 0x46d   :  { %8882 = vmatpush3.bf16.msra.mxu1 %v9389_v1  ;;  %6399 = vmatprep.subr.bf16.mxu0 %v9392_v14  ;;  %v9464_v1 = vld [vmem:[#allocation16 + $0xb8] sm:$0xff]   ;;  %v9465_v14 = vld [vmem:[#allocation16 + $0xf0] sm:$0xff]  }
 0x46e   :  { %8883 = vmatprep.subr.bf16.mxu1 %v9393_v23  ;;  %v9466_v23 = vld [vmem:[#allocation16 + $0xb0] sm:$0xff]  }
 0x470   :  { %6400 = vmatpush2.bf16.msra.mxu0 %v9390_v24  ;;  %v9467_v24 = vld [vmem:[#allocation16 + $0xe8] sm:$0xff]  }
 0x471   :  { %8884 = vmatpush3.bf16.msra.mxu1 %v9394_v29  ;;  %6401 = vmatprep.subr.bf16.mxu0 %v9397_v47  ;;  %v9468_v29 = vld [vmem:[#allocation16 + $0xa8] sm:$0xff]   ;;  %v9469_v47 = vld [vmem:[#allocation16 + $0xe0] sm:$0xff]  }
 0x472   :  { %8885 = vmatprep.subr.bf16.mxu1 %v9398_v13  ;;  %v9470_v13 = vld [vmem:[#allocation16 + $0xa0] sm:$0xff]  }
 0x474   :  { %6402 = vmatpush2.bf16.msra.mxu0 %v9395_v52  ;;  %v9471_v52 = vld [vmem:[#allocation16 + $0xd8] sm:$0xff]  }
 0x475   :  { %8886 = vmatpush3.bf16.msra.mxu1 %v9399_v17  ;;  %6403 = vmatprep.subr.bf16.mxu0 %v9402_v8  ;;  %v9472_v17 = vld [vmem:[#allocation16 + $0x98] sm:$0xff]   ;;  %v9473_v8 = vld [vmem:[#allocation16 + $0xd0] sm:$0xff]  }
 0x476   :  { %8887 = vmatprep.subr.bf16.mxu1 %v9403_v9  ;;  %v9495_v9 = vld [vmem:[#allocation19 + $0x78] sm:$0xff]  }
 0x478   :  { %6404 = vmatpush2.bf16.msra.mxu0 %v9400_v18  ;;  %v9496_v18 = vld [vmem:[#allocation19 + $0x38] sm:$0xff]  }
 0x479   :  { %8888 = vmatpush3.bf16.msra.mxu1 %v9404_v11  ;;  %6405 = vmatprep.subr.bf16.mxu0 %v9407_v60  ;;  %v9474_v11 = vld [vmem:[#allocation16 + $0x90] sm:$0xff]   ;;  %v9475_v60 = vld [vmem:[#allocation16 + $0xc8] sm:$0xff]  }
 0x47a   :  { %8889 = vmatprep.subr.bf16.mxu1 %v9408_v15  ;;  %v9476_v15 = vld [vmem:[#allocation16 + $0x88] sm:$0xff]  }
 0x47c   :  { %6406 = vmatpush2.bf16.msra.mxu0 %v9405_v41  ;;  %v9477_v41 = vld [vmem:[#allocation16 + $0xc0] sm:$0xff]  }
 0x47d   :  { %8890 = vmatpush3.bf16.msra.mxu1 %v9409_v61  ;;  %6407 = vmatprep.subr.bf16.mxu0 %v9412_v5  ;;  %v9479_v61 = vld [vmem:[#allocation16 + $0x1f8] sm:$0xff]  }
 0x47e   :  { %8891 = vmatprep.subr.bf16.mxu1 %v9413_v63  ;;  %v9480_v5 = vld [vmem:[#allocation16 + $0x1b8] sm:$0xff]   ;;  %v9481_v63 = vld [vmem:[#allocation16 + $0x1f0] sm:$0xff]  }
 0x480   :  { %6408 = vmatpush2.bf16.msra.mxu0 %v9410_v33  ;;  %v9482_v33 = vld [vmem:[#allocation16 + $0x1b0] sm:$0xff]  }
 0x481   :  { %8892 = vmatpush3.bf16.msra.mxu1 %v9414_v59  ;;  %6483 = vmatprep.subr.bf16.mxu0 %v9417_v19  ;;  %v9483_v59 = vld [vmem:[#allocation16 + $0x1e8] sm:$0xff]  }
 0x482   :  { %8933 = vmatprep.subr.bf16.mxu1 %v9495_v9  ;;  %v9484_v19 = vld [vmem:[#allocation16 + $0x1a8] sm:$0xff]  }
 0x483   :  { %6410 = vmatmul.mubr.bf16.vlgmr.msra.gmra.mxu0 %v10357_v31 }
 0x484   :  { %7532 = vmatmul.mubr.bf16.vlgmr.msra.gmra.mxu1 %v10466_v16  ;;  %6419 = vmatprep.mubr.bf16.mxu0 %v10370_v30  ;;  %v9424_v16 = vld [vmem:[#allocation11 + $0x340] ss:$8 sps:$4 sm:$0xff]  }
 0x485   :  { %6484 = vmatpush1.bf16.msra.mxu0 %v9415_v28  ;;  %7539 = vmatprep.mubr.bf16.mxu1 %v10472_v26  ;;  %v9432_v26 = vld [vmem:[#allocation11 + $0x324] ss:$8 sps:$4 sm:$0xff]  }
 0x486   :  { %6485 = vmatprep.subr.bf16.mxu0 %v9420_v7  ;;  %8934 = vmatpush3.bf16.msra.mxu1 %v9496_v18  ;;  %v9485_v28 = vld [vmem:[#allocation16 + $0x1e0] sm:$0xff]  }
 0x487   :  { %v9486_v7 = vld [vmem:[#allocation16 + $0x1a0] sm:$0xff]  }
 0x489   :  { %6486 = vmatpush1.bf16.msra.mxu0 %v9418_v34  ;;  %v9487_v34 = vld [vmem:[#allocation16 + $0x1d8] sm:$0xff]  }
 0x48a   :  { %6487 = vmatprep.subr.bf16.mxu0 %v9423_v44  ;;  %v9490_v44 = vld [vmem:[#allocation16 + $0x190] sm:$0xff]  }
 0x48b   :  { %6420 = vmatmul.mubr.bf16.gmra.mxu0 %v10368_v38 }
 0x48c   :  { %7540 = vmatmul.mubr.bf16.gmra.mxu1 %v10480_v35  ;;  %6515 = vmatprep.mubr.bf16.mxu0 %v10485_v50  ;;  %v9436_v35 = vld [vmem:[#allocation11 + $0x300] ss:$8 sps:$4 sm:$0xff]  }
 0x48d   :  { %6488 = vmatpush1.bf16.msra.mxu0 %v9421_v42  ;;  %v9491_v42 = vld [vmem:[#allocation16 + $0x1c8] sm:$0xff]  }
 0x48e   :  { %6489 = vmatprep.subr.bf16.mxu0 %v9426_v51  ;;  %v9492_v51 = vld [vmem:[#allocation16 + $0x188] sm:$0xff]  }
 0x491   :  { %6490 = vmatpush1.bf16.msra.mxu0 %v9424_v16  ;;  %v9493_v16 = vld [vmem:[#allocation16 + $0x1c0] sm:$0xff]  }
 0x492   :  { %6491 = vmatprep.subr.bf16.mxu0 %v9429_v20  ;;  %v9498_v20 = vld [vmem:[#allocation19 + $0x30] sm:$0xff]  }
 0x495   :  { %6492 = vmatpush1.bf16.msra.mxu0 %v9427_v36  ;;  %v9499_v36 = vld [vmem:[#allocation19 + $0x68] sm:$0xff]  }
 0x496   :  { %6493 = vmatprep.subr.bf16.mxu0 %v9432_v26  ;;  %v9500_v26 = vld [vmem:[#allocation19 + $0x28] sm:$0xff]  }
 0x499   :  { %6494 = vmatpush1.bf16.msra.mxu0 %v9430_v43  ;;  %v9501_v43 = vld [vmem:[#allocation19 + $0x60] sm:$0xff]  }
 0x49a   :  { %6495 = vmatprep.subr.bf16.mxu0 %v9435_v12  ;;  %v9502_v12 = vld [vmem:[#allocation19 + $0x20] sm:$0xff]  }
 0x49d   :  { %6496 = vmatpush1.bf16.msra.mxu0 %v9433_v37  ;;  %v9503_v37 = vld [vmem:[#allocation19 + $0x58] sm:$0xff]  }
 0x49e   :  { %6497 = vmatprep.subr.bf16.mxu0 %v9438_v56  ;;  %v9504_v56 = vld [vmem:[#allocation19 + $0x18] sm:$0xff]  }
 0x4a1   :  { %6498 = vmatpush1.bf16.msra.mxu0 %v9436_v35  ;;  %v9505_v35 = vld [vmem:[#allocation19 + $0x50] sm:$0xff]  }
 0x4a2   :  { %6499 = vmatprep.subr.bf16.mxu0 %v9441_v10  ;;  %v9508_v10 = vld [vmem:[#allocation19 + $0x8] sm:$0xff]  }
 0x4a5   :  { %6500 = vmatpush2.bf16.msra.mxu0 %v9439_v22  ;;  %v9509_v22 = vld [vmem:[#allocation19 + $0x40] sm:$0xff]  }
 0x4a6   :  { %6501 = vmatprep.subr.bf16.mxu0 %v9444_v49  ;;  %v9510_v49 = vld [vmem:[#allocation19] sm:$0xff]  }
 0x4a9   :  { %6502 = vmatpush2.bf16.msra.mxu0 %v9442_v27 }
 0x4aa   :  { %6503 = vmatprep.subr.bf16.mxu0 %v9447_v53 }
 0x4ad   :  { %6504 = vmatpush2.bf16.msra.mxu0 %v9445_v21 }
 0x4ae   :  { %6505 = vmatprep.subr.bf16.mxu0 %v9450_v0  ;;  %v6358_v0 = vpop.f32.mrf.mxu1 }
 0x4b1   :  { %6506 = vmatpush2.bf16.msra.mxu0 %v9448_v4 }
 0x4b2   :  { %6507 = vmatprep.subr.bf16.mxu0 %v9453_v39  ;;  %v6360_v39 = vpop.f32.mrf.mxu1 }
 0x4b5   :  { %6508 = vmatpush2.bf16.msra.mxu0 %v9451_v57 }
 0x4b6   :  { %6509 = vmatprep.subr.bf16.mxu0 %v9456_v40  ;;  %v6362_v40 = vpop.f32.mrf.mxu1 }
 0x4b9   :  { %6510 = vmatpush2.bf16.msra.mxu0 %v9454_v3 }
 0x4ba   :  { %6511 = vmatprep.subr.bf16.mxu0 %v9459_v54  ;;  %v6364_v54 = vpop.f32.mrf.mxu1 }
 0x4bd   :  { %6512 = vmatpush2.bf16.msra.mxu0 %v9457_v55 }
 0x4be   :  { %6513 = vmatprep.subr.bf16.mxu0 %v9462_v25  ;;  %v6368_v25 = vpop.f32.mrf.mxu1 }
 0x4c1   :  { %6514 = vmatpush2.bf16.msra.mxu0 %v9460_v45 }
 0x4c2   :  { %8849 = vmatprep.subr.bf16.mxu0 %v9463_v46  ;;  %v6370_v46 = vpop.f32.mrf.mxu1 }
 0x4c4   :  { %6516 = vmatmul.mubr.bf16.vlgmr.msra.gmra.mxu0 %v10487_v48 }
 0x4c5   :  { %6525 = vmatprep.mubr.bf16.mxu0 %v10491_v62  ;;  %8850 = vmatpush3.bf16.msra.mxu0 %v9464_v1 }
 0x4c6   :  { %8851 = vmatprep.subr.bf16.mxu0 %v9465_v14  ;;  %v6372_v14 = vpop.f32.mrf.mxu1 }
 0x4c9   :  { %8852 = vmatpush3.bf16.msra.mxu0 %v9466_v23 }
 0x4ca   :  { %8853 = vmatprep.subr.bf16.mxu0 %v9467_v24  ;;  %v6374_v24 = vpop.f32.mrf.mxu1 }
 0x4cc   :  { %6526 = vmatmul.mubr.bf16.gmra.mxu0 %v10493_v58 }
 0x4cd   :  { %8854 = vmatpush3.bf16.msra.mxu0 %v9468_v29  ;;  %7482 = vmatprep.mubr.bf16.mxu0 %v10381_v32  ;;  %v9478_v32 = vld [vmem:[#allocation16 + $0x80] sm:$0xff]  }
 0x4ce   :  { %8855 = vmatprep.subr.bf16.mxu0 %v9469_v47  ;;  %v6464_v47 = vpop.f32.mrf.mxu1 }
 0x4d1   :  { %8856 = vmatpush3.bf16.msra.mxu0 %v9470_v13 }
 0x4d2   :  { %8857 = vmatprep.subr.bf16.mxu0 %v9471_v52  ;;  %v6466_v52 = vpop.f32.mrf.mxu1 }
 0x4d5   :  { %8858 = vmatpush3.bf16.msra.mxu0 %v9472_v17 }
 0x4d6   :  { %8859 = vmatprep.subr.bf16.mxu0 %v9473_v8  ;;  %v6468_v8 = vpop.f32.mrf.mxu1 }
 0x4d9   :  { %8860 = vmatpush3.bf16.msra.mxu0 %v9474_v11 }
 0x4da   :  { %8861 = vmatprep.subr.bf16.mxu0 %v9475_v60 }
 0x4dd   :  { %8862 = vmatpush3.bf16.msra.mxu0 %v9476_v15  ;;  %v6470_v15 = vpop.f32.mrf.mxu1 }
 0x4de   :  { %8863 = vmatprep.subr.bf16.mxu0 %v9477_v41  ;;  %v6536_v41 = vld [vmem:[#allocation14] sm:$0x3] }
 0x4e1   :  { %8864 = vmatpush3.bf16.msra.mxu0 %v9478_v32 }
 0x4e2   :  { %8905 = vmatprep.subr.bf16.mxu0 %v9479_v61 }
 0x4e4   :  { %7483 = vmatmul.mubr.bf16.vlgmr.msra.gmra.mxu0 %v10357_v31  ;;  %v9488_v31 = vld [vmem:[#allocation16 + $0x198] sm:$0xff]  }
 0x4e5   :  { %7490 = vmatprep.mubr.bf16.mxu0 %v10370_v30  ;;  %8906 = vmatpush3.bf16.msra.mxu0 %v9480_v5  ;;  %v9489_v30 = vld [vmem:[#allocation16 + $0x1d0] sm:$0xff]  }
 0x4e6   :  { %8907 = vmatprep.subr.bf16.mxu0 %v9481_v63 }
 0x4e9   :  { %8908 = vmatpush3.bf16.msra.mxu0 %v9482_v33 }
 0x4ea   :  { %8909 = vmatprep.subr.bf16.mxu0 %v9483_v59 }
 0x4ec   :  { %7491 = vmatmul.mubr.bf16.gmra.mxu0 %v10368_v38  ;;  %v9494_v38 = vld [vmem:[#allocation16 + $0x180] sm:$0xff]  }
 0x4ed   :  { %8910 = vmatpush3.bf16.msra.mxu0 %v9484_v19  ;;  %7580 = vmatprep.mubr.bf16.mxu0 %v10485_v50  ;;  %v9497_v50 = vld [vmem:[#allocation19 + $0x70] sm:$0xff]   ;;  %v6541_v19 = vrot.slane %v6536_v41, %v10114_v2 }
 0x4ee   :  { %8911 = vmatprep.subr.bf16.mxu0 %v9485_v28  ;;  %8935 = vmatprep.subr.bf16.mxu1 %v9497_v50  ;;  %v6474_v28 = vpop.f32.mrf.mxu1 }
 0x4ef   :  { %8936 = vmatpush3.bf16.msra.mxu1 %v9498_v20 }
 0x4f0   :  { %8937 = vmatprep.subr.bf16.mxu1 %v9499_v36 }
 0x4f1   :  { %8912 = vmatpush3.bf16.msra.mxu0 %v9486_v7 }
 0x4f2   :  { %8913 = vmatprep.subr.bf16.mxu0 %v9487_v34 }
 0x4f3   :  { %8938 = vmatpush3.bf16.msra.mxu1 %v9500_v26  ;;  %v6476_v26 = vpop.f32.mrf.mxu1 }
 0x4f4   :  { %8939 = vmatprep.subr.bf16.mxu1 %v9501_v43 }
 0x4f5   :  { %8914 = vmatpush3.bf16.msra.mxu0 %v9488_v31 }
 0x4f6   :  { %8915 = vmatprep.subr.bf16.mxu0 %v9489_v30 }
 0x4f7   :  { %8940 = vmatpush3.bf16.msra.mxu1 %v9502_v12 }
 0x4f8   :  { %8941 = vmatprep.subr.bf16.mxu1 %v9503_v37 }
 0x4f9   :  { %8916 = vmatpush3.bf16.msra.mxu0 %v9490_v44 }
 0x4fa   :  { %8917 = vmatprep.subr.bf16.mxu0 %v9491_v42  ;;  %v6545_v42 = vrot.slane %v6536_v41, %v10119_v6 }
 0x4fb   :  { %8942 = vmatpush3.bf16.msra.mxu1 %v9504_v56 }
 0x4fc   :  { %8943 = vmatprep.subr.bf16.mxu1 %v9505_v35 }
 0x4fd   :  { %8918 = vmatpush3.bf16.msra.mxu0 %v9492_v51 }
 0x4fe   :  { %8919 = vmatprep.subr.bf16.mxu0 %v9493_v16 }
 0x501   :  { %8920 = vmatpush3.bf16.msra.mxu0 %v9494_v38 }
 0x503   :  { %v5665_v27 = vpop.f32.mrf.mxu0 }
 0x504   :  { %7581 = vmatmul.mubr.bf16.vlgmr.msra.gmra.mxu0 %v10487_v48  ;;  %v9506_v48 = vld [vmem:[#allocation19 + $0x10] sm:$0xff]   ;;  %v6359_v9 = vadd.f32 %v6358_v0, %v5665_v27  ;;  %v6478_v27 = vpop.f32.mrf.mxu1 }
 0x505   :  { %7588 = vmatprep.mubr.bf16.mxu0 %v10491_v62  ;;  %8944 = vmatpush3.bf16.msra.mxu1 %v9506_v48  ;;  %v9507_v62 = vld [vmem:[#allocation19 + $0x48] sm:$0xff]  }
 0x506   :  { %8945 = vmatprep.subr.bf16.mxu1 %v9507_v62 }
 0x509   :  { %8946 = vmatpush3.bf16.msra.mxu1 %v9508_v10 }
 0x50a   :  { %8947 = vmatprep.subr.bf16.mxu1 %v9509_v22 }
 0x50c   :  { %7589 = vmatmul.mubr.bf16.gmra.mxu0 %v10493_v58  ;;  %v5667_v58 = vpop.f32.mrf.mxu0 }
 0x50d   :  { %8948 = vmatpush3.bf16.msra.mxu1 %v9510_v49  ;;  %v6361_v11 = vadd.f32 %v6360_v39, %v5667_v58 }
 0x50e   :  { %v5669_v53 = vpop.f32.mrf.mxu0 }
 0x50f   :  { %v6363_v32 = vadd.f32 %v6362_v40, %v5669_v53 }
 0x510   :  { %v5671_v21 = vpop.f32.mrf.mxu0 }
 0x511   :  { %v6365_v63 = vadd.f32 %v6364_v54, %v5671_v21  ;;  %v6480_v54 = vpop.f32.mrf.mxu1 }
 0x512   :  { %v5675_v4 = vpop.f32.mrf.mxu0 }
 0x513   :  { %v6369_v7 = vadd.f32 %v6368_v25, %v5675_v4 }
 0x514   :  { %v5677_v57 = vpop.f32.mrf.mxu0 }
 0x515   :  { %v6371_v38 = vadd.f32 %v6370_v46, %v5677_v57 }
 0x516   :  { %v5679_v3 = vpop.f32.mrf.mxu0 }
 0x517   :  { %v6373_v43 = vadd.f32 %v6372_v14, %v5679_v3 }
 0x518   :  { %v5681_v55 = vpop.f32.mrf.mxu0 }
 0x519   :  { %v6375_v48 = vadd.f32 %v6374_v24, %v5681_v55 }
 0x543   :  { %v6411_v45 = vpop.f32.mrf.mxu0 }
 0x544   :  { %v6412_v60 = vadd.f32 %v6411_v45, %v6359_v9 }
 0x545   :  { %v6413_v1 = vpop.f32.mrf.mxu0 }
 0x546   :  { %v6414_v61 = vadd.f32 %v6413_v1, %v6361_v11  ;;  %v6465_v59 = vadd.f32 %v6464_v47, %v6412_v60 }
 0x547   :  { %v6415_v23 = vpop.f32.mrf.mxu0 }
 0x548   :  { %v6416_v33 = vadd.f32 %v6415_v23, %v6363_v32  ;;  %v6467_v44 = vadd.f32 %v6466_v52, %v6414_v61 }
 0x549   :  { %v6417_v29 = vpop.f32.mrf.mxu0 }
 0x54a   :  { %v6418_v31 = vadd.f32 %v6417_v29, %v6365_v63  ;;  %v6469_v36 = vadd.f32 %v6468_v8, %v6416_v33 }
 0x54b   :  { %v6421_v13 = vpop.f32.mrf.mxu0 }
 0x54c   :  { %v6422_v51 = vadd.f32 %v6421_v13, %v6369_v7  ;;  %v6471_v35 = vadd.f32 %v6470_v15, %v6418_v31 }
 0x54d   :  { %v6423_v17 = vpop.f32.mrf.mxu0 }
 0x54e   :  { %v6424_v37 = vadd.f32 %v6423_v17, %v6371_v38  ;;  %v6475_v10 = vadd.f32 %v6474_v28, %v6422_v51 }
 0x54f   :  { %v6425_v18 = vpop.f32.mrf.mxu0 }
 0x550   :  { %v6426_v22 = vadd.f32 %v6425_v18, %v6373_v43  ;;  %v6477_v4 = vadd.f32 %v6476_v26, %v6424_v37 }
 0x551   :  { %v6427_v5 = vpop.f32.mrf.mxu0 }
 0x552   :  { %v6428_v53 = vadd.f32 %v6427_v5, %v6375_v48  ;;  %v6479_v3 = vadd.f32 %v6478_v27, %v6426_v22 }
 0x554   :  { %v6481_v46 = vadd.f32 %v6480_v54, %v6428_v53 }
 0x584   :  { %v6517_v34 = vpop.f32.mrf.mxu0 }
 0x585   :  { %v6518_v30 = vadd.f32 %v6517_v34, %v6465_v59 }
 0x586   :  { %v6519_v16 = vpop.f32.mrf.mxu0 }
 0x587   :  { %v6548_v50 = vadd.f32 %v6541_v19, %v6518_v30  ;;  %v6520_v20 = vadd.f32 %v6519_v16, %v6467_v44 }
 0x588   :  { %v6521_v12 = vpop.f32.mrf.mxu0 }
 0x589   :  { %v6549_v56 = vadd.f32 %v6545_v42, %v6520_v20  ;;  %v6522_v2 = vadd.f32 %v6521_v12, %v6469_v36  ;;  %9527 = vtanh.f32 %v6548_v50 }
 0x58a   :  { %v6523_v62 = vpop.f32.mrf.mxu0 }
 0x58b   :  { %9529 = vtanh.f32 %v6549_v56  ;;  %v6550_v6 = vadd.f32 %v6541_v19, %v6522_v2  ;;  %v6524_v49 = vadd.f32 %v6523_v62, %v6471_v35 }
 0x58c   :  { %v6527_v58 = vpop.f32.mrf.mxu0 }
 0x58d   :  { %v6551_v21 = vadd.f32 %v6545_v42, %v6524_v49  ;;  %v6528_v0 = vadd.f32 %v6527_v58, %v6475_v10  ;;  %9531 = vtanh.f32 %v6550_v6 }
 0x58e   :  { %v6529_v39 = vpop.f32.mrf.mxu0 }
 0x58f   :  { %9533 = vtanh.f32 %v6551_v21  ;;  %v6552_v57 = vadd.f32 %v6541_v19, %v6528_v0  ;;  %v6530_v40 = vadd.f32 %v6529_v39, %v6477_v4 }
 0x590   :  { %v6531_v55 = vpop.f32.mrf.mxu0 }
 0x591   :  { %v6553_v25 = vadd.f32 %v6545_v42, %v6530_v40  ;;  %v6532_v45 = vadd.f32 %v6531_v55, %v6479_v3  ;;  %9535 = vtanh.f32 %v6552_v57 }
 0x592   :  { %v6533_v1 = vpop.f32.mrf.mxu0 }
 0x593   :  { %9537 = vtanh.f32 %v6553_v25  ;;  %v6554_v14 = vadd.f32 %v6541_v19, %v6532_v45  ;;  %v6534_v23 = vadd.f32 %v6533_v1, %v6481_v46 }
 0x595   :  { %v6555_v24 = vadd.f32 %v6545_v42, %v6534_v23  ;;  %9539 = vtanh.f32 %v6554_v14 }
 0x596   :  { %v9528_v29 = vpop.eup %9527 }
 0x597   :  { %9541 = vtanh.f32 %v6555_v24 }
 0x598   :  { %v9530_v47 = vpop.eup %9529 }
 0x599   :  { %v8789_v13 = vpack.c.bf16 %v9530_v47, %v9528_v29 }
 0x59a   :  { %v9532_v52 = vpop.eup %9531 }
 0x59b   :  { %6708 = vst [vmem:[#allocation23 + $0x28] sm:$0xff] %v8789_v13  ;;  %v6564_v18 = vpack.c.bf16 %v9532_v52, %v9528_v29 }
 0x59c   :  { %v9534_v17 = vpop.eup %9533 }
 0x59d   :  { %v8790_v8 = vpack.c.bf16 %v9534_v17, %v9532_v52  ;;  %v6565_v9 = vpack.c.bf16 %v9534_v17, %v9530_v47 }
 0x59e   :  { %v9536_v11 = vpop.eup %9535 }
 0x59f   :  { %6709 = vst [vmem:[#allocation23 + $0x58] sm:$0xff] %v8790_v8  ;;  %7757 = vmatprep.mubr.bf16.mxu1 %v6565_v9 }
 0x5a0   :  { %v9538_v60 = vpop.eup %9537  ;;  %7758 = vmatmul.mubr.bf16.vlgmr.msra.gmra.mxu1 %v6564_v18 }
 0x5a1   :  { %v8791_v15 = vpack.c.bf16 %v9538_v60, %v9536_v11 }
 0x5a2   :  { %v9540_v41 = vpop.eup %9539 }
 0x5a3   :  { %6710 = vst [vmem:[#allocation23 + $0x88] sm:$0xff] %v8791_v15  ;;  %v6566_v63 = vpack.c.bf16 %v9540_v41, %v9536_v11 }
 0x5a4   :  { %v9542_v32 = vpop.eup %9541 }
 0x5a5   :  { %v8792_v61 = vpack.c.bf16 %v9542_v32, %v9540_v41  ;;  %v6567_v5 = vpack.c.bf16 %v9542_v32, %v9538_v60 }
 0x5a7   :  { %6711 = vst [vmem:[#allocation23 + $0xb8] sm:$0xff] %v8792_v61  ;;  %7765 = vmatprep.mubr.bf16.mxu1 %v6567_v5 }
 0x5a8   :  { %7766 = vmatmul.mubr.bf16.gmra.mxu1 %v6566_v63 }
 0x5a9   :  { %9796 = shalt.err (!%p9793_p8)
}
 0x5aa   :  { %s9862_s22 = smov 768   ;;  %s9863_s0 = smov 48   ;;  %v8809_v33 = vpop.f32.mrf.mxu1  ;;  %v8865_v16 = vpop.f32.mrf.mxu0 }
 0x5ab   :  { %7816 = dma.vmem_to_hbm [thread:$0]  %s7811_s11, 3072, %s10555_s13, [#allocation24], %s9862_s22, %s9862_s22, %s9863_s0  }
 0x5ac   :  { %v8810_v59 = vpop.f32.mrf.mxu1  ;;  %v8866_v50 = vpop.f32.mrf.mxu0  ;;  %s9864_s13 = smov [#allocation22]  }
 0x5ad   :  { %v8811_v39 = vadd.f32 %v8810_v59, %v8809_v33  ;;  %v8867_v57 = vadd.f32 %v8866_v50, %v8865_v16  ;;  %v8768_v33 = vld [vmem:[#allocation20] ss:$0 sm:$0xff]  ;;  %s7798_s17 = sshll.u32 %s9864_s13, 4  ;;  %s7799_s17 = int_to_ptr.vmem [resolvable:$true] %s7798_s17 }
 0x5ae   :  { %v8812_v19 = vpop.f32.mrf.mxu1  ;;  %v8868_v36 = vpop.f32.mrf.mxu0  ;;  %s9805_s20 = scalar_lea.vmem %s7799_s17, 512  ;;  %p9810_p10 = scmp.lt.s32.totalorder %s7799_s17, %s7799_s17 }
 0x5af   :  { %p9806_p9 = scmp.ne.s32.totalorder %s7799_s17, %s9805_s20  ;;  %p9811_p11 = scmp.lt.s32.totalorder %s9805_s20, %s9805_s20 }
 0x5b0   :  { %v8813_v28 = vpop.f32.mrf.mxu1  ;;  %v8869_v43 = vpop.f32.mrf.mxu0 }
 0x5b1   :  { %v8814_v25 = vadd.f32 %v8813_v28, %v8812_v19  ;;  %v8870_v46 = vadd.f32 %v8869_v43, %v8868_v36  ;;  %p9812_p12 = por %p9811_p11, %p9810_p10 }
 0x5b2   :  { %v8815_v7 = vpop.f32.mrf.mxu1  ;;  %v8871_v37 = vpop.f32.mrf.mxu0 }
 0x5b3   :  { %p9813_p13 = pnand %p9812_p12, %p9806_p9 }
 0x5b4   :  { %v8816_v34 = vpop.f32.mrf.mxu1  ;;  %v8872_v35 = vpop.f32.mrf.mxu0 }
 0x5b5   :  { %v8817_v47 = vadd.f32 %v8816_v34, %v8815_v7  ;;  %v8873_v8 = vadd.f32 %v8872_v35, %v8871_v37 }
 0x5b6   :  { %v8818_v31 = vpop.f32.mrf.mxu1  ;;  %v8874_v62 = vpop.f32.mrf.mxu0 }
 0x5b8   :  { %v8819_v30 = vpop.f32.mrf.mxu1  ;;  %v8875_v22 = vpop.f32.mrf.mxu0 }
 0x5b9   :  { %v8820_v5 = vadd.f32 %v8819_v30, %v8818_v31  ;;  %v8876_v28 = vadd.f32 %v8875_v22, %v8874_v62 }
 0x5ba   :  { %v8837_v44 = vpop.f32.mrf.mxu1 }
 0x5bc   :  { %v8838_v42 = vpop.f32.mrf.mxu1 }
 0x5bd   :  { %v8839_v0 = vadd.f32 %v8838_v42, %v8837_v44 }
 0x5be   :  { %v8840_v51 = vpop.f32.mrf.mxu1 }
 0x5bf   :  { %v7436_v3 = vadd.f32 %v8839_v0, %v8811_v39 }
 0x5c0   :  { %v8841_v38 = vpop.f32.mrf.mxu1 }
 0x5c1   :  { %v8842_v54 = vadd.f32 %v8841_v38, %v8840_v51  ;;  %v7485_v45 = vadd.f32 %v8867_v57, %v7436_v3 }
 0x5c2   :  { %v8843_v20 = vpop.f32.mrf.mxu1 }
 0x5c3   :  { %v7439_v23 = vadd.f32 %v8842_v54, %v8814_v25 }
 0x5c4   :  { %v8844_v26 = vpop.f32.mrf.mxu1  ;;  %v8921_v6 = vpop.f32.mrf.mxu0 }
 0x5c5   :  { %v8845_v1 = vadd.f32 %v8844_v26, %v8843_v20  ;;  %v7488_v17 = vadd.f32 %v8870_v46, %v7439_v23 }
 0x5c6   :  { %v8846_v12 = vpop.f32.mrf.mxu1  ;;  %v8922_v27 = vpop.f32.mrf.mxu0 }
 0x5c7   :  { %v8923_v29 = vadd.f32 %v8922_v27, %v8921_v6  ;;  %v7444_v18 = vadd.f32 %v8845_v1, %v8817_v47 }
 0x5c8   :  { %v8847_v56 = vpop.f32.mrf.mxu1  ;;  %v8924_v53 = vpop.f32.mrf.mxu0 }
 0x5c9   :  { %v8848_v11 = vadd.f32 %v8847_v56, %v8846_v12  ;;  %v7493_v19 = vadd.f32 %v8873_v8, %v7444_v18 }
 0x5ca   :  { %v8893_v2 = vpop.f32.mrf.mxu1  ;;  %v8925_v4 = vpop.f32.mrf.mxu0 }
 0x5cb   :  { %v8926_v32 = vadd.f32 %v8925_v4, %v8924_v53  ;;  %v7447_v34 = vadd.f32 %v8848_v11, %v8820_v5 }
 0x5cc   :  { %v8894_v48 = vpop.f32.mrf.mxu1  ;;  %v8927_v55 = vpop.f32.mrf.mxu0 }
 0x5cd   :  { %v8895_v24 = vadd.f32 %v8894_v48, %v8893_v2  ;;  %v7496_v43 = vadd.f32 %v8876_v28, %v7447_v34 }
 0x5ce   :  { %v8896_v10 = vpop.f32.mrf.mxu1  ;;  %v8928_v13 = vpop.f32.mrf.mxu0 }
 0x5cf   :  { %v7534_v9 = vadd.f32 %v8895_v24, %v7485_v45  ;;  %v8929_v38 = vadd.f32 %v8928_v13, %v8927_v55 }
 0x5d0   :  { %v8897_v49 = vpop.f32.mrf.mxu1  ;;  %v8930_v63 = vpop.f32.mrf.mxu0 }
 0x5d1   :  { %v8898_v15 = vadd.f32 %v8897_v49, %v8896_v10  ;;  %v7583_v41 = vadd.f32 %v8923_v29, %v7534_v9 }
 0x5d2   :  { %v8899_v58 = vpop.f32.mrf.mxu1  ;;  %v8931_v36 = vpop.f32.mrf.mxu0 }
 0x5d3   :  { %v7537_v44 = vadd.f32 %v8898_v15, %v7488_v17  ;;  %v8932_v2 = vadd.f32 %v8931_v36, %v8930_v63 }
 0x5d4   :  { %v8900_v21 = vpop.f32.mrf.mxu1 }
 0x5d5   :  { %v8901_v42 = vadd.f32 %v8900_v21, %v8899_v58  ;;  %v7586_v16 = vadd.f32 %v8926_v32, %v7537_v44 }
 0x5d6   :  { %v8902_v40 = vpop.f32.mrf.mxu1 }
 0x5d7   :  { %v7542_v12 = vadd.f32 %v8901_v42, %v7493_v19 }
 0x5d8   :  { %v8903_v14 = vpop.f32.mrf.mxu1 }
 0x5d9   :  { %v8904_v30 = vadd.f32 %v8903_v14, %v8902_v40  ;;  %v7591_v56 = vadd.f32 %v8929_v38, %v7542_v12 }
 0x5db   :  { %v7545_v10 = vadd.f32 %v8904_v30, %v7496_v43 }
 0x5dd   :  { %v7594_v49 = vadd.f32 %v8932_v2, %v7545_v10 }
 0x660   :  { %v8949_v52 = vpop.f32.mrf.mxu1 }
 0x662   :  { %v8950_v60 = vpop.f32.mrf.mxu1 }
 0x663   :  { %v8951_v61 = vadd.f32 %v8950_v60, %v8949_v52 }
 0x664   :  { %v8952_v59 = vpop.f32.mrf.mxu1 }
 0x665   :  { %v7774_v7 = vadd.f32 %v8951_v61, %v7583_v41 }
 0x666   :  { %v8953_v51 = vpop.f32.mrf.mxu1 }
 0x667   :  { %v7785_v50 = vadd.f32 %v8768_v33, %v7774_v7  ;;  %v8954_v20 = vadd.f32 %v8953_v51, %v8952_v59 }
 0x668   :  { %v8955_v26 = vpop.f32.mrf.mxu1 }
 0x669   :  { %7789 = vst [vmem:[#allocation22] sm:$0xff] %v7785_v50  ;;  %v7775_v31 = vadd.f32 %v8954_v20, %v7586_v16 }
 0x66a   :  { %v8956_v37 = vpop.f32.mrf.mxu1 }
 0x66b   :  { %v7786_v35 = vadd.f32 %v8768_v33, %v7775_v31  ;;  %v8957_v48 = vadd.f32 %v8956_v37, %v8955_v26 }
 0x66c   :  { %v8958_v62 = vpop.f32.mrf.mxu1 }
 0x66d   :  { %7790 = vst [vmem:[#allocation22 + $0x8] sm:$0xff] %v7786_v35  ;;  %v7776_v22 = vadd.f32 %v8957_v48, %v7591_v56 }
 0x66e   :  { %v8959_v6 = vpop.f32.mrf.mxu1 }
 0x66f   :  { %v7787_v27 = vadd.f32 %v8768_v33, %v7776_v22  ;;  %v8960_v58 = vadd.f32 %v8959_v6, %v8958_v62 }
 0x671   :  { %7791 = vst [vmem:[#allocation22 + $0x10] sm:$0xff] %v7787_v27  ;;  %v7777_v53 = vadd.f32 %v8960_v58, %v7594_v49 }
 0x673   :  { %v7788_v21 = vadd.f32 %v8768_v33, %v7777_v53 }
 0x675   :  { %7792 = vst [vmem:[#allocation22 + $0x18] sm:$0xff] %v7788_v21 }
 0x676   :  { %9816 = shalt.err (!%p9813_p13)
}
 0x677   :  { %7804 = dma.vmem_to_hbm [thread:$0]  %s7799_s17, 512, %s10554_s12, [#allocation4], %s9847_s18, %s9847_s18, %s9848_s19  }
 0x678   :  { %9839 = dma.done.wait [#allocation4], 512  }
 0x679   :  { %9840 = vsyncadd [#allocation4], 4294966784 }
 0x67a   :  { %9841 = dma.done.wait [#allocation24], 3072  }
 0x67b   :  { %9842 = vsyncadd [#allocation24], 4294964224 }
 0x67c   :  { %7823 = vsyncpa [#allocation3], 1 }
 0x67d   :  { %7824 = vsyncpa [#allocation6], 1 }
 0x67e   :  { %7825 = vsyncpa [#allocation9], 1 }
 0x67f   :  { %7826 = vsyncpa [#allocation12], 1 }
 0x680   :  { %7827 = vsyncpa [#allocation15], 1 }
 0x681   :  { %7828 = vsyncpa [#allocation18], 1 }
 0x682   :  { %7829 = vsyncpa [#allocation21], 1 }
 0x683   :  { %7830 = vsyncpa [#allocation4], 1 }
 0x684   :  { %7831 = vsyncpa [#allocation24], 1 }

</bundles_post_ra>
